<compile_context>
chip_gen: v6e
topology: v6e:2x2x1
jax: 0.10.0
libtpu: 0.0.40
codegen_flags: <defaults>
</compile_context>

<pallas_src>
import jax
import jax.numpy as jnp
import numpy as np
from jax.experimental import pallas as pl
from jax.experimental.pallas import tpu as pltpu


def _round_up(n, m):
    return (n + m - 1) // m * m


def _pick_lane_tile(n_pad):
    """Largest lane tile in {512,256,128} giving >=4 (else >=2) grid steps."""
    for min_steps in (4, 2):
        for t in (512, 256, 128):
            if n_pad % t == 0 and n_pad // t >= min_steps:
                return t
    return n_pad


def _pool_parity_taps(xpad, r, c, Ho, Wo):
    """25 taps (Cin,B,Ho,Wo) of the conv window landing on pool offset (r,c)."""
    return [xpad[:, :, r + di: r + di + 2 * Ho: 2, c + dj: c + dj + 2 * Wo: 2]
            for di in range(5) for dj in range(5)]


# ------------------------- fused conv5x5 + maxpool2 ------------------------ #
def _conv_pool_kernel(w_ref, b_ref, cols_ref, o_ref):
    """maxpool2x2(conv5x5(x)) for one lane tile, output (Cout, TN) bf16."""
    w = w_ref[...]                                                # (Cout, Kp) bf16
    y = jnp.dot(w, cols_ref[0], preferred_element_type=jnp.float32)
    for p in range(1, 4):                                         # running max
        y = jnp.maximum(
            y, jnp.dot(w, cols_ref[p], preferred_element_type=jnp.float32))
    o_ref[...] = (y + b_ref[...]).astype(o_ref.dtype)             # f32 bias, bf16 store


def conv5x5_pool2(x, w, b):
    """Conv2d(k=5, pad=2, stride=1) + MaxPool2d(2) on channel-major input.

    x: (Cin, B, H, W) any float dtype.  Returns bf16 (Cout, B, H//2, W//2).
    """
    Cin, B, H, W = x.shape
    Cout = w.shape[0]
    Ho, Wo = H // 2, W // 2
    L = Ho * Wo
    N = B * L                                  # batch folded into the lane axis
    K = Cin * 25
    Kp = _round_up(K, 16)                      # bf16 sublane packing
    N_pad = _round_up(N, 128)
    TN = _pick_lane_tile(N_pad)

    xpad = jnp.pad(x, ((0, 0), (0, 0), (2, 2), (2, 2))).astype(jnp.bfloat16)

    parities = []
    for r in range(2):
        for c in range(2):
            taps = _pool_parity_taps(xpad, r, c, Ho, Wo)      # 25 x (Cin,B,Ho,Wo)
            parities.append(jnp.stack(taps, axis=1).reshape(K, N))
    cols = jnp.stack(parities, axis=0)                        # (4, K, N) bf16
    cols = jnp.pad(cols, ((0, 0), (0, Kp - K), (0, N_pad - N)))

    # PyTorch (Cout, Cin, 5, 5) row-major reshape -> k = ci*25 + di*5 + dj.
    wmat = jnp.pad(w.reshape(Cout, K).astype(jnp.bfloat16), ((0, 0), (0, Kp - K)))
    bcol = b.reshape(Cout, 1).astype(jnp.float32)

    out = pl.pallas_call(
        _conv_pool_kernel,
        out_shape=jax.ShapeDtypeStruct((Cout, N_pad), jnp.bfloat16),
        grid=(N_pad // TN,),
        in_specs=[
            pl.BlockSpec((Cout, Kp), lambda i: (0, 0)),       # weights resident
            pl.BlockSpec((Cout, 1), lambda i: (0, 0)),        # bias resident
            pl.BlockSpec((4, Kp, TN), lambda i: (0, 0, i)),   # 4 parities, 1 stream
        ],
        out_specs=pl.BlockSpec((Cout, TN), lambda i: (0, i)), # lane-dense slab
        compiler_params=pltpu.CompilerParams(
            dimension_semantics=("parallel",)),
    )(wmat, bcol, cols)
    return out[:, :N].reshape(Cout, B, Ho, Wo)


# ---------- fused conv5x5 + maxpool2 + Flatten + Linear + Linear ----------- #
def _conv_pool_fc_kernel(colsT_ref, w3t_ref, b3_ref, w1t_ref, b1_ref,
                         w2t_ref, b2_ref, o_ref, y3_ref, flat_ref):
    w3t = w3t_ref[...]                                            # (Kp, Cout) bf16
    y = jnp.dot(colsT_ref[0], w3t, preferred_element_type=jnp.float32)
    for p in range(1, 4):                                         # running max
        y = jnp.maximum(
            y, jnp.dot(colsT_ref[p], w3t, preferred_element_type=jnp.float32))
    y3_ref[...] = y + b3_ref[...]                                 # (L*B, Cout) f32

    M, Cout = y3_ref.shape
    B = o_ref.shape[0]
    L = M // B
    # Flatten: flat[b, l*Cout + c] = conv3_pool[c, b, l] (matches the
    # column-permuted FC1 weight built in the wrapper).  Rows are l-major,
    # so each spatial position is one contiguous (B, Cout) block copy.
    for l in range(L):
        flat_ref[:, l * Cout:(l + 1) * Cout] = y3_ref[l * B:(l + 1) * B, :]

    h = jnp.dot(flat_ref[...].astype(jnp.bfloat16), w1t_ref[...],
                preferred_element_type=jnp.float32) + b1_ref[...]           # (B, 64)
    o_ref[...] = (jnp.dot(h.astype(jnp.bfloat16), w2t_ref[...],
                          preferred_element_type=jnp.float32)
                  + b2_ref[...]).astype(o_ref.dtype)                        # (B, 10)


def conv_pool_fc2(x, w3, b3, wl1, bl1, wl2, bl2):
    """Last stage fused: conv+pool -> Flatten -> Linear(1024,64) -> Linear(64,10)."""
    Cin, B, H, W = x.shape
    Cout = w3.shape[0]
    Ho, Wo = H // 2, W // 2
    L = Ho * Wo
    M = L * B                                   # conv3 matmul rows, l-major over b
    K = Cin * 25
    Kp = _round_up(K, 16)
    Hd = wl1.shape[0]
    O = wl2.shape[0]
    assert wl1.shape[1] == Cout * L, "Flatten size must match Linear in_features"

    xpad = jnp.pad(x, ((0, 0), (0, 0), (2, 2), (2, 2))).astype(jnp.bfloat16)

    parities = []
    for r in range(2):
        for c in range(2):
            taps = _pool_parity_taps(xpad, r, c, Ho, Wo)      # 25 x (Cin,B,Ho,Wo)
            t = jnp.stack(taps, axis=-1)                       # (Cin,B,Ho,Wo,25)
            t = jnp.transpose(t, (2, 3, 1, 0, 4))              # (Ho,Wo,B,Cin,25)
            parities.append(t.reshape(M, K))                   # row = l*B + b
    colsT = jnp.stack(parities, axis=0)                        # (4, M, K)
    colsT = jnp.pad(colsT, ((0, 0), (0, 0), (0, Kp - K)))

    w3t = jnp.pad(w3.reshape(Cout, K).astype(jnp.bfloat16),
                  ((0, 0), (0, Kp - K))).T                     # (Kp, Cout)
    b3row = b3.reshape(1, Cout).astype(jnp.float32)

    # Permute FC1 columns from torch flatten order (c*L + l) to the kernel's
    # flat order (l*Cout + c); pure weight plumbing done once by XLA.
    w1p = wl1.reshape(Hd, Cout, L).transpose(0, 2, 1).reshape(Hd, Cout * L)
    w1t = w1p.T.astype(jnp.bfloat16)                           # (Cout*L, Hd)
    b1row = bl1.reshape(1, Hd).astype(jnp.float32)
    w2t = wl2.T.astype(jnp.bfloat16)                           # (Hd, O)
    b2row = bl2.reshape(1, O).astype(jnp.float32)

    return pl.pallas_call(
        _conv_pool_fc_kernel,
        out_shape=jax.ShapeDtypeStruct((B, O), jnp.float32),
        grid=(1,),
        in_specs=[
            pl.BlockSpec((4, M, Kp), lambda i: (0, 0, 0)),
            pl.BlockSpec((Kp, Cout), lambda i: (0, 0)),
            pl.BlockSpec((1, Cout), lambda i: (0, 0)),
            pl.BlockSpec((Cout * L, Hd), lambda i: (0, 0)),
            pl.BlockSpec((1, Hd), lambda i: (0, 0)),
            pl.BlockSpec((Hd, O), lambda i: (0, 0)),
            pl.BlockSpec((1, O), lambda i: (0, 0)),
        ],
        out_specs=pl.BlockSpec((B, O), lambda i: (0, 0)),
        scratch_shapes=[pltpu.VMEM((M, Cout), jnp.float32),
                        pltpu.VMEM((B, Cout * L), jnp.float32)],
        compiler_params=pltpu.CompilerParams(
            dimension_semantics=("arbitrary",)),
    )(colsT, w3t, b3row, w1t, b1row, w2t, b2row)


# -------------------------------- forward ---------------------------------- #
def loss_nn_forward(params, x):
    (w1, b1), (w2, b2), (w3, b3), (wl1, bl1), (wl2, bl2) = params
    xc = jnp.transpose(x, (1, 0, 2, 3))                        # (Cin, B, H, W)
    y = conv5x5_pool2(xc, w1, b1)                              # (32, B, 16, 16) bf16
    y = conv5x5_pool2(y, w2, b2)                               # (32, B, 8, 8)  bf16
    return conv_pool_fc2(y, w3, b3, wl1, bl1, wl2, bl2)        # (B, 10) f32


# --------------------------- pure-JAX reference ----------------------------- #
def _reference_forward(params, x):
    (w1, b1), (w2, b2), (w3, b3), (wl1, bl1), (wl2, bl2) = params

    def conv(x, w, b):
        y = jax.lax.conv_general_dilated(
            x, w, window_strides=(1, 1), padding=((2, 2), (2, 2)),
            dimension_numbers=("NCHW", "OIHW", "NCHW"),
            precision=jax.lax.Precision.HIGHEST)
        return y + b[None, :, None, None]

    def pool(x):
        return jax.lax.reduce_window(
            x, jnp.array(-jnp.inf, dtype=x.dtype), jax.lax.max,
            window_dimensions=(1, 1, 2, 2), window_strides=(1, 1, 2, 2),
            padding="VALID")

    y = pool(conv(x, w1, b1))
    y = pool(conv(y, w2, b2))
    y = pool(conv(y, w3, b3))
    y = y.reshape(y.shape[0], -1)
    y = y @ wl1.T + bl1
    y = y @ wl2.T + bl2
    return y


# ------------------------------ param init --------------------------------- #
def init_params(key):
    ks = jax.random.split(key, 5)

    def conv_p(k, cout, cin, ksz=5):
        k1, k2 = jax.random.split(k)
        scale = 1.0 / jnp.sqrt(cin * ksz * ksz)
        w = jax.random.uniform(k1, (cout, cin, ksz, ksz), jnp.float32, -scale, scale)
        b = jax.random.uniform(k2, (cout,), jnp.float32, -scale, scale)
        return w, b

    def lin_p(k, cout, cin):
        k1, k2 = jax.random.split(k)
        scale = 1.0 / jnp.sqrt(cin)
        w = jax.random.uniform(k1, (cout, cin), jnp.float32, -scale, scale)
        b = jax.random.uniform(k2, (cout,), jnp.float32, -scale, scale)
        return w, b

    return (
        conv_p(ks[0], 32, 3),
        conv_p(ks[1], 32, 32),
        conv_p(ks[2], 64, 32),
        lin_p(ks[3], 64, 1024),
        lin_p(ks[4], 10, 64),
    )


if __name__ == "__main__":
    key = jax.random.PRNGKey(0)
    k_params, k_x = jax.random.split(key)
    params = init_params(k_params)
    # Flatten -> Linear(1024, 64) pins the input to 3x32x32.
    x = jax.random.normal(k_x, (2, 3, 32, 32), dtype=jnp.float32)

    out = jax.jit(loss_nn_forward)(params, x)
    out = jax.block_until_ready(out)
    assert out.shape == (2, 10), out.shape

    # Sanity check vs. a pure-JAX reference (bf16 matmul operands -> loose tol).
    ref = jax.block_until_ready(_reference_forward(params, x))
    np.testing.assert_allclose(np.asarray(out), np.asarray(ref),
                               rtol=5e-2, atol=5e-2)
    print("KERNEL_OK")
</pallas_src>

<mosaic_0001>
module attributes {stable_mosaic.version = 11 : i64} {
  func.func @_conv_pool_kernel(%arg0: i32, %arg1: memref<32x80xbf16, #tpu.memory_space<vmem>>, %arg2: memref<32x1xf32, #tpu.memory_space<vmem>>, %arg3: memref<4x80x128xbf16, #tpu.memory_space<vmem>>, %arg4: memref<32x128xbf16, #tpu.memory_space<vmem>>) attributes {dimension_semantics = [#tpu.dimension_semantics<parallel>], iteration_bounds = array<i64: 4>, scalar_prefetch = 0 : i64, scratch_operands = 0 : i64, tpu.core_type = #tpu.core_type<tc>, window_params = [{pipeline_mode = #tpu.pipeline_mode<synchronous>, transform_indices = @transform_0, window_bounds = array<i64: 32, 80>}, {pipeline_mode = #tpu.pipeline_mode<synchronous>, transform_indices = @transform_1, window_bounds = array<i64: 32, 1>}, {transform_indices = @transform_2, window_bounds = array<i64: 4, 80, 128>}, {transform_indices = @transform_3, window_bounds = array<i64: 32, 128>}]} {
    %c0 = arith.constant 0 : index
    %c0_0 = arith.constant 0 : index
    %0 = vector.load %arg1[%c0, %c0_0] : memref<32x80xbf16, #tpu.memory_space<vmem>>, vector<32x80xbf16>
    %c0_1 = arith.constant 0 : index
    %c0_2 = arith.constant 0 : index
    %c0_3 = arith.constant 0 : index
    %1 = vector.load %arg3[%c0_1, %c0_2, %c0_3] : memref<4x80x128xbf16, #tpu.memory_space<vmem>>, vector<1x80x128xbf16>
    %2 = vector.shape_cast %1 : vector<1x80x128xbf16> to vector<80x128xbf16>
    %cst = arith.constant dense<0.000000e+00> : vector<32x128xf32>
    %3 = tpu.matmul %0, %2, %cst {dimension_numbers = #tpu.dot_dimension_numbers<[1], [0], [0], [1], [0, 0, 1, 1], [], []>} : vector<32x80xbf16>, vector<80x128xbf16>, vector<32x128xf32> -> vector<32x128xf32>
    %c1 = arith.constant 1 : index
    %c0_4 = arith.constant 0 : index
    %c0_5 = arith.constant 0 : index
    %4 = vector.load %arg3[%c1, %c0_4, %c0_5] : memref<4x80x128xbf16, #tpu.memory_space<vmem>>, vector<1x80x128xbf16>
    %5 = vector.shape_cast %4 : vector<1x80x128xbf16> to vector<80x128xbf16>
    %cst_6 = arith.constant dense<0.000000e+00> : vector<32x128xf32>
    %6 = tpu.matmul %0, %5, %cst_6 {dimension_numbers = #tpu.dot_dimension_numbers<[1], [0], [0], [1], [0, 0, 1, 1], [], []>} : vector<32x80xbf16>, vector<80x128xbf16>, vector<32x128xf32> -> vector<32x128xf32>
    %7 = arith.maximumf %3, %6 : vector<32x128xf32>
    %c2 = arith.constant 2 : index
    %c0_7 = arith.constant 0 : index
    %c0_8 = arith.constant 0 : index
    %8 = vector.load %arg3[%c2, %c0_7, %c0_8] : memref<4x80x128xbf16, #tpu.memory_space<vmem>>, vector<1x80x128xbf16>
    %9 = vector.shape_cast %8 : vector<1x80x128xbf16> to vector<80x128xbf16>
    %cst_9 = arith.constant dense<0.000000e+00> : vector<32x128xf32>
    %10 = tpu.matmul %0, %9, %cst_9 {dimension_numbers = #tpu.dot_dimension_numbers<[1], [0], [0], [1], [0, 0, 1, 1], [], []>} : vector<32x80xbf16>, vector<80x128xbf16>, vector<32x128xf32> -> vector<32x128xf32>
    %11 = arith.maximumf %7, %10 : vector<32x128xf32>
    %c3 = arith.constant 3 : index
    %c0_10 = arith.constant 0 : index
    %c0_11 = arith.constant 0 : index
    %12 = vector.load %arg3[%c3, %c0_10, %c0_11] : memref<4x80x128xbf16, #tpu.memory_space<vmem>>, vector<1x80x128xbf16>
    %13 = vector.shape_cast %12 : vector<1x80x128xbf16> to vector<80x128xbf16>
    %cst_12 = arith.constant dense<0.000000e+00> : vector<32x128xf32>
    %14 = tpu.matmul %0, %13, %cst_12 {dimension_numbers = #tpu.dot_dimension_numbers<[1], [0], [0], [1], [0, 0, 1, 1], [], []>} : vector<32x80xbf16>, vector<80x128xbf16>, vector<32x128xf32> -> vector<32x128xf32>
    %15 = arith.maximumf %11, %14 : vector<32x128xf32>
    %c0_13 = arith.constant 0 : index
    %c0_14 = arith.constant 0 : index
    %16 = vector.load %arg2[%c0_13, %c0_14] : memref<32x1xf32, #tpu.memory_space<vmem>>, vector<32x1xf32>
    %17 = vector.broadcast %16 : vector<32x1xf32> to vector<32x128xf32>
    %18 = arith.addf %15, %17 : vector<32x128xf32>
    %19 = arith.truncf %18 : vector<32x128xf32> to vector<32x128xbf16>
    %c0_15 = arith.constant 0 : index
    %c0_16 = arith.constant 0 : index
    %20 = vector.load %arg4[%c0_15, %c0_16] : memref<32x128xbf16, #tpu.memory_space<vmem>>, vector<32x128xbf16>
    tpu.vector_store %arg4[%c0_15, %c0_16], %19 {strides = array<i32>} : memref<32x128xbf16, #tpu.memory_space<vmem>>, vector<32x128xbf16>,
    return
  }
  func.func @transform_0(%arg0: i32) -> (i32, i32) {
    %c0_i32 = arith.constant 0 : i32
    %c0_i32_0 = arith.constant 0 : i32
    %c0_i32_1 = arith.constant 0 : i32
    return %c0_i32, %c0_i32_0 : i32, i32
  }
  func.func @transform_1(%arg0: i32) -> (i32, i32) {
    %c0_i32 = arith.constant 0 : i32
    %c0_i32_0 = arith.constant 0 : i32
    %c0_i32_1 = arith.constant 0 : i32
    return %c0_i32, %c0_i32_0 : i32, i32
  }
  func.func @transform_2(%arg0: i32) -> (i32, i32, i32) {
    %c0_i32 = arith.constant 0 : i32
    %c0_i32_0 = arith.constant 0 : i32
    %c0_i32_1 = arith.constant 0 : i32
    return %c0_i32, %c0_i32_0, %arg0 : i32, i32, i32
  }
  func.func @transform_3(%arg0: i32) -> (i32, i32) {
    %c0_i32 = arith.constant 0 : i32
    %c0_i32_0 = arith.constant 0 : i32
    return %c0_i32, %arg0 : i32, i32
  }
}

module attributes {stable_mosaic.version = 11 : i64} {
  func.func @_conv_pool_kernel(%arg0: i32, %arg1: memref<32x800xbf16, #tpu.memory_space<vmem>>, %arg2: memref<32x1xf32, #tpu.memory_space<vmem>>, %arg3: memref<4x800x128xbf16, #tpu.memory_space<vmem>>, %arg4: memref<32x128xbf16, #tpu.memory_space<vmem>>) attributes {dimension_semantics = [#tpu.dimension_semantics<parallel>], iteration_bounds = array<i64: 1>, scalar_prefetch = 0 : i64, scratch_operands = 0 : i64, tpu.core_type = #tpu.core_type<tc>, window_params = [{pipeline_mode = #tpu.pipeline_mode<synchronous>, transform_indices = @transform_0, window_bounds = array<i64: 32, 800>}, {pipeline_mode = #tpu.pipeline_mode<synchronous>, transform_indices = @transform_1, window_bounds = array<i64: 32, 1>}, {transform_indices = @transform_2, window_bounds = array<i64: 4, 800, 128>}, {transform_indices = @transform_3, window_bounds = array<i64: 32, 128>}]} {
    %c0 = arith.constant 0 : index
    %c0_0 = arith.constant 0 : index
    %0 = vector.load %arg1[%c0, %c0_0] : memref<32x800xbf16, #tpu.memory_space<vmem>>, vector<32x800xbf16>
    %c0_1 = arith.constant 0 : index
    %c0_2 = arith.constant 0 : index
    %c0_3 = arith.constant 0 : index
    %1 = vector.load %arg3[%c0_1, %c0_2, %c0_3] : memref<4x800x128xbf16, #tpu.memory_space<vmem>>, vector<1x800x128xbf16>
    %2 = vector.shape_cast %1 : vector<1x800x128xbf16> to vector<800x128xbf16>
    %cst = arith.constant dense<0.000000e+00> : vector<32x128xf32>
    %3 = tpu.matmul %0, %2, %cst {dimension_numbers = #tpu.dot_dimension_numbers<[1], [0], [0], [1], [0, 0, 1, 1], [], []>} : vector<32x800xbf16>, vector<800x128xbf16>, vector<32x128xf32> -> vector<32x128xf32>
    %c1 = arith.constant 1 : index
    %c0_4 = arith.constant 0 : index
    %c0_5 = arith.constant 0 : index
    %4 = vector.load %arg3[%c1, %c0_4, %c0_5] : memref<4x800x128xbf16, #tpu.memory_space<vmem>>, vector<1x800x128xbf16>
    %5 = vector.shape_cast %4 : vector<1x800x128xbf16> to vector<800x128xbf16>
    %cst_6 = arith.constant dense<0.000000e+00> : vector<32x128xf32>
    %6 = tpu.matmul %0, %5, %cst_6 {dimension_numbers = #tpu.dot_dimension_numbers<[1], [0], [0], [1], [0, 0, 1, 1], [], []>} : vector<32x800xbf16>, vector<800x128xbf16>, vector<32x128xf32> -> vector<32x128xf32>
    %7 = arith.maximumf %3, %6 : vector<32x128xf32>
    %c2 = arith.constant 2 : index
    %c0_7 = arith.constant 0 : index
    %c0_8 = arith.constant 0 : index
    %8 = vector.load %arg3[%c2, %c0_7, %c0_8] : memref<4x800x128xbf16, #tpu.memory_space<vmem>>, vector<1x800x128xbf16>
    %9 = vector.shape_cast %8 : vector<1x800x128xbf16> to vector<800x128xbf16>
    %cst_9 = arith.constant dense<0.000000e+00> : vector<32x128xf32>
    %10 = tpu.matmul %0, %9, %cst_9 {dimension_numbers = #tpu.dot_dimension_numbers<[1], [0], [0], [1], [0, 0, 1, 1], [], []>} : vector<32x800xbf16>, vector<800x128xbf16>, vector<32x128xf32> -> vector<32x128xf32>
    %11 = arith.maximumf %7, %10 : vector<32x128xf32>
    %c3 = arith.constant 3 : index
    %c0_10 = arith.constant 0 : index
    %c0_11 = arith.constant 0 : index
    %12 = vector.load %arg3[%c3, %c0_10, %c0_11] : memref<4x800x128xbf16, #tpu.memory_space<vmem>>, vector<1x800x128xbf16>
    %13 = vector.shape_cast %12 : vector<1x800x128xbf16> to vector<800x128xbf16>
    %cst_12 = arith.constant dense<0.000000e+00> : vector<32x128xf32>
    %14 = tpu.matmul %0, %13, %cst_12 {dimension_numbers = #tpu.dot_dimension_numbers<[1], [0], [0], [1], [0, 0, 1, 1], [], []>} : vector<32x800xbf16>, vector<800x128xbf16>, vector<32x128xf32> -> vector<32x128xf32>
    %15 = arith.maximumf %11, %14 : vector<32x128xf32>
    %c0_13 = arith.constant 0 : index
    %c0_14 = arith.constant 0 : index
    %16 = vector.load %arg2[%c0_13, %c0_14] : memref<32x1xf32, #tpu.memory_space<vmem>>, vector<32x1xf32>
    %17 = vector.broadcast %16 : vector<32x1xf32> to vector<32x128xf32>
    %18 = arith.addf %15, %17 : vector<32x128xf32>
    %19 = arith.truncf %18 : vector<32x128xf32> to vector<32x128xbf16>
    %c0_15 = arith.constant 0 : index
    %c0_16 = arith.constant 0 : index
    %20 = vector.load %arg4[%c0_15, %c0_16] : memref<32x128xbf16, #tpu.memory_space<vmem>>, vector<32x128xbf16>
    tpu.vector_store %arg4[%c0_15, %c0_16], %19 {strides = array<i32>} : memref<32x128xbf16, #tpu.memory_space<vmem>>, vector<32x128xbf16>,
    return
  }
  func.func @transform_0(%arg0: i32) -> (i32, i32) {
    %c0_i32 = arith.constant 0 : i32
    %c0_i32_0 = arith.constant 0 : i32
    %c0_i32_1 = arith.constant 0 : i32
    return %c0_i32, %c0_i32_0 : i32, i32
  }
  func.func @transform_1(%arg0: i32) -> (i32, i32) {
    %c0_i32 = arith.constant 0 : i32
    %c0_i32_0 = arith.constant 0 : i32
    %c0_i32_1 = arith.constant 0 : i32
    return %c0_i32, %c0_i32_0 : i32, i32
  }
  func.func @transform_2(%arg0: i32) -> (i32, i32, i32) {
    %c0_i32 = arith.constant 0 : i32
    %c0_i32_0 = arith.constant 0 : i32
    %c0_i32_1 = arith.constant 0 : i32
    return %c0_i32, %c0_i32_0, %arg0 : i32, i32, i32
  }
  func.func @transform_3(%arg0: i32) -> (i32, i32) {
    %c0_i32 = arith.constant 0 : i32
    %c0_i32_0 = arith.constant 0 : i32
    return %c0_i32, %arg0 : i32, i32
  }
}

module attributes {stable_mosaic.version = 11 : i64} {
  func.func @_conv_pool_fc_kernel(%arg0: i32, %arg1: memref<4x32x800xbf16, #tpu.memory_space<vmem>>, %arg2: memref<800x64xbf16, #tpu.memory_space<vmem>>, %arg3: memref<1x64xf32, #tpu.memory_space<vmem>>, %arg4: memref<1024x64xbf16, #tpu.memory_space<vmem>>, %arg5: memref<1x64xf32, #tpu.memory_space<vmem>>, %arg6: memref<64x10xbf16, #tpu.memory_space<vmem>>, %arg7: memref<1x10xf32, #tpu.memory_space<vmem>>, %arg8: memref<2x10xf32, #tpu.memory_space<vmem>>, %arg9: memref<32x64xf32, #tpu.memory_space<vmem>>, %arg10: memref<2x1024xf32, #tpu.memory_space<vmem>>) attributes {dimension_semantics = [#tpu.dimension_semantics<arbitrary>], iteration_bounds = array<i64: 1>, scalar_prefetch = 0 : i64, scratch_operands = 2 : i64, tpu.core_type = #tpu.core_type<tc>, window_params = [{pipeline_mode = #tpu.pipeline_mode<synchronous>, transform_indices = @transform_0, window_bounds = array<i64: 4, 32, 800>}, {pipeline_mode = #tpu.pipeline_mode<synchronous>, transform_indices = @transform_1, window_bounds = array<i64: 800, 64>}, {pipeline_mode = #tpu.pipeline_mode<synchronous>, transform_indices = @transform_2, window_bounds = array<i64: 1, 64>}, {pipeline_mode = #tpu.pipeline_mode<synchronous>, transform_indices = @transform_3, window_bounds = array<i64: 1024, 64>}, {pipeline_mode = #tpu.pipeline_mode<synchronous>, transform_indices = @transform_4, window_bounds = array<i64: 1, 64>}, {pipeline_mode = #tpu.pipeline_mode<synchronous>, transform_indices = @transform_5, window_bounds = array<i64: 64, 10>}, {pipeline_mode = #tpu.pipeline_mode<synchronous>, transform_indices = @transform_6, window_bounds = array<i64: 1, 10>}, {pipeline_mode = #tpu.pipeline_mode<synchronous>, transform_indices = @transform_7, window_bounds = array<i64: 2, 10>}]} {
    %c0 = arith.constant 0 : index
    %c0_0 = arith.constant 0 : index
    %0 = vector.load %arg2[%c0, %c0_0] : memref<800x64xbf16, #tpu.memory_space<vmem>>, vector<800x64xbf16>
    %c0_1 = arith.constant 0 : index
    %c0_2 = arith.constant 0 : index
    %c0_3 = arith.constant 0 : index
    %1 = vector.load %arg1[%c0_1, %c0_2, %c0_3] : memref<4x32x800xbf16, #tpu.memory_space<vmem>>, vector<1x32x800xbf16>
    %2 = vector.shape_cast %1 : vector<1x32x800xbf16> to vector<32x800xbf16>
    %cst = arith.constant dense<0.000000e+00> : vector<32x64xf32>
    %3 = tpu.matmul %2, %0, %cst {dimension_numbers = #tpu.dot_dimension_numbers<[1], [0], [0], [1], [0, 0, 1, 1], [], []>} : vector<32x800xbf16>, vector<800x64xbf16>, vector<32x64xf32> -> vector<32x64xf32>
    %c1 = arith.constant 1 : index
    %c0_4 = arith.constant 0 : index
    %c0_5 = arith.constant 0 : index
    %4 = vector.load %arg1[%c1, %c0_4, %c0_5] : memref<4x32x800xbf16, #tpu.memory_space<vmem>>, vector<1x32x800xbf16>
    %5 = vector.shape_cast %4 : vector<1x32x800xbf16> to vector<32x800xbf16>
    %cst_6 = arith.constant dense<0.000000e+00> : vector<32x64xf32>
    %6 = tpu.matmul %5, %0, %cst_6 {dimension_numbers = #tpu.dot_dimension_numbers<[1], [0], [0], [1], [0, 0, 1, 1], [], []>} : vector<32x800xbf16>, vector<800x64xbf16>, vector<32x64xf32> -> vector<32x64xf32>
    %7 = arith.maximumf %3, %6 : vector<32x64xf32>
    %c2 = arith.constant 2 : index
    %c0_7 = arith.constant 0 : index
    %c0_8 = arith.constant 0 : index
    %8 = vector.load %arg1[%c2, %c0_7, %c0_8] : memref<4x32x800xbf16, #tpu.memory_space<vmem>>, vector<1x32x800xbf16>
    %9 = vector.shape_cast %8 : vector<1x32x800xbf16> to vector<32x800xbf16>
    %cst_9 = arith.constant dense<0.000000e+00> : vector<32x64xf32>
    %10 = tpu.matmul %9, %0, %cst_9 {dimension_numbers = #tpu.dot_dimension_numbers<[1], [0], [0], [1], [0, 0, 1, 1], [], []>} : vector<32x800xbf16>, vector<800x64xbf16>, vector<32x64xf32> -> vector<32x64xf32>
    %11 = arith.maximumf %7, %10 : vector<32x64xf32>
    %c3 = arith.constant 3 : index
    %c0_10 = arith.constant 0 : index
    %c0_11 = arith.constant 0 : index
    %12 = vector.load %arg1[%c3, %c0_10, %c0_11] : memref<4x32x800xbf16, #tpu.memory_space<vmem>>, vector<1x32x800xbf16>
    %13 = vector.shape_cast %12 : vector<1x32x800xbf16> to vector<32x800xbf16>
    %cst_12 = arith.constant dense<0.000000e+00> : vector<32x64xf32>
    %14 = tpu.matmul %13, %0, %cst_12 {dimension_numbers = #tpu.dot_dimension_numbers<[1], [0], [0], [1], [0, 0, 1, 1], [], []>} : vector<32x800xbf16>, vector<800x64xbf16>, vector<32x64xf32> -> vector<32x64xf32>
    %15 = arith.maximumf %11, %14 : vector<32x64xf32>
    %c0_13 = arith.constant 0 : index
    %c0_14 = arith.constant 0 : index
    %16 = vector.load %arg3[%c0_13, %c0_14] : memref<1x64xf32, #tpu.memory_space<vmem>>, vector<1x64xf32>
    %17 = vector.broadcast %16 : vector<1x64xf32> to vector<32x64xf32>
    %18 = arith.addf %15, %17 : vector<32x64xf32>
    %c0_15 = arith.constant 0 : index
    %c0_16 = arith.constant 0 : index
    %19 = vector.load %arg9[%c0_15, %c0_16] : memref<32x64xf32, #tpu.memory_space<vmem>>, vector<32x64xf32>
    tpu.vector_store %arg9[%c0_15, %c0_16], %18 {strides = array<i32>} : memref<32x64xf32, #tpu.memory_space<vmem>>, vector<32x64xf32>,
    %c0_17 = arith.constant 0 : index
    %c0_18 = arith.constant 0 : index
    %20 = vector.load %arg9[%c0_17, %c0_18] : memref<32x64xf32, #tpu.memory_space<vmem>>, vector<2x64xf32>
    %c0_19 = arith.constant 0 : index
    %c0_20 = arith.constant 0 : index
    %21 = vector.load %arg10[%c0_19, %c0_20] : memref<2x1024xf32, #tpu.memory_space<vmem>>, vector<2x64xf32>
    tpu.vector_store %arg10[%c0_19, %c0_20], %20 {strides = array<i32>} : memref<2x1024xf32, #tpu.memory_space<vmem>>, vector<2x64xf32>,
    %c2_21 = arith.constant 2 : index
    %c0_22 = arith.constant 0 : index
    %22 = vector.load %arg9[%c2_21, %c0_22] : memref<32x64xf32, #tpu.memory_space<vmem>>, vector<2x64xf32>
    %c0_23 = arith.constant 0 : index
    %c64 = arith.constant 64 : index
    %23 = vector.load %arg10[%c0_23, %c64] : memref<2x1024xf32, #tpu.memory_space<vmem>>, vector<2x64xf32>
    tpu.vector_store %arg10[%c0_23, %c64], %22 {strides = array<i32>} : memref<2x1024xf32, #tpu.memory_space<vmem>>, vector<2x64xf32>,
    %c4 = arith.constant 4 : index
    %c0_24 = arith.constant 0 : index
    %24 = vector.load %arg9[%c4, %c0_24] : memref<32x64xf32, #tpu.memory_space<vmem>>, vector<2x64xf32>
    %c0_25 = arith.constant 0 : index
    %c128 = arith.constant 128 : index
    %25 = vector.load %arg10[%c0_25, %c128] : memref<2x1024xf32, #tpu.memory_space<vmem>>, vector<2x64xf32>
    tpu.vector_store %arg10[%c0_25, %c128], %24 {strides = array<i32>} : memref<2x1024xf32, #tpu.memory_space<vmem>>, vector<2x64xf32>,
    %c6 = arith.constant 6 : index
    %c0_26 = arith.constant 0 : index
    %26 = vector.load %arg9[%c6, %c0_26] : memref<32x64xf32, #tpu.memory_space<vmem>>, vector<2x64xf32>
    %c0_27 = arith.constant 0 : index
    %c192 = arith.constant 192 : index
    %27 = vector.load %arg10[%c0_27, %c192] : memref<2x1024xf32, #tpu.memory_space<vmem>>, vector<2x64xf32>
    tpu.vector_store %arg10[%c0_27, %c192], %26 {strides = array<i32>} : memref<2x1024xf32, #tpu.memory_space<vmem>>, vector<2x64xf32>,
    %c8 = arith.constant 8 : index
    %c0_28 = arith.constant 0 : index
    %28 = vector.load %arg9[%c8, %c0_28] : memref<32x64xf32, #tpu.memory_space<vmem>>, vector<2x64xf32>
    %c0_29 = arith.constant 0 : index
    %c256 = arith.constant 256 : index
    %29 = vector.load %arg10[%c0_29, %c256] : memref<2x1024xf32, #tpu.memory_space<vmem>>, vector<2x64xf32>
    tpu.vector_store %arg10[%c0_29, %c256], %28 {strides = array<i32>} : memref<2x1024xf32, #tpu.memory_space<vmem>>, vector<2x64xf32>,
    %c10 = arith.constant 10 : index
    %c0_30 = arith.constant 0 : index
    %30 = vector.load %arg9[%c10, %c0_30] : memref<32x64xf32, #tpu.memory_space<vmem>>, vector<2x64xf32>
    %c0_31 = arith.constant 0 : index
    %c320 = arith.constant 320 : index
    %31 = vector.load %arg10[%c0_31, %c320] : memref<2x1024xf32, #tpu.memory_space<vmem>>, vector<2x64xf32>
    tpu.vector_store %arg10[%c0_31, %c320], %30 {strides = array<i32>} : memref<2x1024xf32, #tpu.memory_space<vmem>>, vector<2x64xf32>,
    %c12 = arith.constant 12 : index
    %c0_32 = arith.constant 0 : index
    %32 = vector.load %arg9[%c12, %c0_32] : memref<32x64xf32, #tpu.memory_space<vmem>>, vector<2x64xf32>
    %c0_33 = arith.constant 0 : index
    %c384 = arith.constant 384 : index
    %33 = vector.load %arg10[%c0_33, %c384] : memref<2x1024xf32, #tpu.memory_space<vmem>>, vector<2x64xf32>
    tpu.vector_store %arg10[%c0_33, %c384], %32 {strides = array<i32>} : memref<2x1024xf32, #tpu.memory_space<vmem>>, vector<2x64xf32>,
    %c14 = arith.constant 14 : index
    %c0_34 = arith.constant 0 : index
    %34 = vector.load %arg9[%c14, %c0_34] : memref<32x64xf32, #tpu.memory_space<vmem>>, vector<2x64xf32>
    %c0_35 = arith.constant 0 : index
    %c448 = arith.constant 448 : index
    %35 = vector.load %arg10[%c0_35, %c448] : memref<2x1024xf32, #tpu.memory_space<vmem>>, vector<2x64xf32>
    tpu.vector_store %arg10[%c0_35, %c448], %34 {strides = array<i32>} : memref<2x1024xf32, #tpu.memory_space<vmem>>, vector<2x64xf32>,
    %c16 = arith.constant 16 : index
    %c0_36 = arith.constant 0 : index
    %36 = vector.load %arg9[%c16, %c0_36] : memref<32x64xf32, #tpu.memory_space<vmem>>, vector<2x64xf32>
    %c0_37 = arith.constant 0 : index
    %c512 = arith.constant 512 : index
    %37 = vector.load %arg10[%c0_37, %c512] : memref<2x1024xf32, #tpu.memory_space<vmem>>, vector<2x64xf32>
    tpu.vector_store %arg10[%c0_37, %c512], %36 {strides = array<i32>} : memref<2x1024xf32, #tpu.memory_space<vmem>>, vector<2x64xf32>,
    %c18 = arith.constant 18 : index
    %c0_38 = arith.constant 0 : index
    %38 = vector.load %arg9[%c18, %c0_38] : memref<32x64xf32, #tpu.memory_space<vmem>>, vector<2x64xf32>
    %c0_39 = arith.constant 0 : index
    %c576 = arith.constant 576 : index
    %39 = vector.load %arg10[%c0_39, %c576] : memref<2x1024xf32, #tpu.memory_space<vmem>>, vector<2x64xf32>
    tpu.vector_store %arg10[%c0_39, %c576], %38 {strides = array<i32>} : memref<2x1024xf32, #tpu.memory_space<vmem>>, vector<2x64xf32>,
    %c20 = arith.constant 20 : index
    %c0_40 = arith.constant 0 : index
    %40 = vector.load %arg9[%c20, %c0_40] : memref<32x64xf32, #tpu.memory_space<vmem>>, vector<2x64xf32>
    %c0_41 = arith.constant 0 : index
    %c640 = arith.constant 640 : index
    %41 = vector.load %arg10[%c0_41, %c640] : memref<2x1024xf32, #tpu.memory_space<vmem>>, vector<2x64xf32>
    tpu.vector_store %arg10[%c0_41, %c640], %40 {strides = array<i32>} : memref<2x1024xf32, #tpu.memory_space<vmem>>, vector<2x64xf32>,
    %c22 = arith.constant 22 : index
    %c0_42 = arith.constant 0 : index
    %42 = vector.load %arg9[%c22, %c0_42] : memref<32x64xf32, #tpu.memory_space<vmem>>, vector<2x64xf32>
    %c0_43 = arith.constant 0 : index
    %c704 = arith.constant 704 : index
    %43 = vector.load %arg10[%c0_43, %c704] : memref<2x1024xf32, #tpu.memory_space<vmem>>, vector<2x64xf32>
    tpu.vector_store %arg10[%c0_43, %c704], %42 {strides = array<i32>} : memref<2x1024xf32, #tpu.memory_space<vmem>>, vector<2x64xf32>,
    %c24 = arith.constant 24 : index
    %c0_44 = arith.constant 0 : index
    %44 = vector.load %arg9[%c24, %c0_44] : memref<32x64xf32, #tpu.memory_space<vmem>>, vector<2x64xf32>
    %c0_45 = arith.constant 0 : index
    %c768 = arith.constant 768 : index
    %45 = vector.load %arg10[%c0_45, %c768] : memref<2x1024xf32, #tpu.memory_space<vmem>>, vector<2x64xf32>
    tpu.vector_store %arg10[%c0_45, %c768], %44 {strides = array<i32>} : memref<2x1024xf32, #tpu.memory_space<vmem>>, vector<2x64xf32>,
    %c26 = arith.constant 26 : index
    %c0_46 = arith.constant 0 : index
    %46 = vector.load %arg9[%c26, %c0_46] : memref<32x64xf32, #tpu.memory_space<vmem>>, vector<2x64xf32>
    %c0_47 = arith.constant 0 : index
    %c832 = arith.constant 832 : index
    %47 = vector.load %arg10[%c0_47, %c832] : memref<2x1024xf32, #tpu.memory_space<vmem>>, vector<2x64xf32>
    tpu.vector_store %arg10[%c0_47, %c832], %46 {strides = array<i32>} : memref<2x1024xf32, #tpu.memory_space<vmem>>, vector<2x64xf32>,
    %c28 = arith.constant 28 : index
    %c0_48 = arith.constant 0 : index
    %48 = vector.load %arg9[%c28, %c0_48] : memref<32x64xf32, #tpu.memory_space<vmem>>, vector<2x64xf32>
    %c0_49 = arith.constant 0 : index
    %c896 = arith.constant 896 : index
    %49 = vector.load %arg10[%c0_49, %c896] : memref<2x1024xf32, #tpu.memory_space<vmem>>, vector<2x64xf32>
    tpu.vector_store %arg10[%c0_49, %c896], %48 {strides = array<i32>} : memref<2x1024xf32, #tpu.memory_space<vmem>>, vector<2x64xf32>,
    %c30 = arith.constant 30 : index
    %c0_50 = arith.constant 0 : index
    %50 = vector.load %arg9[%c30, %c0_50] : memref<32x64xf32, #tpu.memory_space<vmem>>, vector<2x64xf32>
    %c0_51 = arith.constant 0 : index
    %c960 = arith.constant 960 : index
    %51 = vector.load %arg10[%c0_51, %c960] : memref<2x1024xf32, #tpu.memory_space<vmem>>, vector<2x64xf32>
    tpu.vector_store %arg10[%c0_51, %c960], %50 {strides = array<i32>} : memref<2x1024xf32, #tpu.memory_space<vmem>>, vector<2x64xf32>,
    %c0_52 = arith.constant 0 : index
    %c0_53 = arith.constant 0 : index
    %52 = vector.load %arg10[%c0_52, %c0_53] : memref<2x1024xf32, #tpu.memory_space<vmem>>, vector<2x1024xf32>
    %53 = arith.truncf %52 : vector<2x1024xf32> to vector<2x1024xbf16>
    %c0_54 = arith.constant 0 : index
    %c0_55 = arith.constant 0 : index
    %54 = vector.load %arg4[%c0_54, %c0_55] : memref<1024x64xbf16, #tpu.memory_space<vmem>>, vector<1024x64xbf16>
    %cst_56 = arith.constant dense<0.000000e+00> : vector<2x64xf32>
    %55 = tpu.matmul %53, %54, %cst_56 {dimension_numbers = #tpu.dot_dimension_numbers<[1], [0], [0], [1], [0, 0, 1, 1], [], []>} : vector<2x1024xbf16>, vector<1024x64xbf16>, vector<2x64xf32> -> vector<2x64xf32>
    %c0_57 = arith.constant 0 : index
    %c0_58 = arith.constant 0 : index
    %56 = vector.load %arg5[%c0_57, %c0_58] : memref<1x64xf32, #tpu.memory_space<vmem>>, vector<1x64xf32>
    %57 = vector.broadcast %56 : vector<1x64xf32> to vector<2x64xf32>
    %58 = arith.addf %55, %57 : vector<2x64xf32>
    %59 = arith.truncf %58 : vector<2x64xf32> to vector<2x64xbf16>
    %c0_59 = arith.constant 0 : index
    %c0_60 = arith.constant 0 : index
    %60 = vector.load %arg6[%c0_59, %c0_60] : memref<64x10xbf16, #tpu.memory_space<vmem>>, vector<64x10xbf16>
    %cst_61 = arith.constant dense<0.000000e+00> : vector<2x10xf32>
    %61 = tpu.matmul %59, %60, %cst_61 {dimension_numbers = #tpu.dot_dimension_numbers<[1], [0], [0], [1], [0, 0, 1, 1], [], []>} : vector<2x64xbf16>, vector<64x10xbf16>, vector<2x10xf32> -> vector<2x10xf32>
    %c0_62 = arith.constant 0 : index
    %c0_63 = arith.constant 0 : index
    %62 = vector.load %arg7[%c0_62, %c0_63] : memref<1x10xf32, #tpu.memory_space<vmem>>, vector<1x10xf32>
    %63 = vector.broadcast %62 : vector<1x10xf32> to vector<2x10xf32>
    %64 = arith.addf %61, %63 : vector<2x10xf32>
    %c0_64 = arith.constant 0 : index
    %c0_65 = arith.constant 0 : index
    %65 = vector.load %arg8[%c0_64, %c0_65] : memref<2x10xf32, #tpu.memory_space<vmem>>, vector<2x10xf32>
    tpu.vector_store %arg8[%c0_64, %c0_65], %64 {strides = array<i32>} : memref<2x10xf32, #tpu.memory_space<vmem>>, vector<2x10xf32>,
    return
  }
  func.func @transform_0(%arg0: i32) -> (i32, i32, i32) {
    %c0_i32 = arith.constant 0 : i32
    %c0_i32_0 = arith.constant 0 : i32
    %c0_i32_1 = arith.constant 0 : i32
    %c0_i32_2 = arith.constant 0 : i32
    return %c0_i32, %c0_i32_0, %c0_i32_1 : i32, i32, i32
  }
  func.func @transform_1(%arg0: i32) -> (i32, i32) {
    %c0_i32 = arith.constant 0 : i32
    %c0_i32_0 = arith.constant 0 : i32
    %c0_i32_1 = arith.constant 0 : i32
    return %c0_i32, %c0_i32_0 : i32, i32
  }
  func.func @transform_2(%arg0: i32) -> (i32, i32) {
    %c0_i32 = arith.constant 0 : i32
    %c0_i32_0 = arith.constant 0 : i32
    %c0_i32_1 = arith.constant 0 : i32
    return %c0_i32, %c0_i32_0 : i32, i32
  }
  func.func @transform_3(%arg0: i32) -> (i32, i32) {
    %c0_i32 = arith.constant 0 : i32
    %c0_i32_0 = arith.constant 0 : i32
    %c0_i32_1 = arith.constant 0 : i32
    return %c0_i32, %c0_i32_0 : i32, i32
  }
  func.func @transform_4(%arg0: i32) -> (i32, i32) {
    %c0_i32 = arith.constant 0 : i32
    %c0_i32_0 = arith.constant 0 : i32
    %c0_i32_1 = arith.constant 0 : i32
    return %c0_i32, %c0_i32_0 : i32, i32
  }
  func.func @transform_5(%arg0: i32) -> (i32, i32) {
    %c0_i32 = arith.constant 0 : i32
    %c0_i32_0 = arith.constant 0 : i32
    %c0_i32_1 = arith.constant 0 : i32
    return %c0_i32, %c0_i32_0 : i32, i32
  }
  func.func @transform_6(%arg0: i32) -> (i32, i32) {
    %c0_i32 = arith.constant 0 : i32
    %c0_i32_0 = arith.constant 0 : i32
    %c0_i32_1 = arith.constant 0 : i32
    return %c0_i32, %c0_i32_0 : i32, i32
  }
  func.func @transform_7(%arg0: i32) -> (i32, i32) {
    %c0_i32 = arith.constant 0 : i32
    %c0_i32_0 = arith.constant 0 : i32
    %c0_i32_1 = arith.constant 0 : i32
    return %c0_i32, %c0_i32_0 : i32, i32
  }
}

</mosaic_0001>

<bundles_post_ra>
// kernel: loss_nn_forward.3
= control target key start
LH: loop header
LB: loop body
LE: loop exit
PB: predicated region body
PF: predicated region fallthrough
CT: control target
= control target key end

     0   :  { %s1193_s12 = smov 0   ;;  %s1195_s13 = smov 0   ;;  %s1395_s0 = inlined_call_operand.vmem [shape: bf16[32,80], index: 0, kind: input, shape index: {}]   ;;  %s1396_s1 = inlined_call_operand.vmem [shape: f32[32,1], index: 1, kind: input, shape index: {}]   ;;  %s1397_s2 = inlined_call_operand.vmem [shape: bf16[4,80,512], index: 2, kind: input, shape index: {}]   ;;  %s1398_s3 = inlined_call_operand.vmem [shape: bf16[32,512], index: 3, kind: output, shape index: {}]  }
   0x1   :  { %s1197_s14 = smov 0  }
   0x2 LB: > { %s923_s15 = sadd.s32 4294967295, %s1170_s14   ;;  %s1210_s16 = sadd.s32 1, %s1170_s14   ;;  %s1170_s14 = sphi %s1197_s14, %s1402_s14   ;;  %s1166_s13 = sphi %s1195_s13, %s1401_s13   ;;  %s1162_s12 = sphi %s1193_s12, %s1400_s12  }
   0x3   : > { %s59_s17 = ssub.s32 %s1170_s14, %s1210_s16  ;;  %s62_s18 = sadd.s32 1, %s1166_s13 }
   0x4   : > { %p60_p0 = scmp.eq.s32.totalorder %s59_s17, 0  ;;  %p69_p1 = scmp.ne.s32.totalorder %s1166_s13, %s1162_s12 }
   0x5   : > { %p70_p2 = scmp.eq.s32.totalorder %s1170_s14, 0  ;;  %p99_p3 = scmp.eq.s32.totalorder %s923_s15, 3 }
   0x6   : > { %s1221_s19 = scalar_select %p60_p0, %s1166_s13, %s62_s18  }
   0x7   : > { %p71_p4 = por %p70_p2, %p69_p1  ;;  %p1223_p5 = por %p99_p3, %p69_p1 }
   0x8   : > { %p926_p6 = scmp.ge.s32.totalorder %s1170_s14, 4 }
   0xa   : > { %127 = sbr.rel (%p926_p6) target bundleno = 46 (0x2e), region = 24 }
   0xf   : > { %130 = sbr.rel (!%p71_p4) target bundleno = 46 (0x2e), region = 28  ;;  %s132_s21 = sand.u32 (%p71_p4), 1, %s1166_s13  }
  0x10   : > { %s927_s22 = sshll.u32 (%p71_p4), %s1170_s14, 2  ;;  %s1097_s23 = smul.u32 (%p71_p4), 160, %s132_s21 }
  0x11   : > { %s1233_s26 = scalar_lea.vmem (%p71_p4), %s1397_s2, %s927_s22 }
  0x12   : > { %v153_v0 = vld [vmem:[%s1233_s26] sm:$0xf] (%p71_p4)  ;;  %v155_v1 = vld [vmem:[%s1233_s26 + $0x10] sm:$0xf] (%p71_p4)  ;;  %s1240_s27 = scalar_lea.vmem (%p71_p4), [#allocation2], %s1097_s23 }
  0x13   : > { %v157_v2 = vld [vmem:[%s1233_s26 + $0x20] sm:$0xf] (%p71_p4)  ;;  %v159_v3 = vld [vmem:[%s1233_s26 + $0x30] sm:$0xf] (%p71_p4)  ;;  %154 = vst [vmem:[%s1240_s27] sm:$0xf] (%p71_p4), %v153_v0 }
  0x14   : > { %v161_v4 = vld [vmem:[%s1233_s26 + $0x40] sm:$0xf]  ;;  %156 = vst [vmem:[%s1240_s27 + $0x4] sm:$0xf] %v155_v1  ;;  %158 = vst [vmem:[%s1240_s27 + $0x8] sm:$0xf] %v157_v2 }
  0x15   : > { %160 = vst [vmem:[%s1240_s27 + $0xc] sm:$0xf] %v159_v3  ;;  %162 = vst [vmem:[%s1240_s27 + $0x10] sm:$0xf] %v161_v4  ;;  %v163_v5 = vld [vmem:[%s1233_s26 + $0x50] sm:$0xf] }
  0x16   : > { %v165_v6 = vld [vmem:[%s1233_s26 + $0x60] sm:$0xf]  ;;  %v167_v7 = vld [vmem:[%s1233_s26 + $0x70] sm:$0xf]  ;;  %164 = vst [vmem:[%s1240_s27 + $0x14] sm:$0xf] %v163_v5 }
  0x17   : > { %166 = vst [vmem:[%s1240_s27 + $0x18] sm:$0xf] %v165_v6  ;;  %168 = vst [vmem:[%s1240_s27 + $0x1c] sm:$0xf] %v167_v7  ;;  %v169_v8 = vld [vmem:[%s1233_s26 + $0x80] sm:$0xf] }
  0x18   : > { %v171_v9 = vld [vmem:[%s1233_s26 + $0x90] sm:$0xf]  ;;  %v173_v10 = vld [vmem:[%s1233_s26 + $0xa0] sm:$0xf]  ;;  %170 = vst [vmem:[%s1240_s27 + $0x20] sm:$0xf] %v169_v8 }
  0x19   : > { %172 = vst [vmem:[%s1240_s27 + $0x24] sm:$0xf] %v171_v9  ;;  %174 = vst [vmem:[%s1240_s27 + $0x28] sm:$0xf] %v173_v10  ;;  %v175_v11 = vld [vmem:[%s1233_s26 + $0xb0] sm:$0xf] }
  0x1a   : > { %v177_v12 = vld [vmem:[%s1233_s26 + $0xc0] sm:$0xf]  ;;  %v179_v13 = vld [vmem:[%s1233_s26 + $0xd0] sm:$0xf]  ;;  %176 = vst [vmem:[%s1240_s27 + $0x2c] sm:$0xf] %v175_v11 }
  0x1b   : > { %178 = vst [vmem:[%s1240_s27 + $0x30] sm:$0xf] %v177_v12  ;;  %180 = vst [vmem:[%s1240_s27 + $0x34] sm:$0xf] %v179_v13  ;;  %v181_v14 = vld [vmem:[%s1233_s26 + $0xe0] sm:$0xf] }
  0x1c   : > { %v183_v15 = vld [vmem:[%s1233_s26 + $0xf0] sm:$0xf]  ;;  %v185_v16 = vld [vmem:[%s1233_s26 + $0x100] sm:$0xf]  ;;  %182 = vst [vmem:[%s1240_s27 + $0x38] sm:$0xf] %v181_v14 }
  0x1d   : > { %184 = vst [vmem:[%s1240_s27 + $0x3c] sm:$0xf] %v183_v15  ;;  %186 = vst [vmem:[%s1240_s27 + $0x40] sm:$0xf] %v185_v16  ;;  %v187_v17 = vld [vmem:[%s1233_s26 + $0x110] sm:$0xf] }
  0x1e   : > { %v189_v18 = vld [vmem:[%s1233_s26 + $0x120] sm:$0xf]  ;;  %v191_v19 = vld [vmem:[%s1233_s26 + $0x130] sm:$0xf]  ;;  %188 = vst [vmem:[%s1240_s27 + $0x44] sm:$0xf] %v187_v17 }
  0x1f   : > { %190 = vst [vmem:[%s1240_s27 + $0x48] sm:$0xf] %v189_v18  ;;  %192 = vst [vmem:[%s1240_s27 + $0x4c] sm:$0xf] %v191_v19  ;;  %v193_v20 = vld [vmem:[%s1233_s26 + $0x140] sm:$0xf] }
  0x20   : > { %v195_v21 = vld [vmem:[%s1233_s26 + $0x150] sm:$0xf]  ;;  %v197_v22 = vld [vmem:[%s1233_s26 + $0x160] sm:$0xf]  ;;  %194 = vst [vmem:[%s1240_s27 + $0x50] sm:$0xf] %v193_v20 }
  0x21   : > { %196 = vst [vmem:[%s1240_s27 + $0x54] sm:$0xf] %v195_v21  ;;  %198 = vst [vmem:[%s1240_s27 + $0x58] sm:$0xf] %v197_v22  ;;  %v199_v23 = vld [vmem:[%s1233_s26 + $0x170] sm:$0xf] }
  0x22   : > { %v201_v24 = vld [vmem:[%s1233_s26 + $0x180] sm:$0xf]  ;;  %v203_v25 = vld [vmem:[%s1233_s26 + $0x190] sm:$0xf]  ;;  %200 = vst [vmem:[%s1240_s27 + $0x5c] sm:$0xf] %v199_v23 }
  0x23   : > { %202 = vst [vmem:[%s1240_s27 + $0x60] sm:$0xf] %v201_v24  ;;  %204 = vst [vmem:[%s1240_s27 + $0x64] sm:$0xf] %v203_v25  ;;  %v205_v26 = vld [vmem:[%s1233_s26 + $0x1a0] sm:$0xf] }
  0x24   : > { %v207_v27 = vld [vmem:[%s1233_s26 + $0x1b0] sm:$0xf]  ;;  %v209_v28 = vld [vmem:[%s1233_s26 + $0x1c0] sm:$0xf]  ;;  %206 = vst [vmem:[%s1240_s27 + $0x68] sm:$0xf] %v205_v26 }
  0x25   : > { %208 = vst [vmem:[%s1240_s27 + $0x6c] sm:$0xf] %v207_v27  ;;  %210 = vst [vmem:[%s1240_s27 + $0x70] sm:$0xf] %v209_v28  ;;  %v211_v29 = vld [vmem:[%s1233_s26 + $0x1d0] sm:$0xf] }
  0x26   : > { %v213_v30 = vld [vmem:[%s1233_s26 + $0x1e0] sm:$0xf]  ;;  %v215_v31 = vld [vmem:[%s1233_s26 + $0x1f0] sm:$0xf]  ;;  %212 = vst [vmem:[%s1240_s27 + $0x74] sm:$0xf] %v211_v29 }
  0x27   : > { %214 = vst [vmem:[%s1240_s27 + $0x78] sm:$0xf] %v213_v30  ;;  %216 = vst [vmem:[%s1240_s27 + $0x7c] sm:$0xf] %v215_v31  ;;  %v217_v32 = vld [vmem:[%s1233_s26 + $0x200] sm:$0xf] }
  0x28   : > { %v219_v33 = vld [vmem:[%s1233_s26 + $0x210] sm:$0xf]  ;;  %v221_v34 = vld [vmem:[%s1233_s26 + $0x220] sm:$0xf]  ;;  %218 = vst [vmem:[%s1240_s27 + $0x80] sm:$0xf] %v217_v32 }
  0x29   : > { %220 = vst [vmem:[%s1240_s27 + $0x84] sm:$0xf] %v219_v33  ;;  %222 = vst [vmem:[%s1240_s27 + $0x88] sm:$0xf] %v221_v34  ;;  %v223_v35 = vld [vmem:[%s1233_s26 + $0x230] sm:$0xf] }
  0x2a   : > { %v225_v36 = vld [vmem:[%s1233_s26 + $0x240] sm:$0xf]  ;;  %v227_v37 = vld [vmem:[%s1233_s26 + $0x250] sm:$0xf]  ;;  %224 = vst [vmem:[%s1240_s27 + $0x8c] sm:$0xf] %v223_v35 }
  0x2b   : > { %226 = vst [vmem:[%s1240_s27 + $0x90] sm:$0xf] %v225_v36  ;;  %228 = vst [vmem:[%s1240_s27 + $0x94] sm:$0xf] %v227_v37  ;;  %v229_v38 = vld [vmem:[%s1233_s26 + $0x260] sm:$0xf] }
  0x2c   : > { %v231_v39 = vld [vmem:[%s1233_s26 + $0x270] sm:$0xf]  ;;  %230 = vst [vmem:[%s1240_s27 + $0x98] sm:$0xf] %v229_v38 }
  0x2d   : > { %232 = vst [vmem:[%s1240_s27 + $0x9c] sm:$0xf] %v231_v39 }
  0x2e PF: > { %p928_p7 = scmp.ge.s32.totalorder %s1170_s14, 1  ;;  %p335_p8 = scmp.lt.s32.totalorder %s1170_s14, 5 }
  0x30   : > { %p336_p9 = pnand %p928_p7, %p335_p8 }
  0x31   : > { %s342_s28 = sand.u32 (!%p336_p9), 1, %s1162_s12  }
  0x32   : > { %339 = sbr.rel (%p336_p9) target bundleno = 315 (0x13b), region = 69  ;;  %s929_s23 = sshll.u32 (!%p336_p9), %s342_s28, 4 }
  0x33   : > { %s1098_s4 = smul.u32 (!%p336_p9), 160, %s342_s28  ;;  %s363_s24 = scalar_lea.vmem (!%p336_p9), [#allocation3], %s929_s23 }
  0x35   : > { %s1337_s9 = scalar_lea.vmem (!%p336_p9), [#allocation2], %s1098_s4 }
  0x37   : > { %v1323_v40 = vld [vmem:[%s1395_s0] sm:$0xff]   ;;  %vm419_vm0 = vcmask 654336   ;;  %v759_v41 = vld [vmem:[%s1396_s1 + $0x10] sm:$0xff]  ;;  %v1172_v43 = vmov 0   ;;  %v760_v45 = vld [vmem:[%s1396_s1 + $0x18] sm:$0xff]  ;;  %s995_s12 = sshll.u32 (%p1223_p5), %s923_s15, 2 }
  0x38   : > { %1051 = vmatprep.mubr.msk.bf16.mxu0 %vm419_vm0, %v1323_v40  ;;  %1065 = vmatprep.mubr.msk.bf16.mxu1 %vm419_vm0, %v1323_v40  ;;  %v757_v42 = vld [vmem:[%s1396_s1] sm:$0xff]  ;;  %v1127_v46 = vld [vmem:[%s1337_s9 + $0x48] sm:$0xff]   ;;  %v1128_v48 = vld [vmem:[%s1337_s9 + $0x18] sm:$0xff]   ;;  %s813_s27 = scalar_lea.vmem (%p1223_p5), %s1398_s3, %s995_s12 }
  0x39   : > { %1125 = vset.pattern.permute.xlu1 %v1172_v43  ;;  %1124 = vset.pattern.permute.xlu0 %v1172_v43  ;;  %v1126_v44 = vld [vmem:[%s1337_s9 + $0x20] sm:$0xff]   ;;  %v758_v47 = vld [vmem:[%s1396_s1 + $0x8] sm:$0xff]  ;;  %v1130_v50 = vld [vmem:[%s1337_s9 + $0x10] sm:$0xff]  }
  0x3a   : > { %773 = vperm.xlu1 %1125, %v759_v41   ;;  %763 = vperm.xlu0 %1124, %v757_v42   ;;  %v1129_v49 = vld [vmem:[%s1337_s9 + $0x40] sm:$0xff]   ;;  %v1131_v51 = vld [vmem:[%s1337_s9 + $0x38] sm:$0xff]   ;;  %v1132_v52 = vld [vmem:[%s1337_s9 + $0x8] sm:$0xff]  }
  0x3b   : > { %1041 = vmatprep.subr.bf16.mxu0 %v1126_v44  ;;  %1055 = vmatprep.subr.bf16.mxu1 %v1127_v46  ;;  %v1133_v53 = vld [vmem:[%s1337_s9 + $0x30] sm:$0xff]   ;;  %v1134_v54 = vld [vmem:[%s1337_s9] sm:$0xff]   ;;  %v1135_v55 = vld [vmem:[%s1337_s9 + $0x28] sm:$0xff]  }
  0x3c   : > { %1042 = vmatpush3.bf16.msra.mxu0 %v1126_v44  ;;  %1056 = vmatpush3.bf16.msra.mxu1 %v1127_v46  ;;  %v1138_v56 = vld [vmem:[%s1337_s9 + $0x70] sm:$0xff]   ;;  %v1139_v57 = vld [vmem:[%s1337_s9 + $0x98] sm:$0xff]   ;;  %v1137_v58 = vld [vmem:[%s1395_s0 + $0x8] sm:$0xff]  }
  0x3d   : > { %1043 = vmatprep.subr.bf16.mxu0 %v1128_v48  ;;  %1057 = vmatprep.subr.bf16.mxu1 %v1129_v49  ;;  %v1140_v59 = vld [vmem:[%s1337_s9 + $0x68] sm:$0xff]   ;;  %v1141_v60 = vld [vmem:[%s1337_s9 + $0x90] sm:$0xff]   ;;  %v1142_v61 = vld [vmem:[%s1337_s9 + $0x60] sm:$0xff]  }
  0x3e   : > { %778 = vperm.xlu1 %1125, %v760_v45   ;;  %768 = vperm.xlu0 %1124, %v758_v47   ;;  %v1143_v62 = vld [vmem:[%s1337_s9 + $0x88] sm:$0xff]   ;;  %v1144_v63 = vld [vmem:[%s1337_s9 + $0x58] sm:$0xff]   ;;  %v1145_v0 = vld [vmem:[%s1337_s9 + $0x80] sm:$0xff]  }
  0x3f   : > { %v1146_v1 = vld [vmem:[%s1337_s9 + $0x50] sm:$0xff]   ;;  %v1147_v2 = vld [vmem:[%s1337_s9 + $0x78] sm:$0xff]  }
  0x40   : > { %1044 = vmatpush3.bf16.msra.mxu0 %v1128_v48  ;;  %1058 = vmatpush3.bf16.msra.mxu1 %v1129_v49 }
  0x41   : > { %1045 = vmatprep.subr.bf16.mxu0 %v1130_v50  ;;  %1059 = vmatprep.subr.bf16.mxu1 %v1131_v51 }
  0x44   : > { %1046 = vmatpush3.bf16.msra.mxu0 %v1130_v50  ;;  %1060 = vmatpush3.bf16.msra.mxu1 %v1131_v51 }
  0x45   : > { %1047 = vmatprep.subr.bf16.mxu0 %v1132_v52  ;;  %1061 = vmatprep.subr.bf16.mxu1 %v1133_v53 }
  0x48   : > { %1048 = vmatpush3.bf16.msra.mxu0 %v1132_v52  ;;  %1062 = vmatpush3.bf16.msra.mxu1 %v1133_v53 }
  0x49   : > { %1049 = vmatprep.subr.bf16.mxu0 %v1134_v54  ;;  %1063 = vmatprep.subr.bf16.mxu1 %v1135_v55 }
  0x4c   : > { %1050 = vmatpush3.bf16.msra.mxu0 %v1134_v54  ;;  %1064 = vmatpush3.bf16.msra.mxu1 %v1135_v55 }
  0x4d   : > { %1069 = vmatprep.subr.bf16.mxu0 %v1138_v56  ;;  %1083 = vmatprep.subr.bf16.mxu1 %v1139_v57 }
  0x4f   : > { %1052 = vmatmul.mubr.msk.bf16.vlgmr.msra.gmra.mxu0 %vm419_vm0, %v1137_v58  ;;  %1066 = vmatmul.mubr.msk.bf16.vlgmr.msra.gmra.mxu1 %vm419_vm0, %v1137_v58 }
  0x50   : > { %1070 = vmatpush3.bf16.msra.mxu0 %v1138_v56  ;;  %1084 = vmatpush3.bf16.msra.mxu1 %v1139_v57 }
  0x51   : > { %1071 = vmatprep.subr.bf16.mxu0 %v1140_v59  ;;  %1085 = vmatprep.subr.bf16.mxu1 %v1141_v60 }
  0x52   : > { %1079 = vmatprep.mubr.msk.bf16.mxu0 %vm419_vm0, %v1323_v40  ;;  %1093 = vmatprep.mubr.msk.bf16.mxu1 %vm419_vm0, %v1323_v40 }
  0x54   : > { %1072 = vmatpush3.bf16.msra.mxu0 %v1140_v59  ;;  %1086 = vmatpush3.bf16.msra.mxu1 %v1141_v60 }
  0x55   : > { %1073 = vmatprep.subr.bf16.mxu0 %v1142_v61  ;;  %1087 = vmatprep.subr.bf16.mxu1 %v1143_v62 }
  0x58   : > { %1074 = vmatpush3.bf16.msra.mxu0 %v1142_v61  ;;  %1088 = vmatpush3.bf16.msra.mxu1 %v1143_v62 }
  0x59   : > { %1075 = vmatprep.subr.bf16.mxu0 %v1144_v63  ;;  %1089 = vmatprep.subr.bf16.mxu1 %v1145_v0 }
  0x5c   : > { %1076 = vmatpush3.bf16.msra.mxu0 %v1144_v63  ;;  %1090 = vmatpush3.bf16.msra.mxu1 %v1145_v0 }
  0x5d   : > { %1077 = vmatprep.subr.bf16.mxu0 %v1146_v1  ;;  %1091 = vmatprep.subr.bf16.mxu1 %v1147_v2 }
  0x60   : > { %1078 = vmatpush3.bf16.msra.mxu0 %v1146_v1  ;;  %1092 = vmatpush3.bf16.msra.mxu1 %v1147_v2 }
  0x63   : > { %1080 = vmatmul.mubr.msk.bf16.vlgmr.msra.gmra.mxu0 %vm419_vm0, %v1137_v58  ;;  %1094 = vmatmul.mubr.msk.bf16.vlgmr.msra.gmra.mxu1 %vm419_vm0, %v1137_v58 }
  0xb5   : > { %v774_v16 = vpop.permute.xlu1 %773  ;;  %v764_v21 = vpop.permute.xlu0 %763 }
  0xb9   : > { %v779_v31 = vpop.permute.xlu1 %778  ;;  %v769_v36 = vpop.permute.xlu0 %768 }
 0x10f   : > { %v1053_v3 = vpop.f32.mrf.mxu0  ;;  %v1067_v4 = vpop.f32.mrf.mxu1 }
 0x110   : > { %v567_v10 = vmax.f32 %v1053_v3, %v1067_v4 }
 0x111   : > { %v460_v5 = vpop.f32.mrf.mxu0  ;;  %v550_v6 = vpop.f32.mrf.mxu1 }
 0x112   : > { %v565_v13 = vmax.f32 %v460_v5, %v550_v6 }
 0x113   : > { %v1054_v7 = vpop.f32.mrf.mxu0  ;;  %v1068_v8 = vpop.f32.mrf.mxu1 }
 0x114   : > { %v568_v18 = vmax.f32 %v1054_v7, %v1068_v8 }
 0x115   : > { %v463_v9 = vpop.f32.mrf.mxu0  ;;  %v553_v11 = vpop.f32.mrf.mxu1 }
 0x116   : > { %v566_v23 = vmax.f32 %v463_v9, %v553_v11 }
 0x123   : > { %v1081_v12 = vpop.f32.mrf.mxu0  ;;  %v1095_v15 = vpop.f32.mrf.mxu1 }
 0x124   : > { %v661_v14 = vmax.f32 %v567_v10, %v1081_v12 }
 0x125   : > { %v644_v17 = vpop.f32.mrf.mxu0  ;;  %v738_v20 = vpop.f32.mrf.mxu1 }
 0x126   : > { %v659_v19 = vmax.f32 %v565_v13, %v644_v17  ;;  %v755_v24 = vmax.f32 %v661_v14, %v1095_v15 }
 0x127   : > { %v1082_v22 = vpop.f32.mrf.mxu0  ;;  %v1096_v26 = vpop.f32.mrf.mxu1 }
 0x128   : > { %v662_v25 = vmax.f32 %v568_v18, %v1082_v22  ;;  %v753_v28 = vmax.f32 %v659_v19, %v738_v20  ;;  %v783_v33 = vadd.f32 %v774_v16, %v755_v24 }
 0x129   : > { %v647_v27 = vpop.f32.mrf.mxu0  ;;  %v741_v32 = vpop.f32.mrf.mxu1 }
 0x12a   : > { %v756_v29 = vmax.f32 %v662_v25, %v1096_v26  ;;  %v660_v30 = vmax.f32 %v566_v23, %v647_v27  ;;  %v781_v37 = vadd.f32 %v764_v21, %v753_v28 }
 0x12c   : > { %v784_v34 = vadd.f32 %v779_v31, %v756_v29  ;;  %v754_v35 = vmax.f32 %v660_v30, %v741_v32 }
 0x12e   : > { %v1010_v38 = vpack.c.bf16 %v784_v34, %v783_v33  ;;  %v782_v39 = vadd.f32 %v769_v36, %v754_v35  ;;  %811 = sbr.rel (!%p1223_p5) target bundleno = 315 (0x13b), region = 77 }
 0x130   : > { %1012 = vst [vmem:[%s363_s24 + $0x8] sm:$0xff] %v1010_v38   ;;  %v1005_v40 = vpack.c.bf16 %v782_v39, %v781_v37 }
 0x132   : > { %1006 = vst [vmem:[%s363_s24] sm:$0xff] %v1005_v40  }
 0x137   : > { %v834_v43 = vld [vmem:[%s363_s24 + $0x8] sm:$0xf]  ;;  %v836_v44 = vld [vmem:[%s363_s24 + $0xc] sm:$0xf] }
 0x138   : > { %835 = vst [vmem:[%s813_s27 + $0x20] sm:$0xf] %v834_v43  ;;  %837 = vst [vmem:[%s813_s27 + $0x30] sm:$0xf] %v836_v44 }
 0x139   : > { %v830_v41 = vld [vmem:[%s363_s24] sm:$0xf]  ;;  %v832_v42 = vld [vmem:[%s363_s24 + $0x4] sm:$0xf] }
 0x13a   : > { %831 = vst [vmem:[%s813_s27] sm:$0xf] %v830_v41  ;;  %833 = vst [vmem:[%s813_s27 + $0x10] sm:$0xf] %v832_v42 }
 0x13b PF: > { %p10_p10 = scmp.ge.s32.totalorder %s1210_s16, 6   ;;  %s1400_s12 = smov %s1166_s13 }
 0x13c   : > { %s1401_s13 = smov %s1221_s19  ;;  %s1402_s14 = smov %s1210_s16 }
 0x13d   :  { %12 = sbr.rel (!%p10_p10) target bundleno = 2 (0x2), region = 152 }

// kernel: loss_nn_forward.4
= control target key start
LH: loop header
LB: loop body
LE: loop exit
PB: predicated region body
PF: predicated region fallthrough
CT: control target
= control target key end

     0   :  { %vm501_vm0 = vcmask 261120   ;;  %s4564_s2 = inlined_call_operand.vmem [shape: bf16[4,800,128], index: 2, kind: input, shape index: {}]   ;;  %s4565_s0 = inlined_call_operand.vmem [shape: bf16[32,800], index: 0, kind: input, shape index: {}]   ;;  %s4566_s1 = inlined_call_operand.vmem [shape: f32[32,1], index: 1, kind: input, shape index: {}]   ;;  %s4567_s3 = inlined_call_operand.vmem [shape: bf16[32,128], index: 3, kind: output, shape index: {}]  }
   0x1   :  { %v3487_v0 = vld [vmem:[%s4564_s2 + $0x78] sm:$0xff]   ;;  %v3491_v4 = vld [vmem:[%s4564_s2 + $0x70] sm:$0xff]   ;;  %v3495_v8 = vld [vmem:[%s4564_s2 + $0x68] sm:$0xff]  }
   0x2   :  { %v3488_v1 = vld [vmem:[%s4564_s2 + $0xf8] sm:$0xff]   ;;  %3100 = vmatprep.subr.bf16.mxu0 %v3487_v0  ;;  %v3492_v5 = vld [vmem:[%s4564_s2 + $0xf0] sm:$0xff]   ;;  %v3496_v9 = vld [vmem:[%s4564_s2 + $0xe8] sm:$0xff]  }
   0x3   :  { %v3489_v2 = vld [vmem:[%s4564_s2 + $0x38] sm:$0xff]   ;;  %3128 = vmatprep.subr.bf16.mxu1 %v3488_v1  ;;  %v3493_v6 = vld [vmem:[%s4564_s2 + $0x30] sm:$0xff]   ;;  %v3497_v10 = vld [vmem:[%s4564_s2 + $0x28] sm:$0xff]  }
   0x4   :  { %v3490_v3 = vld [vmem:[%s4564_s2 + $0xb8] sm:$0xff]   ;;  %3101 = vmatpush3.bf16.msra.mxu0 %v3489_v2  ;;  %v3494_v7 = vld [vmem:[%s4564_s2 + $0xb0] sm:$0xff]   ;;  %v3498_v11 = vld [vmem:[%s4564_s2 + $0xa8] sm:$0xff]  }
   0x5   :  { %3129 = vmatpush3.bf16.msra.mxu1 %v3490_v3  ;;  %3102 = vmatprep.subr.bf16.mxu0 %v3491_v4  ;;  %v3499_v12 = vld [vmem:[%s4564_s2 + $0x60] sm:$0xff]   ;;  %v3503_v16 = vld [vmem:[%s4564_s2 + $0x58] sm:$0xff]   ;;  %v3507_v20 = vld [vmem:[%s4564_s2 + $0x50] sm:$0xff]  }
   0x6   :  { %3130 = vmatprep.subr.bf16.mxu1 %v3492_v5  ;;  %v3500_v13 = vld [vmem:[%s4564_s2 + $0xe0] sm:$0xff]   ;;  %v3504_v17 = vld [vmem:[%s4564_s2 + $0xd8] sm:$0xff]   ;;  %v3508_v21 = vld [vmem:[%s4564_s2 + $0xd0] sm:$0xff]  }
   0x7   :  { %v3501_v14 = vld [vmem:[%s4564_s2 + $0x20] sm:$0xff]   ;;  %v3505_v18 = vld [vmem:[%s4564_s2 + $0x18] sm:$0xff]   ;;  %v3509_v22 = vld [vmem:[%s4564_s2 + $0x10] sm:$0xff]  }
   0x8   :  { %3103 = vmatpush3.bf16.msra.mxu0 %v3493_v6  ;;  %v3502_v15 = vld [vmem:[%s4564_s2 + $0xa0] sm:$0xff]   ;;  %v3506_v19 = vld [vmem:[%s4564_s2 + $0x98] sm:$0xff]   ;;  %v3510_v23 = vld [vmem:[%s4564_s2 + $0x90] sm:$0xff]  }
   0x9   :  { %3131 = vmatpush3.bf16.msra.mxu1 %v3494_v7  ;;  %3104 = vmatprep.subr.bf16.mxu0 %v3495_v8  ;;  %v3511_v24 = vld [vmem:[%s4564_s2 + $0x48] sm:$0xff]   ;;  %v3515_v28 = vld [vmem:[%s4564_s2 + $0x40] sm:$0xff]   ;;  %v3525_v36 = vld [vmem:[%s4564_s2 + $0x178] sm:$0xff]  }
   0xa   :  { %3132 = vmatprep.subr.bf16.mxu1 %v3496_v9  ;;  %v3512_v25 = vld [vmem:[%s4564_s2 + $0xc8] sm:$0xff]   ;;  %v3516_v29 = vld [vmem:[%s4564_s2 + $0xc0] sm:$0xff]   ;;  %v3527_v38 = vld [vmem:[%s4564_s2 + $0x138] sm:$0xff]  }
   0xb   :  { %v3513_v26 = vld [vmem:[%s4564_s2 + $0x8] sm:$0xff]   ;;  %v3517_v30 = vld [vmem:[%s4564_s2] sm:$0xff]   ;;  %v3528_v39 = vld [vmem:[%s4564_s2 + $0x170] sm:$0xff]  }
   0xc   :  { %3105 = vmatpush3.bf16.msra.mxu0 %v3497_v10  ;;  %v3514_v27 = vld [vmem:[%s4564_s2 + $0x88] sm:$0xff]   ;;  %v3518_v31 = vld [vmem:[%s4564_s2 + $0x80] sm:$0xff]   ;;  %v3529_v40 = vld [vmem:[%s4564_s2 + $0x130] sm:$0xff]  }
   0xd   :  { %3133 = vmatpush3.bf16.msra.mxu1 %v3498_v11  ;;  %3106 = vmatprep.subr.bf16.mxu0 %v3499_v12  ;;  %v3841_v32 = vld [vmem:[%s4565_s0 + $0x4] ss:$28 sps:$4 sm:$0xff]   ;;  %v3846_v33 = vld [vmem:[%s4565_s0 + $0xc] ss:$28 sps:$4 sm:$0xff]   ;;  %v3880_v41 = vld [vmem:[%s4565_s0 + $0x3c] ss:$28 sps:$4 sm:$0xff]  }
   0xe   :  { %3134 = vmatprep.subr.bf16.mxu1 %v3500_v13  ;;  %540 = vmatprep.mubr.bf16.mxu0 %v3841_v32  ;;  %v3852_v34 = vld [vmem:[%s4565_s0] ss:$28 sps:$4 sm:$0xff]   ;;  %v3857_v35 = vld [vmem:[%s4565_s0 + $0x8] ss:$28 sps:$4 sm:$0xff]   ;;  %v3890_v43 = vld [vmem:[%s4565_s0 + $0x38] ss:$28 sps:$4 sm:$0xff]  }
   0xf   :  { %589 = vmatprep.mubr.bf16.mxu1 %v3846_v33  ;;  %v3526_v37 = vld [vmem:[%s4564_s2 + $0x188] sm:$0xff]   ;;  %v3885_v42 = vld [vmem:[%s4565_s0 + $0x44] ss:$28 sps:$4 sm:$0xff]   ;;  %v3919_v50 = vld [vmem:[%s4565_s0 + $0x18] ss:$28 sps:$4 sm:$0xff]  }
  0x10   :  { %3107 = vmatpush3.bf16.msra.mxu0 %v3501_v14  ;;  %v3896_v44 = vld [vmem:[%s4565_s0 + $0x40] ss:$28 sps:$4 sm:$0xff]   ;;  %v3536_v45 = vld [vmem:[%s4564_s2 + $0x168] sm:$0xff]   ;;  %v3548_v57 = vld [vmem:[%s4564_s2 + $0x150] sm:$0xff]  }
  0x11   :  { %3135 = vmatpush3.bf16.msra.mxu1 %v3502_v15  ;;  %3108 = vmatprep.subr.bf16.mxu0 %v3503_v16  ;;  %v3537_v46 = vld [vmem:[%s4564_s2 + $0x180] sm:$0xff]   ;;  %v3538_v47 = vld [vmem:[%s4564_s2 + $0x128] sm:$0xff]   ;;  %v3543_v52 = vld [vmem:[%s4564_s2 + $0x158] sm:$0xff]  }
  0x12   :  { %3136 = vmatprep.subr.bf16.mxu1 %v3504_v17  ;;  %v3539_v48 = vld [vmem:[%s4564_s2 + $0x160] sm:$0xff]   ;;  %v3542_v51 = vld [vmem:[%s4564_s2 + $0x208] sm:$0xff]   ;;  %v3546_v55 = vld [vmem:[%s4564_s2 + $0x118] sm:$0xff]  }
  0x13   :  { %v3540_v49 = vld [vmem:[%s4564_s2 + $0x120] sm:$0xff]   ;;  %v3932_v53 = vld [vmem:[%s4565_s0 + $0x50] ss:$28 sps:$4 sm:$0xff]   ;;  %v3551_v60 = vld [vmem:[%s4564_s2 + $0x1f8] sm:$0xff]  }
  0x14   :  { %3109 = vmatpush3.bf16.msra.mxu0 %v3505_v18  ;;  %v3545_v54 = vld [vmem:[%s4564_s2 + $0x1c8] sm:$0xff]   ;;  %v3547_v56 = vld [vmem:[%s4564_s2 + $0x200] sm:$0xff]   ;;  %v3550_v59 = vld [vmem:[%s4564_s2 + $0x110] sm:$0xff]  }
  0x15   :  { %3137 = vmatpush3.bf16.msra.mxu1 %v3506_v19  ;;  %3110 = vmatprep.subr.bf16.mxu0 %v3507_v20  ;;  %v3549_v58 = vld [vmem:[%s4564_s2 + $0x1c0] sm:$0xff]   ;;  %v3552_v61 = vld [vmem:[%s4564_s2 + $0x148] sm:$0xff]   ;;  %v3553_v62 = vld [vmem:[%s4564_s2 + $0x1b8] sm:$0xff]  }
  0x16   :  { %3138 = vmatprep.subr.bf16.mxu1 %v3508_v21  ;;  %v3554_v63 = vld [vmem:[%s4564_s2 + $0x108] sm:$0xff]   ;;  %v3555_v0 = vld [vmem:[%s4564_s2 + $0x1f0] sm:$0xff]   ;;  %v3556_v1 = vld [vmem:[%s4564_s2 + $0x140] sm:$0xff]  }
  0x17   :  { %v3557_v2 = vld [vmem:[%s4564_s2 + $0x1b0] sm:$0xff]   ;;  %v3558_v3 = vld [vmem:[%s4564_s2 + $0x100] sm:$0xff]   ;;  %v3562_v6 = vld [vmem:[%s4564_s2 + $0x1e8] sm:$0xff]  }
  0x18   :  { %3111 = vmatpush3.bf16.msra.mxu0 %v3509_v22  ;;  %v3982_v4 = vld [vmem:[%s4565_s0 + $0x10] ss:$28 sps:$4 sm:$0xff]   ;;  %v3566_v10 = vld [vmem:[%s4564_s2 + $0x1e0] sm:$0xff]   ;;  %v3572_v15 = vld [vmem:[%s4564_s2 + $0x1d8] sm:$0xff]  }
  0x19   :  { %3139 = vmatpush3.bf16.msra.mxu1 %v3510_v23  ;;  %3112 = vmatprep.subr.bf16.mxu0 %v3511_v24  ;;  %v3987_v5 = vld [vmem:[%s4565_s0 + $0x14] ss:$28 sps:$4 sm:$0xff]   ;;  %v3563_v7 = vld [vmem:[%s4564_s2 + $0x1a8] sm:$0xff]   ;;  %v3567_v11 = vld [vmem:[%s4564_s2 + $0x1a0] sm:$0xff]  }
  0x1a   :  { %3140 = vmatprep.subr.bf16.mxu1 %v3512_v25  ;;  %v3564_v8 = vld [vmem:[%s4564_s2 + $0x288] sm:$0xff]   ;;  %v3568_v12 = vld [vmem:[%s4564_s2 + $0x280] sm:$0xff]   ;;  %v3574_v17 = vld [vmem:[%s4564_s2 + $0x198] sm:$0xff]  }
  0x1b   :  { %v3565_v9 = vld [vmem:[%s4564_s2 + $0x248] sm:$0xff]   ;;  %v3569_v13 = vld [vmem:[%s4564_s2 + $0x240] sm:$0xff]   ;;  %v3575_v18 = vld [vmem:[%s4564_s2 + $0x278] sm:$0xff]  }
  0x1c   :  { %3113 = vmatpush3.bf16.msra.mxu0 %v3513_v26  ;;  %v4018_v14 = vld [vmem:[%s4565_s0 + $0x4c] ss:$28 sps:$4 sm:$0xff]   ;;  %v3576_v19 = vld [vmem:[%s4564_s2 + $0x238] sm:$0xff]   ;;  %v3577_v20 = vld [vmem:[%s4564_s2 + $0x1d0] sm:$0xff]  }
  0x1d   :  { %3141 = vmatpush3.bf16.msra.mxu1 %v3514_v27  ;;  %3114 = vmatprep.subr.bf16.mxu0 %v3515_v28  ;;  %v4026_v16 = vld [vmem:[%s4565_s0 + $0x48] ss:$28 sps:$4 sm:$0xff]   ;;  %v3578_v21 = vld [vmem:[%s4564_s2 + $0x190] sm:$0xff]  }
  0x1e   :  { %3142 = vmatprep.subr.bf16.mxu1 %v3516_v29  ;;  %v3579_v22 = vld [vmem:[%s4564_s2 + $0x270] sm:$0xff]   ;;  %v3581_v24 = vld [vmem:[%s4564_s2 + $0x308] sm:$0xff]   ;;  %v3585_v28 = vld [vmem:[%s4564_s2 + $0x300] sm:$0xff]  }
  0x1f   :  { %v3580_v23 = vld [vmem:[%s4564_s2 + $0x230] sm:$0xff]   ;;  %v3582_v25 = vld [vmem:[%s4564_s2 + $0x268] sm:$0xff]   ;;  %v3586_v29 = vld [vmem:[%s4564_s2 + $0x260] sm:$0xff]  }
  0x20   :  { %3115 = vmatpush3.bf16.msra.mxu0 %v3517_v30  ;;  %v3583_v26 = vld [vmem:[%s4564_s2 + $0x2c8] sm:$0xff]   ;;  %v3587_v30 = vld [vmem:[%s4564_s2 + $0x2c0] sm:$0xff]  }
  0x21   :  { %3143 = vmatpush3.bf16.msra.mxu1 %v3518_v31  ;;  %3156 = vmatprep.subr.bf16.mxu0 %v3525_v36  ;;  %v3584_v27 = vld [vmem:[%s4564_s2 + $0x228] sm:$0xff]   ;;  %v3588_v31 = vld [vmem:[%s4564_s2 + $0x220] sm:$0xff]   ;;  %v3589_v36 = vld [vmem:[%s4564_s2 + $0x2f8] sm:$0xff]  }
  0x22   :  { %3452 = vmatprep.subr.bf16.mxu1 %v3526_v37 }
  0x23   :  { %541 = vmatmul.mubr.bf16.vlgmr.msra.gmra.mxu0 %v3852_v34 }
  0x24   :  { %590 = vmatmul.mubr.bf16.vlgmr.msra.gmra.mxu1 %v3857_v35  ;;  %3157 = vmatpush3.bf16.msra.mxu0 %v3527_v38  ;;  %v3591_v38 = vld [vmem:[%s4564_s2 + $0x2b8] sm:$0xff]  }
  0x25   :  { %3453 = vmatpush3.bf16.msra.mxu1 %v3526_v37  ;;  %3158 = vmatprep.subr.bf16.mxu0 %v3528_v39  ;;  %v3590_v37 = vld [vmem:[%s4564_s2 + $0x258] sm:$0xff]  }
  0x26   :  { %548 = vmatprep.mubr.bf16.mxu0 %v3880_v41  ;;  %597 = vmatprep.mubr.bf16.mxu1 %v3885_v42  ;;  %v3592_v39 = vld [vmem:[%s4564_s2 + $0x218] sm:$0xff]  }
  0x27   :  { %3454 = vmatprep.subr.bf16.mxu1 %v3537_v46 }
  0x28   :  { %3159 = vmatpush3.bf16.msra.mxu0 %v3529_v40  ;;  %v3593_v40 = vld [vmem:[%s4564_s2 + $0x2f0] sm:$0xff]  }
  0x29   :  { %3160 = vmatprep.subr.bf16.mxu0 %v3536_v45  ;;  %3455 = vmatpush3.bf16.msra.mxu1 %v3537_v46  ;;  %v3594_v45 = vld [vmem:[%s4564_s2 + $0x250] sm:$0xff]  }
  0x2a   :  { %3188 = vmatprep.subr.bf16.mxu1 %v3542_v51  ;;  %v3595_v46 = vld [vmem:[%s4564_s2 + $0x2b0] sm:$0xff]   ;;  %v3599_v51 = vld [vmem:[%s4564_s2 + $0x2e0] sm:$0xff]  }
  0x2b   :  { %549 = vmatmul.mubr.bf16.gmra.mxu0 %v3890_v43 }
  0x2c   :  { %598 = vmatmul.mubr.bf16.gmra.mxu1 %v3896_v44  ;;  %3161 = vmatpush3.bf16.msra.mxu0 %v3538_v47  ;;  %v3596_v47 = vld [vmem:[%s4564_s2 + $0x210] sm:$0xff]  }
  0x2d   :  { %3162 = vmatprep.subr.bf16.mxu0 %v3539_v48  ;;  %3456 = vmatprep.mubr.msk.bf16.mxu1 %vm501_vm0, %v3919_v50  ;;  %v3597_v48 = vld [vmem:[%s4564_s2 + $0x2e8] sm:$0xff]  }
  0x2e   :  { %638 = vmatprep.mubr.bf16.mxu0 %v3987_v5 }
  0x30   :  { %3163 = vmatpush3.bf16.msra.mxu0 %v3540_v49  ;;  %v3598_v49 = vld [vmem:[%s4564_s2 + $0x2a8] sm:$0xff]  }
  0x31   :  { %3164 = vmatprep.subr.bf16.mxu0 %v3543_v52  ;;  %v3600_v52 = vld [vmem:[%s4564_s2 + $0x2a0] sm:$0xff]  }
  0x34   :  { %3457 = vmatmul.mubr.msk.bf16.vlgmr.msra.gmra.mxu1 %vm501_vm0, %v3932_v53  ;;  %3165 = vmatpush3.bf16.msra.mxu0 %v3546_v55  ;;  %v3602_v55 = vld [vmem:[%s4564_s2 + $0x318] sm:$0xff]  }
  0x35   :  { %3189 = vmatpush3.bf16.msra.mxu1 %v3545_v54  ;;  %1137 = vmatprep.mubr.bf16.mxu1 %v3841_v32  ;;  %v3601_v54 = vld [vmem:[%s4564_s2 + $0x2d8] sm:$0xff]  }
  0x36   :  { %3190 = vmatprep.subr.bf16.mxu1 %v3547_v56  ;;  %3166 = vmatprep.subr.bf16.mxu0 %v3548_v57  ;;  %v3603_v56 = vld [vmem:[%s4564_s2 + $0x298] sm:$0xff]   ;;  %v3605_v57 = vld [vmem:[%s4564_s2 + $0x310] sm:$0xff]  }
  0x38   :  { %3167 = vmatpush3.bf16.msra.mxu0 %v3550_v59  ;;  %v3607_v59 = vld [vmem:[%s4564_s2 + $0x398] sm:$0xff]  }
  0x39   :  { %3191 = vmatpush3.bf16.msra.mxu1 %v3549_v58  ;;  %3168 = vmatprep.subr.bf16.mxu0 %v3552_v61  ;;  %v3604_v58 = vld [vmem:[%s4564_s2 + $0x2d0] sm:$0xff]   ;;  %v3608_v61 = vld [vmem:[%s4564_s2 + $0x418] sm:$0xff]  }
  0x3a   :  { %3192 = vmatprep.subr.bf16.mxu1 %v3551_v60  ;;  %v3606_v60 = vld [vmem:[%s4564_s2 + $0x290] sm:$0xff]  }
  0x3c   :  { %3169 = vmatpush3.bf16.msra.mxu0 %v3554_v63  ;;  %v3610_v63 = vld [vmem:[%s4564_s2 + $0x3d8] sm:$0xff]  }
  0x3d   :  { %3193 = vmatpush3.bf16.msra.mxu1 %v3553_v62  ;;  %3170 = vmatprep.subr.bf16.mxu0 %v3556_v1  ;;  %v3609_v62 = vld [vmem:[%s4564_s2 + $0x358] sm:$0xff]   ;;  %v3611_v1 = vld [vmem:[%s4564_s2 + $0x390] sm:$0xff]  }
  0x3e   :  { %3194 = vmatprep.subr.bf16.mxu1 %v3555_v0  ;;  %v3612_v0 = vld [vmem:[%s4564_s2 + $0x410] sm:$0xff]  }
  0x40   :  { %3171 = vmatpush3.bf16.msra.mxu0 %v3558_v3  ;;  %v3614_v3 = vld [vmem:[%s4564_s2 + $0x3d0] sm:$0xff]  }
  0x41   :  { %3195 = vmatpush3.bf16.msra.mxu1 %v3557_v2  ;;  %3216 = vmatprep.subr.bf16.mxu0 %v3564_v8  ;;  %v3613_v2 = vld [vmem:[%s4564_s2 + $0x350] sm:$0xff]   ;;  %v3617_v8 = vld [vmem:[%s4564_s2 + $0x348] sm:$0xff]  }
  0x42   :  { %3196 = vmatprep.subr.bf16.mxu1 %v3562_v6  ;;  %v3616_v6 = vld [vmem:[%s4564_s2 + $0x408] sm:$0xff]  }
  0x43   :  { %639 = vmatmul.mubr.bf16.vlgmr.msra.gmra.mxu0 %v3982_v4 }
  0x44   :  { %3217 = vmatpush3.bf16.msra.mxu0 %v3565_v9  ;;  %646 = vmatprep.mubr.bf16.mxu0 %v4018_v14  ;;  %v3618_v9 = vld [vmem:[%s4564_s2 + $0x3c8] sm:$0xff]  }
  0x45   :  { %3197 = vmatpush3.bf16.msra.mxu1 %v3563_v7  ;;  %3218 = vmatprep.subr.bf16.mxu0 %v3568_v12  ;;  %v3615_v7 = vld [vmem:[%s4564_s2 + $0x388] sm:$0xff]   ;;  %v3622_v12 = vld [vmem:[%s4564_s2 + $0x3c0] sm:$0xff]  }
  0x46   :  { %3198 = vmatprep.subr.bf16.mxu1 %v3566_v10  ;;  %v3620_v10 = vld [vmem:[%s4564_s2 + $0x400] sm:$0xff]  }
  0x48   :  { %3219 = vmatpush3.bf16.msra.mxu0 %v3569_v13  ;;  %v3624_v13 = vld [vmem:[%s4564_s2 + $0x3f8] sm:$0xff]  }
  0x49   :  { %3199 = vmatpush3.bf16.msra.mxu1 %v3567_v11  ;;  %3220 = vmatprep.subr.bf16.mxu0 %v3575_v18  ;;  %v3619_v11 = vld [vmem:[%s4564_s2 + $0x380] sm:$0xff]   ;;  %v3628_v18 = vld [vmem:[%s4564_s2 + $0x3f0] sm:$0xff]  }
  0x4a   :  { %3200 = vmatprep.subr.bf16.mxu1 %v3572_v15  ;;  %v3623_v15 = vld [vmem:[%s4564_s2 + $0x378] sm:$0xff]  }
  0x4b   :  { %647 = vmatmul.mubr.bf16.gmra.mxu0 %v4026_v16 }
  0x4c   :  { %1186 = vmatprep.mubr.bf16.mxu0 %v3846_v33  ;;  %3221 = vmatpush3.bf16.msra.mxu0 %v3576_v19  ;;  %v3627_v19 = vld [vmem:[%s4564_s2 + $0x370] sm:$0xff]  }
  0x4d   :  { %3201 = vmatpush3.bf16.msra.mxu1 %v3574_v17  ;;  %3222 = vmatprep.subr.bf16.mxu0 %v3579_v22  ;;  %v3625_v17 = vld [vmem:[%s4564_s2 + $0x338] sm:$0xff]   ;;  %v3632_v22 = vld [vmem:[%s4564_s2 + $0x3e8] sm:$0xff]  }
  0x4e   :  { %3202 = vmatprep.subr.bf16.mxu1 %v3577_v20  ;;  %v3629_v20 = vld [vmem:[%s4564_s2 + $0x330] sm:$0xff]  }
  0x50   :  { %3223 = vmatpush3.bf16.msra.mxu0 %v3580_v23  ;;  %v3631_v23 = vld [vmem:[%s4564_s2 + $0x368] sm:$0xff]  }
  0x51   :  { %3203 = vmatpush3.bf16.msra.mxu1 %v3578_v21  ;;  %3224 = vmatprep.subr.bf16.mxu0 %v3582_v25  ;;  %v3630_v21 = vld [vmem:[%s4564_s2 + $0x3b0] sm:$0xff]   ;;  %v3634_v25 = vld [vmem:[%s4564_s2 + $0x3a8] sm:$0xff]  }
  0x52   :  { %3244 = vmatprep.subr.bf16.mxu1 %v3581_v24  ;;  %v3633_v24 = vld [vmem:[%s4564_s2 + $0x328] sm:$0xff]  }
  0x54   :  { %1138 = vmatmul.mubr.bf16.vlgmr.msra.gmra.mxu1 %v3852_v34  ;;  %3225 = vmatpush3.bf16.msra.mxu0 %v3584_v27  ;;  %v3635_v27 = vld [vmem:[%s4564_s2 + $0x360] sm:$0xff]  }
  0x55   :  { %1145 = vmatprep.mubr.bf16.mxu1 %v3880_v41  ;;  %3245 = vmatpush3.bf16.msra.mxu1 %v3583_v26  ;;  %v3636_v26 = vld [vmem:[%s4564_s2 + $0x3e0] sm:$0xff]  }
  0x56   :  { %3246 = vmatprep.subr.bf16.mxu1 %v3585_v28  ;;  %3226 = vmatprep.subr.bf16.mxu0 %v3586_v29  ;;  %v3637_v28 = vld [vmem:[%s4564_s2 + $0x320] sm:$0xff]  }
  0x57   :  { %v3638_v29 = vld [vmem:[%s4564_s2 + $0x3a0] sm:$0xff]  }
  0x58   :  { %3227 = vmatpush3.bf16.msra.mxu0 %v3588_v31  ;;  %v3639_v31 = vld [vmem:[%s4564_s2 + $0x498] sm:$0xff]  }
  0x59   :  { %3247 = vmatpush3.bf16.msra.mxu1 %v3587_v30  ;;  %3228 = vmatprep.subr.bf16.mxu0 %v3590_v37  ;;  %v3640_v30 = vld [vmem:[%s4564_s2 + $0x4a8] sm:$0xff]   ;;  %v3642_v37 = vld [vmem:[%s4564_s2 + $0x490] sm:$0xff]  }
  0x5a   :  { %3248 = vmatprep.subr.bf16.mxu1 %v3589_v36  ;;  %v3641_v36 = vld [vmem:[%s4564_s2 + $0x458] sm:$0xff]  }
  0x5c   :  { %1146 = vmatmul.mubr.bf16.gmra.mxu1 %v3890_v43  ;;  %3229 = vmatpush3.bf16.msra.mxu0 %v3592_v39  ;;  %v3643_v39 = vld [vmem:[%s4564_s2 + $0x450] sm:$0xff]  }
  0x5d   :  { %1235 = vmatprep.mubr.bf16.mxu1 %v3987_v5  ;;  %3249 = vmatpush3.bf16.msra.mxu1 %v3591_v38  ;;  %v3645_v38 = vld [vmem:[%s4564_s2 + $0x4a0] sm:$0xff]  }
  0x5e   :  { %3250 = vmatprep.subr.bf16.mxu1 %v3593_v40  ;;  %3230 = vmatprep.subr.bf16.mxu0 %v3594_v45  ;;  %v3649_v40 = vld [vmem:[%s4564_s2 + $0x528] sm:$0xff]   ;;  %v3650_v45 = vld [vmem:[%s4564_s2 + $0x478] sm:$0xff]  }
  0x60   :  { %3231 = vmatpush3.bf16.msra.mxu0 %v3596_v47  ;;  %v3656_v47 = vld [vmem:[%s4564_s2 + $0x430] sm:$0xff]  }
  0x61   :  { %3251 = vmatpush3.bf16.msra.mxu1 %v3595_v46  ;;  %3460 = vmatprep.subr.bf16.mxu0 %v3602_v55  ;;  %v3655_v46 = vld [vmem:[%s4564_s2 + $0x4e0] sm:$0xff]  }
  0x62   :  { %3252 = vmatprep.subr.bf16.mxu1 %v3597_v48  ;;  %v3707_v48 = vld [vmem:[%s4565_s0 + $0x4] ss:$28 sps:$4 sm:$0xff]  }
  0x63   :  { %1187 = vmatmul.mubr.bf16.vlgmr.msra.gmra.mxu0 %v3857_v35 }
  0x64   :  { %1194 = vmatprep.mubr.bf16.mxu0 %v3885_v42  ;;  %3461 = vmatpush3.bf16.msra.mxu0 %v3602_v55  ;;  %v3662_v55 = vld [vmem:[%s4564_s2 + $0x460] sm:$0xff]  }
  0x65   :  { %3253 = vmatpush3.bf16.msra.mxu1 %v3598_v49  ;;  %3462 = vmatprep.subr.bf16.mxu0 %v3605_v57  ;;  %v3658_v49 = vld [vmem:[%s4564_s2 + $0x468] sm:$0xff]  }
  0x66   :  { %3254 = vmatprep.subr.bf16.mxu1 %v3599_v51  ;;  %v3659_v51 = vld [vmem:[%s4564_s2 + $0x4d8] sm:$0xff]  }
  0x68   :  { %3463 = vmatpush3.bf16.msra.mxu0 %v3605_v57  ;;  %v3664_v57 = vld [vmem:[%s4564_s2 + $0x420] sm:$0xff]  }
  0x69   :  { %3255 = vmatpush3.bf16.msra.mxu1 %v3600_v52  ;;  %3276 = vmatprep.subr.bf16.mxu0 %v3607_v59  ;;  %v3660_v52 = vld [vmem:[%s4564_s2 + $0x428] sm:$0xff]  }
  0x6a   :  { %3256 = vmatprep.subr.bf16.mxu1 %v3601_v54  ;;  %v3661_v54 = vld [vmem:[%s4564_s2 + $0x510] sm:$0xff]   ;;  %v3667_v59 = vld [vmem:[%s4564_s2 + $0x5a8] sm:$0xff]  }
  0x6b   :  { %1195 = vmatmul.mubr.bf16.gmra.mxu0 %v3896_v44 }
  0x6c   :  { %3464 = vmatprep.mubr.msk.bf16.mxu0 %vm501_vm0, %v3919_v50 }
  0x6d   :  { %3257 = vmatpush3.bf16.msra.mxu1 %v3603_v56  ;;  %v3663_v56 = vld [vmem:[%s4564_s2 + $0x4d0] sm:$0xff]  }
  0x6e   :  { %3258 = vmatprep.subr.bf16.mxu1 %v3604_v58  ;;  %v3665_v58 = vld [vmem:[%s4564_s2 + $0x508] sm:$0xff]  }
  0x71   :  { %3259 = vmatpush3.bf16.msra.mxu1 %v3606_v60  ;;  %v3666_v60 = vld [vmem:[%s4564_s2 + $0x4c8] sm:$0xff]  }
  0x72   :  { %3304 = vmatprep.subr.bf16.mxu1 %v3608_v61  ;;  %v3668_v61 = vld [vmem:[%s4564_s2 + $0x568] sm:$0xff]  }
  0x73   :  { %3465 = vmatmul.mubr.msk.bf16.vlgmr.msra.gmra.mxu0 %vm501_vm0, %v3932_v53 }
  0x74   :  { %1236 = vmatmul.mubr.bf16.vlgmr.msra.gmra.mxu1 %v3982_v4  ;;  %3277 = vmatpush3.bf16.msra.mxu0 %v3609_v62  ;;  %v3669_v62 = vld [vmem:[%s4564_s2 + $0x500] sm:$0xff]  }
  0x75   :  { %3305 = vmatpush3.bf16.msra.mxu1 %v3610_v63  ;;  %3278 = vmatprep.subr.bf16.mxu0 %v3611_v1  ;;  %v3671_v63 = vld [vmem:[%s4564_s2 + $0x5a0] sm:$0xff]  }
  0x76   :  { %3306 = vmatprep.subr.bf16.mxu1 %v3612_v0  ;;  %1243 = vmatprep.mubr.bf16.mxu1 %v4018_v14  ;;  %v3721_v0 = vmov 0   ;;  %v3670_v1 = vld [vmem:[%s4564_s2 + $0x4c0] sm:$0xff]  }
  0x77   :  { %1738 = vmatprep.mubr.bf16.mxu0 %v3841_v32  ;;  %v3621_v32 = vld [vmem:[%s4564_s2 + $0x340] sm:$0xff]   ;;  %3485 = vset.pattern.permute.xlu0 %v3721_v0 }
  0x78   :  { %3279 = vmatpush3.bf16.msra.mxu0 %v3613_v2  ;;  %3486 = vset.pattern.permute.xlu1 %v3721_v0  ;;  %v3672_v2 = vld [vmem:[%s4564_s2 + $0x560] sm:$0xff]  }
  0x79   :  { %3307 = vmatpush3.bf16.msra.mxu1 %v3614_v3  ;;  %3280 = vmatprep.subr.bf16.mxu0 %v3615_v7  ;;  %v3673_v3 = vld [vmem:[%s4564_s2 + $0x4f8] sm:$0xff]  }
  0x7a   :  { %3308 = vmatprep.subr.bf16.mxu1 %v3616_v6  ;;  %v3675_v6 = vld [vmem:[%s4564_s2 + $0x598] sm:$0xff]  }
  0x7b   :  { %v3676_v7 = vld [vmem:[%s4564_s2 + $0x558] sm:$0xff]  }
  0x7c   :  { %1244 = vmatmul.mubr.bf16.gmra.mxu1 %v4026_v16  ;;  %3281 = vmatpush3.bf16.msra.mxu0 %v3617_v8  ;;  %v3677_v8 = vld [vmem:[%s4564_s2 + $0x4f0] sm:$0xff]  }
  0x7d   :  { %3309 = vmatpush3.bf16.msra.mxu1 %v3618_v9  ;;  %1787 = vmatprep.mubr.bf16.mxu1 %v3846_v33  ;;  %v3626_v33 = vld [vmem:[%s4564_s2 + $0x3b8] sm:$0xff]   ;;  %v3678_v9 = vld [vmem:[%s4564_s2 + $0x4b0] sm:$0xff]  }
  0x7e   :  { %3310 = vmatprep.subr.bf16.mxu1 %v3620_v10  ;;  %3282 = vmatprep.subr.bf16.mxu0 %v3619_v11  ;;  %v3680_v10 = vld [vmem:[%s4564_s2 + $0x550] sm:$0xff]   ;;  %v3681_v11 = vld [vmem:[%s4564_s2 + $0x628] sm:$0xff]  }
  0x80   :  { %3283 = vmatpush3.bf16.msra.mxu0 %v3621_v32  ;;  %v3682_v32 = vld [vmem:[%s4564_s2 + $0x588] sm:$0xff]  }
  0x81   :  { %3311 = vmatpush3.bf16.msra.mxu1 %v3622_v12  ;;  %3284 = vmatprep.subr.bf16.mxu0 %v3623_v15  ;;  %v3683_v12 = vld [vmem:[%s4564_s2 + $0x5e8] sm:$0xff]   ;;  %v3685_v15 = vld [vmem:[%s4564_s2 + $0x620] sm:$0xff]  }
  0x82   :  { %3312 = vmatprep.subr.bf16.mxu1 %v3624_v13  ;;  %v3684_v13 = vld [vmem:[%s4564_s2 + $0x548] sm:$0xff]  }
  0x84   :  { %3285 = vmatpush3.bf16.msra.mxu0 %v3625_v17  ;;  %v3686_v17 = vld [vmem:[%s4564_s2 + $0x580] sm:$0xff]  }
  0x85   :  { %3313 = vmatpush3.bf16.msra.mxu1 %v3626_v33  ;;  %3286 = vmatprep.subr.bf16.mxu0 %v3627_v19  ;;  %v3709_v33 = vld [vmem:[%s4565_s0] ss:$28 sps:$4 sm:$0xff]  }
  0x86   :  { %3314 = vmatprep.subr.bf16.mxu1 %v3628_v18  ;;  %v3687_v18 = vld [vmem:[%s4564_s2 + $0x5e0] sm:$0xff]  }
  0x87   :  { %v3688_v19 = vld [vmem:[%s4564_s2 + $0x540] sm:$0xff]  }
  0x88   :  { %3287 = vmatpush3.bf16.msra.mxu0 %v3629_v20  ;;  %v3710_v20 = vld [vmem:[%s4565_s0 + $0x3c] ss:$28 sps:$4 sm:$0xff]  }
  0x89   :  { %3315 = vmatpush3.bf16.msra.mxu1 %v3630_v21  ;;  %3288 = vmatprep.subr.bf16.mxu0 %v3631_v23  ;;  %v3689_v21 = vld [vmem:[%s4564_s2 + $0x618] sm:$0xff]  }
  0x8a   :  { %3316 = vmatprep.subr.bf16.mxu1 %v3632_v22  ;;  %v3690_v22 = vld [vmem:[%s4564_s2 + $0x578] sm:$0xff]  }
  0x8b   :  { %v3691_v23 = vld [vmem:[%s4564_s2 + $0x5d8] sm:$0xff]  }
  0x8c   :  { %3289 = vmatpush3.bf16.msra.mxu0 %v3633_v24  ;;  %v3692_v24 = vld [vmem:[%s4564_s2 + $0x538] sm:$0xff]  }
  0x8d   :  { %3317 = vmatpush3.bf16.msra.mxu1 %v3634_v25  ;;  %3290 = vmatprep.subr.bf16.mxu0 %v3635_v27  ;;  %v3693_v25 = vld [vmem:[%s4564_s2 + $0x610] sm:$0xff]  }
  0x8e   :  { %3318 = vmatprep.subr.bf16.mxu1 %v3636_v26  ;;  %v3694_v26 = vld [vmem:[%s4564_s2 + $0x570] sm:$0xff]  }
  0x8f   :  { %v3695_v27 = vld [vmem:[%s4564_s2 + $0x5d0] sm:$0xff]  }
  0x90   :  { %3291 = vmatpush3.bf16.msra.mxu0 %v3637_v28  ;;  %v3711_v28 = vld [vmem:[%s4565_s0 + $0x38] ss:$28 sps:$4 sm:$0xff]  }
  0x91   :  { %3319 = vmatpush3.bf16.msra.mxu1 %v3638_v29  ;;  %3332 = vmatprep.subr.bf16.mxu0 %v3639_v31  ;;  %v3696_v29 = vld [vmem:[%s4564_s2 + $0x530] sm:$0xff]   ;;  %v3697_v31 = vld [vmem:[%s4564_s2 + $0x608] sm:$0xff]  }
  0x92   :  { %3468 = vmatprep.subr.bf16.mxu1 %v3640_v30 }
  0x93   :  { %1739 = vmatmul.mubr.bf16.vlgmr.msra.gmra.mxu0 %v3852_v34  ;;  %v3646_v34 = vld [vmem:[%s4564_s2 + $0x448] sm:$0xff]  }
  0x94   :  { %1788 = vmatmul.mubr.bf16.vlgmr.msra.gmra.mxu1 %v3857_v35  ;;  %3333 = vmatpush3.bf16.msra.mxu0 %v3641_v36  ;;  %v3644_v35 = vld [vmem:[%s4564_s2 + $0x488] sm:$0xff]   ;;  %v3704_v36 = vld [vmem:[%s4564_s2 + $0x638] sm:$0xff]  }
  0x95   :  { %3469 = vmatpush3.bf16.msra.mxu1 %v3640_v30  ;;  %1746 = vmatprep.mubr.bf16.mxu0 %v3880_v41  ;;  %v3647_v41 = vld [vmem:[%s4564_s2 + $0x480] sm:$0xff]   ;;  %v3712_v30 = vld [vmem:[%s4565_s0 + $0x14] ss:$28 sps:$4 sm:$0xff]  }
  0x96   :  { %3334 = vmatprep.subr.bf16.mxu0 %v3642_v37  ;;  %1795 = vmatprep.mubr.bf16.mxu1 %v3885_v42  ;;  %v3648_v42 = vld [vmem:[%s4564_s2 + $0x440] sm:$0xff]  }
  0x97   :  { %3470 = vmatprep.subr.bf16.mxu1 %v3645_v38  ;;  %v2507_v37 = vld [vmem:[%s4566_s1] sm:$0xff] }
  0x98   :  { %3335 = vmatpush3.bf16.msra.mxu0 %v3643_v39  ;;  %2513 = vperm.xlu0 %3485, %v2507_v37   ;;  %v3698_v39 = vld [vmem:[%s4564_s2 + $0x5c8] sm:$0xff]  }
  0x99   :  { %3471 = vmatpush3.bf16.msra.mxu1 %v3645_v38  ;;  %3336 = vmatprep.subr.bf16.mxu0 %v3644_v35  ;;  %v2509_v38 = vld [vmem:[%s4566_s1 + $0x10] sm:$0xff]  ;;  %v2510_v35 = vld [vmem:[%s4566_s1 + $0x18] sm:$0xff] }
  0x9a   :  { %3364 = vmatprep.subr.bf16.mxu1 %v3649_v40  ;;  %2523 = vperm.xlu1 %3486, %v2509_v38   ;;  %v2508_v40 = vld [vmem:[%s4566_s1 + $0x8] sm:$0xff] }
  0x9b   :  { %1747 = vmatmul.mubr.bf16.gmra.mxu0 %v3890_v43  ;;  %v3652_v43 = vld [vmem:[%s4564_s2 + $0x438] sm:$0xff]  }
  0x9c   :  { %1796 = vmatmul.mubr.bf16.gmra.mxu1 %v3896_v44  ;;  %3337 = vmatpush3.bf16.msra.mxu0 %v3646_v34  ;;  %v3651_v44 = vld [vmem:[%s4564_s2 + $0x4e8] sm:$0xff]   ;;  %v3699_v34 = vld [vmem:[%s4564_s2 + $0x600] sm:$0xff]  }
  0x9d   :  { %3472 = vmatprep.mubr.msk.bf16.mxu1 %vm501_vm0, %v3919_v50  ;;  %1836 = vmatprep.mubr.bf16.mxu0 %v3987_v5  ;;  %v3653_v50 = vld [vmem:[%s4564_s2 + $0x520] sm:$0xff]   ;;  %v3654_v5 = vld [vmem:[%s4564_s2 + $0x470] sm:$0xff]  }
  0x9e   :  { %3338 = vmatprep.subr.bf16.mxu0 %v3647_v41  ;;  %v3706_v41 = vld [vmem:[%s4564_s2 + $0x630] sm:$0xff]   ;;  %2518 = vperm.xlu0 %3485, %v2508_v40  }
  0x9f   :  { %2528 = vperm.xlu1 %3486, %v2510_v35  }
  0xa0   :  { %3339 = vmatpush3.bf16.msra.mxu0 %v3648_v42  ;;  %v3713_v42 = vld [vmem:[%s4565_s0 + $0x8] ss:$28 sps:$4 sm:$0xff]  }
  0xa1   :  { %3340 = vmatprep.subr.bf16.mxu0 %v3650_v45  ;;  %v3700_v45 = vld [vmem:[%s4564_s2 + $0x5c0] sm:$0xff]  }
  0xa4   :  { %3473 = vmatmul.mubr.msk.bf16.vlgmr.msra.gmra.mxu1 %vm501_vm0, %v3932_v53  ;;  %3341 = vmatpush3.bf16.msra.mxu0 %v3652_v43  ;;  %v3657_v53 = vld [vmem:[%s4564_s2 + $0x518] sm:$0xff]  }
  0xa5   :  { %3365 = vmatpush3.bf16.msra.mxu1 %v3651_v44  ;;  %2339 = vmatprep.mubr.bf16.mxu1 %v3707_v48  ;;  %v3714_v44 = vld [vmem:[%s4565_s0 + $0x44] ss:$28 sps:$4 sm:$0xff]   ;;  %v3701_v43 = vld [vmem:[%s4564_s2 + $0x5f8] sm:$0xff]  }
  0xa6   :  { %3366 = vmatprep.subr.bf16.mxu1 %v3653_v50  ;;  %3342 = vmatprep.subr.bf16.mxu0 %v3654_v5  ;;  %v3702_v50 = vld [vmem:[%s4564_s2 + $0x5b8] sm:$0xff]   ;;  %v3703_v5 = vld [vmem:[%s4564_s2 + $0x5f0] sm:$0xff]  }
  0xa7   :  { %v3716_v48 = vld [vmem:[%s4565_s0 + $0x18] ss:$28 sps:$4 sm:$0xff]  }
  0xa8   :  { %3343 = vmatpush3.bf16.msra.mxu0 %v3656_v47  ;;  %v3705_v47 = vld [vmem:[%s4564_s2 + $0x5b0] sm:$0xff]  }
  0xa9   :  { %3367 = vmatpush3.bf16.msra.mxu1 %v3655_v46  ;;  %3344 = vmatprep.subr.bf16.mxu0 %v3658_v49  ;;  %v3715_v46 = vld [vmem:[%s4565_s0 + $0x40] ss:$28 sps:$4 sm:$0xff]  }
  0xaa   :  { %3368 = vmatprep.subr.bf16.mxu1 %v3657_v53 }
  0xac   :  { %3345 = vmatpush3.bf16.msra.mxu0 %v3660_v52 }
  0xad   :  { %3369 = vmatpush3.bf16.msra.mxu1 %v3659_v51  ;;  %3346 = vmatprep.subr.bf16.mxu0 %v3662_v55 }
  0xae   :  { %3370 = vmatprep.subr.bf16.mxu1 %v3661_v54  ;;  %v3717_v54 = vld [vmem:[%s4565_s0 + $0x10] ss:$28 sps:$4 sm:$0xff]  }
  0xb0   :  { %3347 = vmatpush3.bf16.msra.mxu0 %v3664_v57  ;;  %v3718_v57 = vld [vmem:[%s4565_s0 + $0x50] ss:$28 sps:$4 sm:$0xff]  }
  0xb1   :  { %3371 = vmatpush3.bf16.msra.mxu1 %v3663_v56  ;;  %3392 = vmatprep.subr.bf16.mxu0 %v3667_v59 }
  0xb2   :  { %3372 = vmatprep.subr.bf16.mxu1 %v3665_v58 }
  0xb3   :  { %1837 = vmatmul.mubr.bf16.vlgmr.msra.gmra.mxu0 %v3982_v4  ;;  %v3674_v4 = vld [vmem:[%s4564_s2 + $0x4b8] sm:$0xff]  }
  0xb4   :  { %3393 = vmatpush3.bf16.msra.mxu0 %v3668_v61  ;;  %1844 = vmatprep.mubr.bf16.mxu0 %v4018_v14  ;;  %v3679_v14 = vld [vmem:[%s4564_s2 + $0x590] sm:$0xff]  }
  0xb5   :  { %3373 = vmatpush3.bf16.msra.mxu1 %v3666_v60  ;;  %3394 = vmatprep.subr.bf16.mxu0 %v3671_v63  ;;  %v3719_v60 = vld [vmem:[%s4565_s0 + $0x4c] ss:$28 sps:$4 sm:$0xff]  }
  0xb6   :  { %3374 = vmatprep.subr.bf16.mxu1 %v3669_v62 }
  0xb8   :  { %3395 = vmatpush3.bf16.msra.mxu0 %v3672_v2 }
  0xb9   :  { %3375 = vmatpush3.bf16.msra.mxu1 %v3670_v1  ;;  %3396 = vmatprep.subr.bf16.mxu0 %v3675_v6 }
  0xba   :  { %3376 = vmatprep.subr.bf16.mxu1 %v3673_v3 }
  0xbb   :  { %1845 = vmatmul.mubr.bf16.gmra.mxu0 %v4026_v16  ;;  %v3708_v16 = vld [vmem:[%s4565_s0 + $0xc] ss:$28 sps:$4 sm:$0xff]  }
  0xbc   :  { %3397 = vmatpush3.bf16.msra.mxu0 %v3676_v7  ;;  %2388 = vmatprep.mubr.bf16.mxu0 %v3708_v16 }
  0xbd   :  { %3377 = vmatpush3.bf16.msra.mxu1 %v3674_v4  ;;  %3398 = vmatprep.subr.bf16.mxu0 %v3679_v14 }
  0xbe   :  { %3378 = vmatprep.subr.bf16.mxu1 %v3677_v8  ;;  %v3720_v8 = vld [vmem:[%s4565_s0 + $0x48] ss:$28 sps:$4 sm:$0xff]  }
  0xc0   :  { %3399 = vmatpush3.bf16.msra.mxu0 %v3680_v10 }
  0xc1   :  { %3379 = vmatpush3.bf16.msra.mxu1 %v3678_v9  ;;  %3400 = vmatprep.subr.bf16.mxu0 %v3682_v32 }
  0xc2   :  { %3420 = vmatprep.subr.bf16.mxu1 %v3681_v11 }
  0xc4   :  { %2340 = vmatmul.mubr.bf16.vlgmr.msra.gmra.mxu1 %v3709_v33  ;;  %3401 = vmatpush3.bf16.msra.mxu0 %v3684_v13 }
  0xc5   :  { %3421 = vmatpush3.bf16.msra.mxu1 %v3683_v12  ;;  %2347 = vmatprep.mubr.bf16.mxu1 %v3710_v20 }
  0xc6   :  { %3422 = vmatprep.subr.bf16.mxu1 %v3685_v15  ;;  %3402 = vmatprep.subr.bf16.mxu0 %v3686_v17 }
  0xc8   :  { %3403 = vmatpush3.bf16.msra.mxu0 %v3688_v19 }
  0xc9   :  { %3423 = vmatpush3.bf16.msra.mxu1 %v3687_v18  ;;  %3404 = vmatprep.subr.bf16.mxu0 %v3690_v22 }
  0xca   :  { %3424 = vmatprep.subr.bf16.mxu1 %v3689_v21 }
  0xcc   :  { %2348 = vmatmul.mubr.bf16.gmra.mxu1 %v3711_v28  ;;  %3405 = vmatpush3.bf16.msra.mxu0 %v3692_v24 }
  0xcd   :  { %3425 = vmatpush3.bf16.msra.mxu1 %v3691_v23  ;;  %2437 = vmatprep.mubr.bf16.mxu1 %v3712_v30 }
  0xce   :  { %3426 = vmatprep.subr.bf16.mxu1 %v3693_v25  ;;  %3406 = vmatprep.subr.bf16.mxu0 %v3694_v26 }
  0xd0   :  { %3407 = vmatpush3.bf16.msra.mxu0 %v3696_v29 }
  0xd1   :  { %3427 = vmatpush3.bf16.msra.mxu1 %v3695_v27  ;;  %3476 = vmatprep.subr.bf16.mxu0 %v3704_v36 }
  0xd2   :  { %3428 = vmatprep.subr.bf16.mxu1 %v3697_v31 }
  0xd3   :  { %2389 = vmatmul.mubr.bf16.vlgmr.msra.gmra.mxu0 %v3713_v42 }
  0xd4   :  { %2396 = vmatprep.mubr.bf16.mxu0 %v3714_v44  ;;  %3477 = vmatpush3.bf16.msra.mxu0 %v3704_v36 }
  0xd5   :  { %3429 = vmatpush3.bf16.msra.mxu1 %v3698_v39  ;;  %3478 = vmatprep.subr.bf16.mxu0 %v3706_v41 }
  0xd6   :  { %3430 = vmatprep.subr.bf16.mxu1 %v3699_v34 }
  0xd8   :  { %3479 = vmatpush3.bf16.msra.mxu0 %v3706_v41 }
  0xd9   :  { %3431 = vmatpush3.bf16.msra.mxu1 %v3700_v45 }
  0xda   :  { %3432 = vmatprep.subr.bf16.mxu1 %v3701_v43 }
  0xdb   :  { %2397 = vmatmul.mubr.bf16.gmra.mxu0 %v3715_v46 }
  0xdc   :  { %3480 = vmatprep.mubr.msk.bf16.mxu0 %vm501_vm0, %v3716_v48 }
  0xdd   :  { %3433 = vmatpush3.bf16.msra.mxu1 %v3702_v50 }
  0xde   :  { %3434 = vmatprep.subr.bf16.mxu1 %v3703_v5 }
  0xe1   :  { %3435 = vmatpush3.bf16.msra.mxu1 %v3705_v47 }
  0xe3   :  { %v3116_v53 = vpop.f32.mrf.mxu0  ;;  %3481 = vmatmul.mubr.msk.bf16.vlgmr.msra.gmra.mxu0 %vm501_vm0, %v3718_v57 }
  0xe4   :  { %v3144_v49 = vpop.f32.mrf.mxu1  ;;  %2438 = vmatmul.mubr.bf16.vlgmr.msra.gmra.mxu1 %v3717_v54 }
  0xe5   :  { %v3117_v51 = vpop.f32.mrf.mxu0  ;;  %2445 = vmatprep.mubr.bf16.mxu1 %v3719_v60 }
  0xe6   :  { %v3145_v52 = vpop.f32.mrf.mxu1  ;;  %v3118_v55 = vadd.f32 %v3117_v51, %v3116_v53 }
  0xe7   :  { %v3146_v56 = vadd.f32 %v3145_v52, %v3144_v49  ;;  %v3119_v58 = vpop.f32.mrf.mxu0 }
  0xe8   :  { %v3147_v59 = vpop.f32.mrf.mxu1 }
  0xe9   :  { %v592_v61 = vadd.f32 %v3146_v56, %v3118_v55  ;;  %v3120_v62 = vpop.f32.mrf.mxu0 }
  0xea   :  { %v3148_v63 = vpop.f32.mrf.mxu1  ;;  %v3121_v0 = vadd.f32 %v3120_v62, %v3119_v58 }
  0xeb   :  { %v3149_v1 = vadd.f32 %v3148_v63, %v3147_v59  ;;  %v3122_v2 = vpop.f32.mrf.mxu0 }
  0xec   :  { %v3150_v3 = vpop.f32.mrf.mxu1  ;;  %2446 = vmatmul.mubr.bf16.gmra.mxu1 %v3720_v8 }
  0xed   :  { %v595_v6 = vadd.f32 %v3149_v1, %v3121_v0  ;;  %v3123_v4 = vpop.f32.mrf.mxu0 }
  0xee   :  { %v3151_v7 = vpop.f32.mrf.mxu1  ;;  %v3124_v14 = vadd.f32 %v3123_v4, %v3122_v2 }
  0xef   :  { %v3152_v9 = vadd.f32 %v3151_v7, %v3150_v3  ;;  %v3125_v10 = vpop.f32.mrf.mxu0 }
  0xf0   :  { %v3153_v11 = vpop.f32.mrf.mxu1 }
  0xf1   :  { %v600_v32 = vadd.f32 %v3152_v9, %v3124_v14  ;;  %v3126_v16 = vpop.f32.mrf.mxu0 }
  0xf2   :  { %v3154_v12 = vpop.f32.mrf.mxu1  ;;  %v3127_v13 = vadd.f32 %v3126_v16, %v3125_v10 }
  0xf3   :  { %v3155_v15 = vadd.f32 %v3154_v12, %v3153_v11 }
  0xf4   :  { %v3458_v33 = vpop.f32.mrf.mxu1 }
  0xf5   :  { %v603_v17 = vadd.f32 %v3155_v15, %v3127_v13 }
  0xf6   :  { %v689_v19 = vpop.f32.mrf.mxu1 }
  0xf8   :  { %v3459_v24 = vpop.f32.mrf.mxu1 }
  0xfa   :  { %v692_v30 = vpop.f32.mrf.mxu1 }
 0x103   :  { %v3172_v18 = vpop.f32.mrf.mxu0 }
 0x105   :  { %v3173_v20 = vpop.f32.mrf.mxu0 }
 0x106   :  { %v3174_v21 = vadd.f32 %v3173_v20, %v3172_v18 }
 0x107   :  { %v3175_v22 = vpop.f32.mrf.mxu0 }
 0x108   :  { %v641_v23 = vadd.f32 %v3174_v21, %v592_v61 }
 0x109   :  { %v3176_v25 = vpop.f32.mrf.mxu0 }
 0x10a   :  { %v3177_v26 = vadd.f32 %v3176_v25, %v3175_v22  ;;  %v4516_v27 = vadd.f32 %v689_v19, %v641_v23 }
 0x10b   :  { %v3178_v28 = vpop.f32.mrf.mxu0 }
 0x10c   :  { %v644_v29 = vadd.f32 %v3177_v26, %v595_v6 }
 0x10d   :  { %v3179_v31 = vpop.f32.mrf.mxu0 }
 0x10e   :  { %v3180_v36 = vadd.f32 %v3179_v31, %v3178_v28  ;;  %v4518_v37 = vadd.f32 %v692_v30, %v644_v29 }
 0x10f   :  { %v3181_v38 = vpop.f32.mrf.mxu0 }
 0x110   :  { %v649_v39 = vadd.f32 %v3180_v36, %v600_v32 }
 0x111   :  { %v3182_v40 = vpop.f32.mrf.mxu0 }
 0x112   :  { %v4520_v35 = vadd.f32 %v3458_v33, %v649_v39  ;;  %v3183_v34 = vadd.f32 %v3182_v40, %v3181_v38 }
 0x114   :  { %4572 = vst [vmem:[#allocation2_spill] sm:$0xff] %v4520_v35  ;;  %v3204_v41 = vpop.f32.mrf.mxu1  ;;  %v652_v42 = vadd.f32 %v3183_v34, %v603_v17 }
 0x116   :  { %v3205_v45 = vpop.f32.mrf.mxu1  ;;  %v4522_v44 = vadd.f32 %v3459_v24, %v652_v42 }
 0x117   :  { %v3206_v43 = vadd.f32 %v3205_v45, %v3204_v41 }
 0x118   :  { %4573 = vst [vmem:[#allocation3_spill] sm:$0xff] %v4522_v44  ;;  %v3207_v50 = vpop.f32.mrf.mxu1 }
 0x11a   :  { %v3208_v5 = vpop.f32.mrf.mxu1 }
 0x11b   :  { %v3209_v46 = vadd.f32 %v3208_v5, %v3207_v50 }
 0x11c   :  { %v3210_v47 = vpop.f32.mrf.mxu1 }
 0x11e   :  { %v3211_v48 = vpop.f32.mrf.mxu1 }
 0x11f   :  { %v3212_v53 = vadd.f32 %v3211_v48, %v3210_v47 }
 0x120   :  { %v3213_v49 = vpop.f32.mrf.mxu1 }
 0x122   :  { %v3214_v51 = vpop.f32.mrf.mxu1 }
 0x123   :  { %v3215_v52 = vadd.f32 %v3214_v51, %v3213_v49  ;;  %v3232_v54 = vpop.f32.mrf.mxu0 }
 0x125   :  { %v3233_v55 = vpop.f32.mrf.mxu0 }
 0x126   :  { %v3234_v56 = vadd.f32 %v3233_v55, %v3232_v54 }
 0x127   :  { %v3235_v57 = vpop.f32.mrf.mxu0 }
 0x128   :  { %v1189_v58 = vadd.f32 %v3234_v56, %v3206_v43 }
 0x129   :  { %v3236_v59 = vpop.f32.mrf.mxu0 }
 0x12a   :  { %v3237_v60 = vadd.f32 %v3236_v59, %v3235_v57 }
 0x12b   :  { %v3238_v61 = vpop.f32.mrf.mxu0 }
 0x12c   :  { %v1192_v62 = vadd.f32 %v3237_v60, %v3209_v46 }
 0x12d   :  { %v3239_v63 = vpop.f32.mrf.mxu0 }
 0x12e   :  { %v3240_v0 = vadd.f32 %v3239_v63, %v3238_v61 }
 0x12f   :  { %v3241_v1 = vpop.f32.mrf.mxu0 }
 0x130   :  { %v1197_v2 = vadd.f32 %v3240_v0, %v3212_v53 }
 0x131   :  { %v3242_v3 = vpop.f32.mrf.mxu0 }
 0x132   :  { %v3243_v6 = vadd.f32 %v3242_v3, %v3241_v1 }
 0x133   :  { %v3466_v7 = vpop.f32.mrf.mxu0 }
 0x134   :  { %v3260_v4 = vpop.f32.mrf.mxu1  ;;  %v1200_v8 = vadd.f32 %v3243_v6, %v3215_v52 }
 0x135   :  { %v1286_v10 = vpop.f32.mrf.mxu0 }
 0x136   :  { %v3261_v14 = vpop.f32.mrf.mxu1 }
 0x137   :  { %v3262_v9 = vadd.f32 %v3261_v14, %v3260_v4  ;;  %v3467_v16 = vpop.f32.mrf.mxu0 }
 0x138   :  { %v3263_v11 = vpop.f32.mrf.mxu1 }
 0x139   :  { %v1238_v32 = vadd.f32 %v3262_v9, %v1189_v58  ;;  %v1289_v33 = vpop.f32.mrf.mxu0 }
 0x13a   :  { %v3264_v12 = vpop.f32.mrf.mxu1 }
 0x13b   :  { %v3265_v13 = vadd.f32 %v3264_v12, %v3263_v11  ;;  %v4524_v15 = vadd.f32 %v1286_v10, %v1238_v32 }
 0x13c   :  { %v3266_v17 = vpop.f32.mrf.mxu1 }
 0x13d   :  { %v1241_v19 = vadd.f32 %v3265_v13, %v1192_v62 }
 0x13e   :  { %v3267_v20 = vpop.f32.mrf.mxu1 }
 0x13f   :  { %v3268_v21 = vadd.f32 %v3267_v20, %v3266_v17  ;;  %v4528_v22 = vadd.f32 %v1289_v33, %v1241_v19 }
 0x140   :  { %v3269_v23 = vpop.f32.mrf.mxu1 }
 0x141   :  { %v1246_v24 = vadd.f32 %v3268_v21, %v1197_v2 }
 0x142   :  { %v3270_v26 = vpop.f32.mrf.mxu1 }
 0x143   :  { %v4532_v28 = vadd.f32 %v3466_v7, %v1246_v24  ;;  %v3271_v29 = vadd.f32 %v3270_v26, %v3269_v23 }
 0x145   :  { %4574 = vst [vmem:[#allocation4_spill] sm:$0xff] %v4532_v28  ;;  %v1249_v30 = vadd.f32 %v3271_v29, %v1200_v8 }
 0x147   :  { %v4536_v36 = vadd.f32 %v3467_v16, %v1249_v30 }
 0x149   :  { %4575 = vst [vmem:[#allocation5_spill] sm:$0xff] %v4536_v36 }
 0x153   :  { %v3292_v39 = vpop.f32.mrf.mxu0 }
 0x154   :  { %v3320_v40 = vpop.f32.mrf.mxu1 }
 0x155   :  { %v3293_v34 = vpop.f32.mrf.mxu0 }
 0x156   :  { %v3321_v41 = vpop.f32.mrf.mxu1  ;;  %v3294_v12 = vadd.f32 %v3293_v34, %v3292_v39 }
 0x157   :  { %v3295_v42 = vpop.f32.mrf.mxu0  ;;  %v3322_v13 = vadd.f32 %v3321_v41, %v3320_v40 }
 0x158   :  { %v3323_v45 = vpop.f32.mrf.mxu1 }
 0x159   :  { %v3296_v43 = vpop.f32.mrf.mxu0  ;;  %v1790_v26 = vadd.f32 %v3322_v13, %v3294_v12 }
 0x15a   :  { %v3324_v50 = vpop.f32.mrf.mxu1  ;;  %v3297_v33 = vadd.f32 %v3296_v43, %v3295_v42 }
 0x15b   :  { %v3298_v5 = vpop.f32.mrf.mxu0  ;;  %v3325_v19 = vadd.f32 %v3324_v50, %v3323_v45 }
 0x15c   :  { %v3326_v46 = vpop.f32.mrf.mxu1 }
 0x15d   :  { %v3299_v47 = vpop.f32.mrf.mxu0  ;;  %v1793_v38 = vadd.f32 %v3325_v19, %v3297_v33 }
 0x15e   :  { %v3327_v48 = vpop.f32.mrf.mxu1  ;;  %v3300_v44 = vadd.f32 %v3299_v47, %v3298_v5  ;;  %v2514_v5 = vpop.permute.xlu0 %2513 }
 0x15f   :  { %v3301_v53 = vpop.f32.mrf.mxu0  ;;  %v3328_v28 = vadd.f32 %v3327_v48, %v3326_v46 }
 0x160   :  { %v3329_v49 = vpop.f32.mrf.mxu1 }
 0x161   :  { %v3302_v51 = vpop.f32.mrf.mxu0 }
 0x162   :  { %v3330_v52 = vpop.f32.mrf.mxu1  ;;  %v3303_v45 = vadd.f32 %v3302_v51, %v3301_v53 }
 0x163   :  { %v3331_v43 = vadd.f32 %v3330_v52, %v3329_v49 }
 0x164   :  { %v4540_v55 = vpop.f32.mrf.mxu1 }
 0x165   :  { %v1801_v48 = vadd.f32 %v3331_v43, %v3303_v45 }
 0x166   :  { %v1887_v57 = vpop.f32.mrf.mxu1 }
 0x168   :  { %v4542_v59 = vpop.f32.mrf.mxu1 }
 0x16a   :  { %v1890_v61 = vpop.f32.mrf.mxu1 }
 0x173   :  { %v3348_v54 = vpop.f32.mrf.mxu0 }
 0x175   :  { %v3349_v56 = vpop.f32.mrf.mxu0 }
 0x176   :  { %v3350_v20 = vadd.f32 %v3349_v56, %v3348_v54 }
 0x177   :  { %v3351_v58 = vpop.f32.mrf.mxu0 }
 0x178   :  { %v1839_v25 = vadd.f32 %v3350_v20, %v1790_v26  ;;  %v4579_v26 = vld [vmem:[#allocation4_spill] sm:$0xff] }
 0x179   :  { %v3352_v60 = vpop.f32.mrf.mxu0 }
 0x17a   :  { %v3353_v23 = vadd.f32 %v3352_v60, %v3351_v58  ;;  %v1888_v54 = vadd.f32 %v1887_v57, %v1839_v25  ;;  %v4576_v25 = vmax.f32 %v4516_v27, %v4524_v15 }
 0x17b   :  { %v3354_v62 = vpop.f32.mrf.mxu0 }
 0x17c   :  { %v1842_v35 = vadd.f32 %v3353_v23, %v1793_v38  ;;  %v1902_v51 = vmax.f32 %v4576_v25, %v1888_v54  ;;  %v4578_v23 = vld [vmem:[#allocation2_spill] sm:$0xff] }
 0x17d   :  { %v3355_v0 = vpop.f32.mrf.mxu0 }
 0x17e   :  { %v3356_v56 = vadd.f32 %v3355_v0, %v3354_v62  ;;  %v1891_v12 = vadd.f32 %v1890_v61, %v1842_v35 }
 0x17f   :  { %v3357_v2 = vpop.f32.mrf.mxu0 }
 0x181   :  { %v3358_v6 = vpop.f32.mrf.mxu0 }
 0x184   :  { %v3380_v63 = vpop.f32.mrf.mxu1 }
 0x186   :  { %v3381_v1 = vpop.f32.mrf.mxu1 }
 0x187   :  { %v3382_v18 = vadd.f32 %v3381_v1, %v3380_v63  ;;  %v3359_v63 = vadd.f32 %v3358_v6, %v3357_v2 }
 0x188   :  { %v3383_v3 = vpop.f32.mrf.mxu1 }
 0x189   :  { %v1850_v57 = vadd.f32 %v3359_v63, %v1801_v48 }
 0x18a   :  { %v3384_v4 = vpop.f32.mrf.mxu1 }
 0x18b   :  { %v3385_v58 = vadd.f32 %v3384_v4, %v3383_v3  ;;  %v1899_v15 = vadd.f32 %v4542_v59, %v1850_v57  ;;  %v4582_v59 = vld [vmem:[#allocation5_spill] sm:$0xff] }
 0x18c   :  { %v3386_v8 = vpop.f32.mrf.mxu1 }
 0x18e   :  { %v3387_v10 = vpop.f32.mrf.mxu1 }
 0x18f   :  { %v3388_v49 = vadd.f32 %v3387_v10, %v3386_v8 }
 0x190   :  { %v3389_v16 = vpop.f32.mrf.mxu1 }
 0x192   :  { %v3390_v24 = vpop.f32.mrf.mxu1 }
 0x193   :  { %v3408_v7 = vpop.f32.mrf.mxu0  ;;  %v3391_v6 = vadd.f32 %v3390_v24, %v3389_v16  ;;  %v4580_v16 = vmax.f32 %v4578_v23, %v4579_v26 }
 0x195   :  { %v3409_v14 = vpop.f32.mrf.mxu0 }
 0x196   :  { %v3410_v29 = vadd.f32 %v3409_v14, %v3408_v7  ;;  %v1798_v14 = vadd.f32 %v3328_v28, %v3300_v44  ;;  %v4577_v28 = vmax.f32 %v4518_v37, %v4528_v22  ;;  %v2524_v22 = vpop.permute.xlu1 %2523 }
 0x197   :  { %v3411_v9 = vpop.f32.mrf.mxu0 }
 0x198   :  { %v2391_v40 = vadd.f32 %v3410_v29, %v3382_v18  ;;  %v1847_v53 = vadd.f32 %v3356_v56, %v1798_v14  ;;  %v1903_v61 = vmax.f32 %v4577_v28, %v1891_v12  ;;  %v4581_v29 = vld [vmem:[#allocation3_spill] sm:$0xff] }
 0x199   :  { %v3412_v11 = vpop.f32.mrf.mxu0 }
 0x19a   :  { %v3413_v34 = vadd.f32 %v3412_v11, %v3411_v9  ;;  %v2519_v11 = vpop.permute.xlu0 %2518  ;;  %v1896_v8 = vadd.f32 %v4540_v55, %v1847_v53 }
 0x19b   :  { %v3414_v32 = vpop.f32.mrf.mxu0 }
 0x19c   :  { %v2394_v46 = vadd.f32 %v3413_v34, %v3385_v58  ;;  %v1904_v24 = vmax.f32 %v4580_v16, %v1896_v8 }
 0x19d   :  { %v3415_v17 = vpop.f32.mrf.mxu0 }
 0x19e   :  { %v3416_v38 = vadd.f32 %v3415_v17, %v3414_v32 }
 0x19f   :  { %v3417_v21 = vpop.f32.mrf.mxu0 }
 0x1a0   :  { %v2399_v62 = vadd.f32 %v3416_v38, %v3388_v49 }
 0x1a1   :  { %v3418_v30 = vpop.f32.mrf.mxu0 }
 0x1a2   :  { %v3419_v44 = vadd.f32 %v3418_v30, %v3417_v21  ;;  %v4583_v30 = vmax.f32 %v4581_v29, %v4582_v59 }
 0x1a3   :  { %v3482_v36 = vpop.f32.mrf.mxu0 }
 0x1a4   :  { %v3436_v31 = vpop.f32.mrf.mxu1  ;;  %v2402_v32 = vadd.f32 %v3419_v44, %v3391_v6 }
 0x1a5   :  { %v2488_v42 = vpop.f32.mrf.mxu0 }
 0x1a6   :  { %v3437_v39 = vpop.f32.mrf.mxu1 }
 0x1a7   :  { %v3438_v41 = vadd.f32 %v3437_v39, %v3436_v31  ;;  %v3483_v7 = vpop.f32.mrf.mxu0  ;;  %v1905_v39 = vmax.f32 %v4583_v30, %v1899_v15 }
 0x1a8   :  { %v3439_v50 = vpop.f32.mrf.mxu1 }
 0x1a9   :  { %v2440_v60 = vadd.f32 %v3438_v41, %v2391_v40  ;;  %v2491_v9 = vpop.f32.mrf.mxu0  ;;  %v2529_v41 = vpop.permute.xlu1 %2528 }
 0x1aa   :  { %v3440_v1 = vpop.f32.mrf.mxu1 }
 0x1ab   :  { %v3441_v47 = vadd.f32 %v3440_v1, %v3439_v50  ;;  %v2489_v18 = vadd.f32 %v2488_v42, %v2440_v60 }
 0x1ac   :  { %v3442_v31 = vpop.f32.mrf.mxu1 }
 0x1ad   :  { %v2443_v52 = vadd.f32 %v3441_v47, %v2394_v46  ;;  %v2503_v0 = vmax.f32 %v1902_v51, %v2489_v18 }
 0x1ae   :  { %v3443_v35 = vpop.f32.mrf.mxu1 }
 0x1af   :  { %v3444_v2 = vadd.f32 %v3443_v35, %v3442_v31  ;;  %v2492_v3 = vadd.f32 %v2491_v9, %v2443_v52  ;;  %v2531_v17 = vadd.f32 %v2514_v5, %v2503_v0 }
 0x1b0   :  { %v3445_v4 = vpop.f32.mrf.mxu1 }
 0x1b1   :  { %v2448_v10 = vadd.f32 %v3444_v2, %v2399_v62  ;;  %v2504_v27 = vmax.f32 %v1903_v61, %v2492_v3 }
 0x1b2   :  { %v3446_v13 = vpop.f32.mrf.mxu1 }
 0x1b3   :  { %v2532_v33 = vadd.f32 %v2519_v11, %v2504_v27  ;;  %v3447_v19 = vadd.f32 %v3446_v13, %v3445_v4  ;;  %v2497_v37 = vadd.f32 %v3482_v36, %v2448_v10 }
 0x1b5   :  { %v3092_v20 = vpack.c.bf16 %v2532_v33, %v2531_v17  ;;  %v2451_v21 = vadd.f32 %v3447_v19, %v2402_v32  ;;  %v2505_v55 = vmax.f32 %v1904_v24, %v2497_v37 }
 0x1b7   :  { %3093 = vst [vmem:[%s4567_s3] sm:$0xff] %v3092_v20   ;;  %v2500_v40 = vadd.f32 %v3483_v7, %v2451_v21  ;;  %v2533_v36 = vadd.f32 %v2524_v22, %v2505_v55 }
 0x1b9   :  { %v2506_v34 = vmax.f32 %v1905_v39, %v2500_v40 }
 0x1bb   :  { %v2534_v42 = vadd.f32 %v2529_v41, %v2506_v34 }
 0x1bd   :  { %v3097_v45 = vpack.c.bf16 %v2534_v42, %v2533_v36 }
 0x1bf   :  { %3099 = vst [vmem:[%s4567_s3 + $0x8] sm:$0xff] %v3097_v45  }

// kernel: loss_nn_forward.5
= control target key start
LH: loop header
LB: loop body
LE: loop exit
PB: predicated region body
PF: predicated region fallthrough
CT: control target
= control target key end

     0   :  { %vm514_vm0 = vcmask 261120   ;;  %s4601_s0 = inlined_call_operand.vmem [shape: bf16[4,32,800], index: 0, kind: input, shape index: {}]   ;;  %s4602_s1 = inlined_call_operand.vmem [shape: bf16[800,64], index: 1, kind: input, shape index: {}]   ;;  %s4603_s2 = inlined_call_operand.vmem [shape: f32[1,64], index: 2, kind: input, shape index: {}]   ;;  %s4604_s3 = inlined_call_operand.vmem [shape: bf16[1024,64], index: 3, kind: input, shape index: {}]   ;;  %s4605_s4 = inlined_call_operand.vmem [shape: f32[1,64], index: 4, kind: input, shape index: {}]   ;;  %s4606_s5 = inlined_call_operand.vmem [shape: bf16[64,10], index: 5, kind: input, shape index: {}]   ;;  %s4607_s6 = inlined_call_operand.vmem [shape: f32[1,10], index: 6, kind: input, shape index: {}]   ;;  %s4608_s7 = inlined_call_operand.hbm [shape: f32[2,10], index: 7, kind: output, shape index: {}]  }
   0x1   :  { %v3601_v0 = vld [vmem:[%s4602_s1 + $0x78] sm:$0xff]   ;;  %v3624_v4 = vld [vmem:[%s4602_s1 + $0x70] sm:$0xff]   ;;  %v3648_v8 = vld [vmem:[%s4602_s1 + $0x68] sm:$0xff]  }
   0x2   :  { %v3606_v1 = vld [vmem:[%s4602_s1 + $0xf8] sm:$0xff]   ;;  %2808 = vmatprep.subr.bf16.mxu0 %v3601_v0  ;;  %v3630_v5 = vld [vmem:[%s4602_s1 + $0xf0] sm:$0xff]   ;;  %v3654_v9 = vld [vmem:[%s4602_s1 + $0xe8] sm:$0xff]  }
   0x3   :  { %v3612_v2 = vld [vmem:[%s4602_s1 + $0x38] sm:$0xff]   ;;  %2836 = vmatprep.subr.bf16.mxu1 %v3606_v1  ;;  %v3636_v6 = vld [vmem:[%s4602_s1 + $0x30] sm:$0xff]   ;;  %v3660_v10 = vld [vmem:[%s4602_s1 + $0x28] sm:$0xff]  }
   0x4   :  { %v3618_v3 = vld [vmem:[%s4602_s1 + $0xb8] sm:$0xff]   ;;  %2809 = vmatpush3.bf16.msra.mxu0 %v3612_v2  ;;  %v3642_v7 = vld [vmem:[%s4602_s1 + $0xb0] sm:$0xff]   ;;  %v3666_v11 = vld [vmem:[%s4602_s1 + $0xa8] sm:$0xff]  }
   0x5   :  { %2837 = vmatpush3.bf16.msra.mxu1 %v3618_v3  ;;  %2810 = vmatprep.subr.bf16.mxu0 %v3624_v4  ;;  %v3672_v12 = vld [vmem:[%s4602_s1 + $0x60] sm:$0xff]   ;;  %v3696_v16 = vld [vmem:[%s4602_s1 + $0x58] sm:$0xff]   ;;  %v3720_v20 = vld [vmem:[%s4602_s1 + $0x50] sm:$0xff]  }
   0x6   :  { %2838 = vmatprep.subr.bf16.mxu1 %v3630_v5  ;;  %v3678_v13 = vld [vmem:[%s4602_s1 + $0xe0] sm:$0xff]   ;;  %v3702_v17 = vld [vmem:[%s4602_s1 + $0xd8] sm:$0xff]   ;;  %v3726_v21 = vld [vmem:[%s4602_s1 + $0xd0] sm:$0xff]  }
   0x7   :  { %v3684_v14 = vld [vmem:[%s4602_s1 + $0x20] sm:$0xff]   ;;  %v3708_v18 = vld [vmem:[%s4602_s1 + $0x18] sm:$0xff]   ;;  %v3732_v22 = vld [vmem:[%s4602_s1 + $0x10] sm:$0xff]  }
   0x8   :  { %2811 = vmatpush3.bf16.msra.mxu0 %v3636_v6  ;;  %v3690_v15 = vld [vmem:[%s4602_s1 + $0xa0] sm:$0xff]   ;;  %v3714_v19 = vld [vmem:[%s4602_s1 + $0x98] sm:$0xff]   ;;  %v3738_v23 = vld [vmem:[%s4602_s1 + $0x90] sm:$0xff]  }
   0x9   :  { %2839 = vmatpush3.bf16.msra.mxu1 %v3642_v7  ;;  %2812 = vmatprep.subr.bf16.mxu0 %v3648_v8  ;;  %v3744_v24 = vld [vmem:[%s4602_s1 + $0x48] sm:$0xff]   ;;  %v3768_v28 = vld [vmem:[%s4602_s1 + $0x40] sm:$0xff]   ;;  %v3805_v36 = vld [vmem:[%s4602_s1 + $0x178] sm:$0xff]  }
   0xa   :  { %2840 = vmatprep.subr.bf16.mxu1 %v3654_v9  ;;  %v3750_v25 = vld [vmem:[%s4602_s1 + $0xc8] sm:$0xff]   ;;  %v3774_v29 = vld [vmem:[%s4602_s1 + $0xc0] sm:$0xff]   ;;  %v3816_v38 = vld [vmem:[%s4602_s1 + $0x138] sm:$0xff]  }
   0xb   :  { %v3756_v26 = vld [vmem:[%s4602_s1 + $0x8] sm:$0xff]   ;;  %v3780_v30 = vld [vmem:[%s4602_s1] sm:$0xff]   ;;  %v3822_v39 = vld [vmem:[%s4602_s1 + $0x170] sm:$0xff]  }
   0xc   :  { %2813 = vmatpush3.bf16.msra.mxu0 %v3660_v10  ;;  %v3762_v27 = vld [vmem:[%s4602_s1 + $0x88] sm:$0xff]   ;;  %v3786_v31 = vld [vmem:[%s4602_s1 + $0x80] sm:$0xff]   ;;  %v3829_v40 = vld [vmem:[%s4602_s1 + $0x130] sm:$0xff]  }
   0xd   :  { %2841 = vmatpush3.bf16.msra.mxu1 %v3666_v11  ;;  %2814 = vmatprep.subr.bf16.mxu0 %v3672_v12  ;;  %v3334_v32 = vld [vmem:[%s4601_s0] ss:$28 sps:$4 sm:$0xff]   ;;  %v3337_v34 = vld [vmem:[%s4601_s0 + $0x8] ss:$28 sps:$4 sm:$0xff]   ;;  %v3349_v43 = vld [vmem:[%s4601_s0 + $0x38] ss:$28 sps:$4 sm:$0xff]  }
   0xe   :  { %2842 = vmatprep.subr.bf16.mxu1 %v3678_v13  ;;  %v3336_v33 = vld [vmem:[%s4601_s0 + $0x4] ss:$28 sps:$4 sm:$0xff]   ;;  %v3339_v35 = vld [vmem:[%s4601_s0 + $0xc] ss:$28 sps:$4 sm:$0xff]   ;;  %v3345_v41 = vld [vmem:[%s4601_s0 + $0x3c] ss:$28 sps:$4 sm:$0xff]  }
   0xf   :  { %553 = vmatprep.mubr.bf16.mxu0 %v3336_v33  ;;  %602 = vmatprep.mubr.bf16.mxu1 %v3339_v35  ;;  %v3810_v37 = vld [vmem:[%s4602_s1 + $0x188] sm:$0xff]   ;;  %v3347_v42 = vld [vmem:[%s4601_s0 + $0x44] ss:$28 sps:$4 sm:$0xff]   ;;  %v3356_v50 = vld [vmem:[%s4601_s0 + $0x18] ss:$28 sps:$4 sm:$0xff]  }
  0x10   :  { %2815 = vmatpush3.bf16.msra.mxu0 %v3684_v14  ;;  %v3350_v44 = vld [vmem:[%s4601_s0 + $0x40] ss:$28 sps:$4 sm:$0xff]   ;;  %v3848_v45 = vld [vmem:[%s4602_s1 + $0x168] sm:$0xff]   ;;  %v3898_v54 = vld [vmem:[%s4602_s1 + $0x150] sm:$0xff]  }
  0x11   :  { %2843 = vmatpush3.bf16.msra.mxu1 %v3690_v15  ;;  %2816 = vmatprep.subr.bf16.mxu0 %v3696_v16  ;;  %v3853_v46 = vld [vmem:[%s4602_s1 + $0x180] sm:$0xff]   ;;  %v3859_v47 = vld [vmem:[%s4602_s1 + $0x128] sm:$0xff]   ;;  %v3882_v51 = vld [vmem:[%s4602_s1 + $0x158] sm:$0xff]  }
  0x12   :  { %2844 = vmatprep.subr.bf16.mxu1 %v3702_v17  ;;  %v3865_v48 = vld [vmem:[%s4602_s1 + $0x160] sm:$0xff]   ;;  %v3358_v52 = vld [vmem:[%s4601_s0 + $0x50] ss:$28 sps:$4 sm:$0xff]   ;;  %v3892_v53 = vld [vmem:[%s4602_s1 + $0x118] sm:$0xff]  }
  0x13   :  { %v3872_v49 = vld [vmem:[%s4602_s1 + $0x120] sm:$0xff]   ;;  %v3907_v55 = vld [vmem:[%s4602_s1 + $0x110] sm:$0xff]   ;;  %v3913_v56 = vld [vmem:[%s4602_s1 + $0x148] sm:$0xff]  }
  0x14   :  { %2817 = vmatpush3.bf16.msra.mxu0 %v3708_v18  ;;  %v3368_v57 = vld [vmem:[%s4601_s0 + $0x14] ss:$28 sps:$4 sm:$0xff]   ;;  %v3924_v58 = vld [vmem:[%s4602_s1 + $0x108] sm:$0xff]   ;;  %v3930_v59 = vld [vmem:[%s4602_s1 + $0x140] sm:$0xff]  }
  0x15   :  { %2845 = vmatpush3.bf16.msra.mxu1 %v3714_v19  ;;  %2818 = vmatprep.subr.bf16.mxu0 %v3720_v20  ;;  %v3374_v60 = vld [vmem:[%s4601_s0 + $0x74] ss:$28 sps:$4 sm:$0xff]   ;;  %v3941_v61 = vld [vmem:[%s4602_s1 + $0x100] sm:$0xff]   ;;  %v3369_v63 = vld [vmem:[%s4601_s0 + $0x4c] ss:$28 sps:$4 sm:$0xff]  }
  0x16   :  { %2846 = vmatprep.subr.bf16.mxu1 %v3726_v21  ;;  %v3366_v62 = vld [vmem:[%s4601_s0 + $0x10] ss:$28 sps:$4 sm:$0xff]   ;;  %v3377_v33 = vld [vmem:[%s4601_s0 + $0x7c] ss:$28 sps:$4 sm:$0xff]  }
  0x17   :  { %v3378_v35 = vld [vmem:[%s4601_s0 + $0xac] ss:$28 sps:$4 sm:$0xff]  }
  0x18   :  { %2819 = vmatpush3.bf16.msra.mxu0 %v3732_v22 }
  0x19   :  { %2847 = vmatpush3.bf16.msra.mxu1 %v3738_v23  ;;  %2820 = vmatprep.subr.bf16.mxu0 %v3744_v24 }
  0x1a   :  { %2848 = vmatprep.subr.bf16.mxu1 %v3750_v25 }
  0x1c   :  { %2821 = vmatpush3.bf16.msra.mxu0 %v3756_v26 }
  0x1d   :  { %2849 = vmatpush3.bf16.msra.mxu1 %v3762_v27  ;;  %2822 = vmatprep.subr.bf16.mxu0 %v3768_v28 }
  0x1e   :  { %2850 = vmatprep.subr.bf16.mxu1 %v3774_v29 }
  0x20   :  { %2823 = vmatpush3.bf16.msra.mxu0 %v3780_v30 }
  0x21   :  { %2851 = vmatpush3.bf16.msra.mxu1 %v3786_v31  ;;  %2864 = vmatprep.subr.bf16.mxu0 %v3805_v36 }
  0x22   :  { %3253 = vmatprep.subr.bf16.mxu1 %v3810_v37 }
  0x23   :  { %554 = vmatmul.mubr.bf16.vlgmr.msra.gmra.mxu0 %v3334_v32  ;;  %v3371_v32 = vld [vmem:[%s4601_s0 + $0x48] ss:$28 sps:$4 sm:$0xff]  }
  0x24   :  { %603 = vmatmul.mubr.bf16.vlgmr.msra.gmra.mxu1 %v3337_v34  ;;  %2865 = vmatpush3.bf16.msra.mxu0 %v3816_v38  ;;  %v3372_v34 = vld [vmem:[%s4601_s0 + $0x70] ss:$28 sps:$4 sm:$0xff]  }
  0x25   :  { %3254 = vmatpush3.bf16.msra.mxu1 %v3810_v37  ;;  %2866 = vmatprep.subr.bf16.mxu0 %v3822_v39 }
  0x26   :  { %561 = vmatprep.mubr.bf16.mxu0 %v3345_v41  ;;  %610 = vmatprep.mubr.bf16.mxu1 %v3347_v42  ;;  %v3380_v41 = vld [vmem:[%s4601_s0 + $0xa8] ss:$28 sps:$4 sm:$0xff]  }
  0x27   :  { %3255 = vmatprep.subr.bf16.mxu1 %v3853_v46  ;;  %v3386_v42 = vld [vmem:[%s4601_s0 + $0x84] ss:$28 sps:$4 sm:$0xff]  }
  0x28   :  { %2867 = vmatpush3.bf16.msra.mxu0 %v3829_v40 }
  0x29   :  { %2868 = vmatprep.subr.bf16.mxu0 %v3848_v45  ;;  %3256 = vmatpush3.bf16.msra.mxu1 %v3853_v46 }
  0x2a   :  { %2896 = vmatprep.subr.bf16.mxu1 %v3601_v0 }
  0x2b   :  { %562 = vmatmul.mubr.bf16.gmra.mxu0 %v3349_v43  ;;  %v3375_v43 = vld [vmem:[%s4601_s0 + $0x78] ss:$28 sps:$4 sm:$0xff]  }
  0x2c   :  { %611 = vmatmul.mubr.bf16.gmra.mxu1 %v3350_v44  ;;  %2869 = vmatpush3.bf16.msra.mxu0 %v3859_v47  ;;  %v3381_v44 = vld [vmem:[%s4601_s0 + $0xb4] ss:$28 sps:$4 sm:$0xff]  }
  0x2d   :  { %2870 = vmatprep.subr.bf16.mxu0 %v3865_v48  ;;  %3257 = vmatprep.mubr.msk.bf16.mxu1 %vm514_vm0, %v3356_v50  ;;  %v3383_v50 = vld [vmem:[%s4601_s0 + $0xb0] ss:$28 sps:$4 sm:$0xff]  }
  0x2e   :  { %651 = vmatprep.mubr.bf16.mxu0 %v3368_v57  ;;  %v3384_v57 = vld [vmem:[%s4601_s0 + $0x80] ss:$28 sps:$4 sm:$0xff]  }
  0x30   :  { %2871 = vmatpush3.bf16.msra.mxu0 %v3872_v49 }
  0x31   :  { %2872 = vmatprep.subr.bf16.mxu0 %v3882_v51 }
  0x34   :  { %3258 = vmatmul.mubr.msk.bf16.vlgmr.msra.gmra.mxu1 %vm514_vm0, %v3358_v52  ;;  %2873 = vmatpush3.bf16.msra.mxu0 %v3892_v53  ;;  %v3387_v52 = vld [vmem:[%s4601_s0 + $0x88] ss:$28 sps:$4 sm:$0xff]  }
  0x35   :  { %2897 = vmatpush3.bf16.msra.mxu1 %v3612_v2  ;;  %2874 = vmatprep.subr.bf16.mxu0 %v3898_v54 }
  0x36   :  { %2898 = vmatprep.subr.bf16.mxu1 %v3624_v4  ;;  %842 = vmatprep.mubr.bf16.mxu1 %v3374_v60  ;;  %v3388_v60 = vld [vmem:[%s4601_s0 + $0xc0] ss:$28 sps:$4 sm:$0xff]  }
  0x38   :  { %2875 = vmatpush3.bf16.msra.mxu0 %v3907_v55 }
  0x39   :  { %2899 = vmatpush3.bf16.msra.mxu1 %v3636_v6  ;;  %2876 = vmatprep.subr.bf16.mxu0 %v3913_v56 }
  0x3a   :  { %2900 = vmatprep.subr.bf16.mxu1 %v3648_v8 }
  0x3c   :  { %2877 = vmatpush3.bf16.msra.mxu0 %v3924_v58 }
  0x3d   :  { %2901 = vmatpush3.bf16.msra.mxu1 %v3660_v10  ;;  %2878 = vmatprep.subr.bf16.mxu0 %v3930_v59 }
  0x3e   :  { %2902 = vmatprep.subr.bf16.mxu1 %v3672_v12 }
  0x40   :  { %2879 = vmatpush3.bf16.msra.mxu0 %v3941_v61 }
  0x41   :  { %2903 = vmatpush3.bf16.msra.mxu1 %v3684_v14  ;;  %2924 = vmatprep.subr.bf16.mxu0 %v3606_v1 }
  0x42   :  { %2904 = vmatprep.subr.bf16.mxu1 %v3696_v16 }
  0x43   :  { %652 = vmatmul.mubr.bf16.vlgmr.msra.gmra.mxu0 %v3366_v62  ;;  %v3394_v62 = vld [vmem:[%s4601_s0 + $0xe4] ss:$28 sps:$4 sm:$0xff]  }
  0x44   :  { %2925 = vmatpush3.bf16.msra.mxu0 %v3618_v3  ;;  %659 = vmatprep.mubr.bf16.mxu0 %v3369_v63  ;;  %v3391_v63 = vld [vmem:[%s4601_s0 + $0xb8] ss:$28 sps:$4 sm:$0xff]  }
  0x45   :  { %2905 = vmatpush3.bf16.msra.mxu1 %v3708_v18  ;;  %2926 = vmatprep.subr.bf16.mxu0 %v3630_v5 }
  0x46   :  { %2906 = vmatprep.subr.bf16.mxu1 %v3720_v20 }
  0x48   :  { %2927 = vmatpush3.bf16.msra.mxu0 %v3642_v7 }
  0x49   :  { %2907 = vmatpush3.bf16.msra.mxu1 %v3732_v22  ;;  %2928 = vmatprep.subr.bf16.mxu0 %v3654_v9 }
  0x4a   :  { %2908 = vmatprep.subr.bf16.mxu1 %v3744_v24 }
  0x4b   :  { %660 = vmatmul.mubr.bf16.gmra.mxu0 %v3371_v32 }
  0x4c   :  { %2929 = vmatpush3.bf16.msra.mxu0 %v3666_v11  ;;  %891 = vmatprep.mubr.bf16.mxu0 %v3377_v33 }
  0x4d   :  { %2909 = vmatpush3.bf16.msra.mxu1 %v3756_v26  ;;  %2930 = vmatprep.subr.bf16.mxu0 %v3678_v13 }
  0x4e   :  { %2910 = vmatprep.subr.bf16.mxu1 %v3768_v28 }
  0x50   :  { %2931 = vmatpush3.bf16.msra.mxu0 %v3690_v15 }
  0x51   :  { %2911 = vmatpush3.bf16.msra.mxu1 %v3780_v30  ;;  %2932 = vmatprep.subr.bf16.mxu0 %v3702_v17 }
  0x52   :  { %2952 = vmatprep.subr.bf16.mxu1 %v3805_v36 }
  0x54   :  { %843 = vmatmul.mubr.bf16.vlgmr.msra.gmra.mxu1 %v3372_v34  ;;  %2933 = vmatpush3.bf16.msra.mxu0 %v3714_v19 }
  0x55   :  { %2953 = vmatpush3.bf16.msra.mxu1 %v3816_v38  ;;  %850 = vmatprep.mubr.bf16.mxu1 %v3378_v35 }
  0x56   :  { %2954 = vmatprep.subr.bf16.mxu1 %v3822_v39  ;;  %2934 = vmatprep.subr.bf16.mxu0 %v3726_v21 }
  0x58   :  { %2935 = vmatpush3.bf16.msra.mxu0 %v3738_v23 }
  0x59   :  { %2955 = vmatpush3.bf16.msra.mxu1 %v3829_v40  ;;  %2936 = vmatprep.subr.bf16.mxu0 %v3750_v25 }
  0x5a   :  { %2956 = vmatprep.subr.bf16.mxu1 %v3848_v45 }
  0x5c   :  { %851 = vmatmul.mubr.bf16.gmra.mxu1 %v3380_v41  ;;  %2937 = vmatpush3.bf16.msra.mxu0 %v3762_v27 }
  0x5d   :  { %2957 = vmatpush3.bf16.msra.mxu1 %v3859_v47  ;;  %940 = vmatprep.mubr.bf16.mxu1 %v3386_v42 }
  0x5e   :  { %2958 = vmatprep.subr.bf16.mxu1 %v3865_v48  ;;  %2938 = vmatprep.subr.bf16.mxu0 %v3774_v29 }
  0x60   :  { %2939 = vmatpush3.bf16.msra.mxu0 %v3786_v31 }
  0x61   :  { %2959 = vmatpush3.bf16.msra.mxu1 %v3872_v49  ;;  %3261 = vmatprep.subr.bf16.mxu0 %v3810_v37 }
  0x62   :  { %2960 = vmatprep.subr.bf16.mxu1 %v3882_v51 }
  0x63   :  { %892 = vmatmul.mubr.bf16.vlgmr.msra.gmra.mxu0 %v3375_v43 }
  0x64   :  { %3262 = vmatpush3.bf16.msra.mxu0 %v3810_v37  ;;  %899 = vmatprep.mubr.bf16.mxu0 %v3381_v44 }
  0x65   :  { %2961 = vmatpush3.bf16.msra.mxu1 %v3892_v53  ;;  %3263 = vmatprep.subr.bf16.mxu0 %v3853_v46 }
  0x66   :  { %2962 = vmatprep.subr.bf16.mxu1 %v3898_v54 }
  0x68   :  { %3264 = vmatpush3.bf16.msra.mxu0 %v3853_v46 }
  0x69   :  { %2963 = vmatpush3.bf16.msra.mxu1 %v3907_v55  ;;  %2984 = vmatprep.subr.bf16.mxu0 %v3601_v0  ;;  %v3389_v0 = vld [vmem:[%s4601_s0 + $0xbc] ss:$28 sps:$4 sm:$0xff]  }
  0x6a   :  { %2964 = vmatprep.subr.bf16.mxu1 %v3913_v56 }
  0x6b   :  { %900 = vmatmul.mubr.bf16.gmra.mxu0 %v3383_v50 }
  0x6c   :  { %3265 = vmatprep.mubr.msk.bf16.mxu0 %vm514_vm0, %v3387_v52 }
  0x6d   :  { %2965 = vmatpush3.bf16.msra.mxu1 %v3924_v58 }
  0x6e   :  { %2966 = vmatprep.subr.bf16.mxu1 %v3930_v59 }
  0x71   :  { %2967 = vmatpush3.bf16.msra.mxu1 %v3941_v61 }
  0x72   :  { %3012 = vmatprep.subr.bf16.mxu1 %v3606_v1  ;;  %v3397_v1 = vld [vmem:[%s4601_s0 + $0xec] ss:$28 sps:$4 sm:$0xff]  }
  0x73   :  { %3266 = vmatmul.mubr.msk.bf16.vlgmr.msra.gmra.mxu0 %vm514_vm0, %v3388_v60 }
  0x74   :  { %941 = vmatmul.mubr.bf16.vlgmr.msra.gmra.mxu1 %v3384_v57  ;;  %2985 = vmatpush3.bf16.msra.mxu0 %v3612_v2 }
  0x75   :  { %3013 = vmatpush3.bf16.msra.mxu1 %v3618_v3  ;;  %2986 = vmatprep.subr.bf16.mxu0 %v3624_v4 }
  0x76   :  { %3014 = vmatprep.subr.bf16.mxu1 %v3630_v5  ;;  %948 = vmatprep.mubr.bf16.mxu1 %v3389_v0 }
  0x77   :  { %1135 = vmatprep.mubr.bf16.mxu0 %v3394_v62 }
  0x78   :  { %2987 = vmatpush3.bf16.msra.mxu0 %v3636_v6 }
  0x79   :  { %3015 = vmatpush3.bf16.msra.mxu1 %v3642_v7  ;;  %2988 = vmatprep.subr.bf16.mxu0 %v3648_v8 }
  0x7a   :  { %3016 = vmatprep.subr.bf16.mxu1 %v3654_v9 }
  0x7c   :  { %949 = vmatmul.mubr.bf16.gmra.mxu1 %v3391_v63  ;;  %2989 = vmatpush3.bf16.msra.mxu0 %v3660_v10 }
  0x7d   :  { %3017 = vmatpush3.bf16.msra.mxu1 %v3666_v11  ;;  %1184 = vmatprep.mubr.bf16.mxu1 %v3397_v1 }
  0x7e   :  { %3018 = vmatprep.subr.bf16.mxu1 %v3678_v13  ;;  %2990 = vmatprep.subr.bf16.mxu0 %v3672_v12 }
  0x80   :  { %2991 = vmatpush3.bf16.msra.mxu0 %v3684_v14 }
  0x81   :  { %3019 = vmatpush3.bf16.msra.mxu1 %v3690_v15  ;;  %2992 = vmatprep.subr.bf16.mxu0 %v3696_v16 }
  0x82   :  { %3020 = vmatprep.subr.bf16.mxu1 %v3702_v17 }
  0x84   :  { %2993 = vmatpush3.bf16.msra.mxu0 %v3708_v18 }
  0x85   :  { %3021 = vmatpush3.bf16.msra.mxu1 %v3714_v19 }
  0x86   :  { %3022 = vmatprep.subr.bf16.mxu1 %v3726_v21 }
  0x87   :  { %12 = vsyncpa [#allocation5], 0  ;;  %2994 = vmatprep.subr.bf16.mxu0 %v3720_v20  ;;  %v3395_v2 = vld [vmem:[%s4601_s0 + $0xe8] ss:$28 sps:$4 sm:$0xff]   ;;  %v3392_v3 = vld [vmem:[%s4601_s0 + $0xe0] ss:$28 sps:$4 sm:$0xff]  }
  0x88   :  { %2995 = vmatpush3.bf16.msra.mxu0 %v3732_v22  ;;  %v3398_v4 = vld [vmem:[%s4601_s0 + $0x11c] ss:$28 sps:$4 sm:$0xff]   ;;  %v3400_v5 = vld [vmem:[%s4601_s0 + $0x124] ss:$28 sps:$4 sm:$0xff]   ;;  %v3408_v10 = vld [vmem:[%s4601_s0 + $0xf4] ss:$28 sps:$4 sm:$0xff]  }
  0x89   :  { %3023 = vmatpush3.bf16.msra.mxu1 %v3738_v23  ;;  %2996 = vmatprep.subr.bf16.mxu0 %v3744_v24  ;;  %v3403_v6 = vld [vmem:[%s4601_s0 + $0x120] ss:$28 sps:$4 sm:$0xff]   ;;  %v3402_v7 = vld [vmem:[%s4601_s0 + $0x118] ss:$28 sps:$4 sm:$0xff]   ;;  %v3405_v11 = vld [vmem:[%s4601_s0 + $0x130] ss:$28 sps:$4 sm:$0xff]  }
  0x8a   :  { %3024 = vmatprep.subr.bf16.mxu1 %v3750_v25  ;;  %v3404_v8 = vld [vmem:[%s4601_s0 + $0xf8] ss:$28 sps:$4 sm:$0xff]   ;;  %v3506_v16 = vld [vmem:[%s4602_s1 + $0x68] sm:$0xff]   ;;  %v3508_v18 = vld [vmem:[%s4602_s1 + $0x60] sm:$0xff]   ;;  %vm1607_vm1 = vcmask 523264   ;;  %vm1613_vm2 = vcmask 517120  }
  0x8b   :  { %v3502_v9 = vld [vmem:[%s4602_s1 + $0x78] sm:$0xff]   ;;  %v3414_v12 = vld [vmem:[%s4601_s0 + $0x154] ss:$28 sps:$4 sm:$0xff]   ;;  %v3507_v17 = vld [vmem:[%s4602_s1 + $0x28] sm:$0xff]   ;;  %s3553_s14 = smov 64   ;;  %vm1627_vm3 = vcmask 1041920  }
  0x8c   :  { %2997 = vmatpush3.bf16.msra.mxu0 %v3756_v26  ;;  %v3503_v13 = vld [vmem:[%s4602_s1 + $0x38] sm:$0xff]   ;;  %v3504_v14 = vld [vmem:[%s4602_s1 + $0x70] sm:$0xff]   ;;  %v3509_v19 = vld [vmem:[%s4602_s1 + $0x20] sm:$0xff]   ;;  %vm3556_vm4 = vmmov 0   ;;  %s3557_s26 = smov [#allocation4]   ;;  %vm2550_vm5 = vcmask 74752  }
  0x8d   :  { %3025 = vmatpush3.bf16.msra.mxu1 %v3762_v27  ;;  %2998 = vmatprep.subr.bf16.mxu0 %v3768_v28  ;;  %v3505_v15 = vld [vmem:[%s4602_s1 + $0x30] sm:$0xff]   ;;  %v3510_v21 = vld [vmem:[%s4602_s1 + $0x58] sm:$0xff]   ;;  %v3409_v23 = vld [vmem:[%s4601_s0 + $0x12c] ss:$28 sps:$4 sm:$0xff]   ;;  %s2558_s27 = sshll.u32 %s3557_s26, 4  ;;  %s2559_s27 = int_to_ptr.vmem [resolvable:$true] %s2558_s27 }
  0x8e   :  { %3026 = vmatprep.subr.bf16.mxu1 %v3774_v29  ;;  %v3406_v20 = vld [vmem:[%s4601_s0 + $0xf0] ss:$28 sps:$4 sm:$0xff]   ;;  %v3511_v22 = vld [vmem:[%s4602_s1 + $0xf8] sm:$0xff]   ;;  %v3411_v32 = vld [vmem:[%s4601_s0 + $0x128] ss:$28 sps:$4 sm:$0xff]   ;;  %s3531_s28 = scalar_lea.vmem %s2559_s27, 32  ;;  %p3536_p1 = scmp.lt.s32.totalorder %s2559_s27, %s2559_s27 }
  0x8f   :  { %v3512_v24 = vld [vmem:[%s4602_s1 + $0x18] sm:$0xff]   ;;  %v3514_v27 = vld [vmem:[%s4602_s1 + $0x50] sm:$0xff]   ;;  %v3518_v34 = vld [vmem:[%s4602_s1 + $0x48] sm:$0xff]   ;;  %p3532_p0 = scmp.ne.s32.totalorder %s2559_s27, %s3531_s28  ;;  %p3537_p2 = scmp.lt.s32.totalorder %s3531_s28, %s3531_s28 }
  0x90   :  { %2999 = vmatpush3.bf16.msra.mxu0 %v3780_v30  ;;  %v3513_v25 = vld [vmem:[%s4602_s1 + $0xb8] sm:$0xff]   ;;  %v3515_v29 = vld [vmem:[%s4602_s1 + $0xf0] sm:$0xff]   ;;  %v3519_v35 = vld [vmem:[%s4602_s1 + $0xe8] sm:$0xff]  }
  0x91   :  { %3027 = vmatpush3.bf16.msra.mxu1 %v3786_v31  ;;  %3040 = vmatprep.subr.bf16.mxu0 %v3805_v36  ;;  %v3516_v31 = vld [vmem:[%s4602_s1 + $0x10] sm:$0xff]   ;;  %v3417_v41 = vld [vmem:[%s4601_s0 + $0x15c] ss:$28 sps:$4 sm:$0xff]   ;;  %v3520_v42 = vld [vmem:[%s4602_s1 + $0xa8] sm:$0xff]   ;;  %p3538_p3 = por %p3537_p2, %p3536_p1 }
  0x92   :  { %3269 = vmatprep.subr.bf16.mxu1 %v3810_v37  ;;  %v3517_v33 = vld [vmem:[%s4602_s1 + $0xb0] sm:$0xff]   ;;  %v3521_v43 = vld [vmem:[%s4602_s1 + $0xe0] sm:$0xff]   ;;  %v3523_v50 = vld [vmem:[%s4602_s1 + $0xd8] sm:$0xff]  }
  0x93   :  { %1136 = vmatmul.mubr.bf16.vlgmr.msra.gmra.mxu0 %v3392_v3  ;;  %v3412_v44 = vld [vmem:[%s4601_s0 + $0x150] ss:$28 sps:$4 sm:$0xff]   ;;  %v3420_v52 = vld [vmem:[%s4601_s0 + $0x188] ss:$28 sps:$4 sm:$0xff]   ;;  %v3415_v60 = vld [vmem:[%s4601_s0 + $0x158] ss:$28 sps:$4 sm:$0xff]   ;;  %p3539_p4 = pnand %p3538_p3, %p3532_p0 }
  0x94   :  { %1185 = vmatmul.mubr.bf16.vlgmr.msra.gmra.mxu1 %v3395_v2  ;;  %3041 = vmatpush3.bf16.msra.mxu0 %v3816_v38  ;;  %v3526_v57 = vld [vmem:[%s4602_s1 + $0x90] sm:$0xff]  }
  0x95   :  { %3270 = vmatpush3.bf16.msra.mxu1 %v3810_v37  ;;  %1143 = vmatprep.mubr.bf16.mxu0 %v3398_v4  ;;  %v3431_v63 = vld [vmem:[%s4601_s0 + $0x198] ss:$28 sps:$4 sm:$0xff]  }
  0x96   :  { %3042 = vmatprep.subr.bf16.mxu0 %v3822_v39  ;;  %1192 = vmatprep.mubr.bf16.mxu1 %v3400_v5 }
  0x97   :  { %3271 = vmatprep.subr.bf16.mxu1 %v3853_v46 }
  0x98   :  { %3043 = vmatpush3.bf16.msra.mxu0 %v3829_v40 }
  0x99   :  { %3272 = vmatpush3.bf16.msra.mxu1 %v3853_v46  ;;  %3044 = vmatprep.subr.bf16.mxu0 %v3848_v45 }
  0x9a   :  { %3072 = vmatprep.subr.bf16.mxu1 %v3502_v9 }
  0x9b   :  { %1144 = vmatmul.mubr.bf16.gmra.mxu0 %v3402_v7 }
  0x9c   :  { %1193 = vmatmul.mubr.bf16.gmra.mxu1 %v3403_v6  ;;  %3045 = vmatpush3.bf16.msra.mxu0 %v3859_v47 }
  0x9d   :  { %3273 = vmatprep.mubr.msk.bf16.mxu1 %vm514_vm0, %v3404_v8  ;;  %1233 = vmatprep.mubr.bf16.mxu0 %v3408_v10 }
  0x9e   :  { %3046 = vmatprep.subr.bf16.mxu0 %v3865_v48 }
  0xa0   :  { %3047 = vmatpush3.bf16.msra.mxu0 %v3872_v49 }
  0xa1   :  { %3048 = vmatprep.subr.bf16.mxu0 %v3882_v51 }
  0xa4   :  { %3274 = vmatmul.mubr.msk.bf16.vlgmr.msra.gmra.mxu1 %vm514_vm0, %v3405_v11  ;;  %3049 = vmatpush3.bf16.msra.mxu0 %v3892_v53 }
  0xa5   :  { %3073 = vmatpush3.bf16.msra.mxu1 %v3503_v13  ;;  %1428 = vmatprep.mubr.bf16.mxu1 %v3414_v12 }
  0xa6   :  { %3074 = vmatprep.subr.bf16.mxu1 %v3504_v14  ;;  %3050 = vmatprep.subr.bf16.mxu0 %v3898_v54 }
  0xa8   :  { %3051 = vmatpush3.bf16.msra.mxu0 %v3907_v55 }
  0xa9   :  { %3075 = vmatpush3.bf16.msra.mxu1 %v3505_v15  ;;  %3052 = vmatprep.subr.bf16.mxu0 %v3913_v56 }
  0xaa   :  { %3076 = vmatprep.subr.bf16.mxu1 %v3506_v16 }
  0xac   :  { %3053 = vmatpush3.bf16.msra.mxu0 %v3924_v58 }
  0xad   :  { %3077 = vmatpush3.bf16.msra.mxu1 %v3507_v17  ;;  %3054 = vmatprep.subr.bf16.mxu0 %v3930_v59 }
  0xae   :  { %3078 = vmatprep.subr.bf16.mxu1 %v3508_v18 }
  0xb0   :  { %3055 = vmatpush3.bf16.msra.mxu0 %v3941_v61 }
  0xb1   :  { %3079 = vmatpush3.bf16.msra.mxu1 %v3509_v19  ;;  %3100 = vmatprep.subr.bf16.mxu0 %v3511_v22 }
  0xb2   :  { %3080 = vmatprep.subr.bf16.mxu1 %v3510_v21 }
  0xb3   :  { %1234 = vmatmul.mubr.bf16.vlgmr.msra.gmra.mxu0 %v3406_v20 }
  0xb4   :  { %3101 = vmatpush3.bf16.msra.mxu0 %v3513_v25  ;;  %1241 = vmatprep.mubr.bf16.mxu0 %v3409_v23 }
  0xb5   :  { %3081 = vmatpush3.bf16.msra.mxu1 %v3512_v24  ;;  %3102 = vmatprep.subr.bf16.mxu0 %v3515_v29 }
  0xb6   :  { %3082 = vmatprep.subr.bf16.mxu1 %v3514_v27 }
  0xb8   :  { %3103 = vmatpush3.bf16.msra.mxu0 %v3517_v33 }
  0xb9   :  { %3083 = vmatpush3.bf16.msra.mxu1 %v3516_v31  ;;  %3104 = vmatprep.subr.bf16.mxu0 %v3519_v35 }
  0xba   :  { %3084 = vmatprep.subr.bf16.mxu1 %v3518_v34 }
  0xbb   :  { %1242 = vmatmul.mubr.bf16.gmra.mxu0 %v3411_v32 }
  0xbc   :  { %3105 = vmatpush3.bf16.msra.mxu0 %v3520_v42  ;;  %1477 = vmatprep.mubr.bf16.mxu0 %v3417_v41 }
  0xbd   :  { %3085 = vmatpush3.bf16.msra.mxu1 %v3756_v26  ;;  %3106 = vmatprep.subr.bf16.mxu0 %v3521_v43  ;;  %v3418_v26 = vld [vmem:[%s4601_s0 + $0x18c] ss:$28 sps:$4 sm:$0xff]  }
  0xbe   :  { %3086 = vmatprep.subr.bf16.mxu1 %v3768_v28  ;;  %v3522_v28 = vld [vmem:[%s4602_s1 + $0xa0] sm:$0xff]  }
  0xc0   :  { %3107 = vmatpush3.bf16.msra.mxu0 %v3522_v28 }
  0xc1   :  { %3087 = vmatpush3.bf16.msra.mxu1 %v3780_v30  ;;  %3108 = vmatprep.subr.bf16.mxu0 %v3523_v50  ;;  %v3524_v30 = vld [vmem:[%s4602_s1 + $0x98] sm:$0xff]  }
  0xc2   :  { %3128 = vmatprep.subr.bf16.mxu1 %v3805_v36  ;;  %v3525_v36 = vld [vmem:[%s4602_s1 + $0xd0] sm:$0xff]  }
  0xc4   :  { %1429 = vmatmul.mubr.bf16.vlgmr.msra.gmra.mxu1 %v3412_v44  ;;  %3109 = vmatpush3.bf16.msra.mxu0 %v3524_v30 }
  0xc5   :  { %3129 = vmatpush3.bf16.msra.mxu1 %v3816_v38  ;;  %1436 = vmatprep.mubr.bf16.mxu1 %v3418_v26  ;;  %v3426_v38 = vld [vmem:[%s4601_s0 + $0x164] ss:$28 sps:$4 sm:$0xff]  }
  0xc6   :  { %3130 = vmatprep.subr.bf16.mxu1 %v3822_v39  ;;  %3110 = vmatprep.subr.bf16.mxu0 %v3525_v36  ;;  %v3527_v39 = vld [vmem:[%s4602_s1 + $0xc8] sm:$0xff]  }
  0xc8   :  { %3111 = vmatpush3.bf16.msra.mxu0 %v3526_v57 }
  0xc9   :  { %3131 = vmatpush3.bf16.msra.mxu1 %v3829_v40  ;;  %3112 = vmatprep.subr.bf16.mxu0 %v3527_v39  ;;  %v3528_v40 = vld [vmem:[%s4602_s1 + $0x88] sm:$0xff]  }
  0xca   :  { %3132 = vmatprep.subr.bf16.mxu1 %v3848_v45  ;;  %v3529_v45 = vld [vmem:[%s4602_s1 + $0xc0] sm:$0xff]  }
  0xcc   :  { %1437 = vmatmul.mubr.bf16.gmra.mxu1 %v3420_v52  ;;  %3113 = vmatpush3.bf16.msra.mxu0 %v3528_v40 }
  0xcd   :  { %3133 = vmatpush3.bf16.msra.mxu1 %v3859_v47  ;;  %1526 = vmatprep.mubr.bf16.mxu1 %v3426_v38  ;;  %v3530_v47 = vld [vmem:[%s4602_s1 + $0x80] sm:$0xff]  }
  0xce   :  { %3134 = vmatprep.subr.bf16.mxu1 %v3865_v48  ;;  %3114 = vmatprep.subr.bf16.mxu0 %v3529_v45  ;;  %v3421_v48 = vld [vmem:[%s4601_s0 + $0x194] ss:$28 sps:$4 sm:$0xff]  }
  0xd0   :  { %3115 = vmatpush3.bf16.msra.mxu0 %v3530_v47 }
  0xd1   :  { %3135 = vmatpush3.bf16.msra.mxu1 %v3872_v49  ;;  %3277 = vmatprep.subr.bf16.mxu0 %v3810_v37  ;;  %v3423_v49 = vld [vmem:[%s4601_s0 + $0x190] ss:$28 sps:$4 sm:$0xff]  }
  0xd2   :  { %3136 = vmatprep.subr.bf16.mxu1 %v3882_v51  ;;  %v3427_v51 = vld [vmem:[%s4601_s0 + $0x168] ss:$28 sps:$4 sm:$0xff]  }
  0xd3   :  { %1478 = vmatmul.mubr.bf16.vlgmr.msra.gmra.mxu0 %v3415_v60 }
  0xd4   :  { %3278 = vmatpush3.bf16.msra.mxu0 %v3810_v37  ;;  %1485 = vmatprep.mubr.bf16.mxu0 %v3421_v48  ;;  %v3424_v37 = vld [vmem:[%s4601_s0 + $0x160] ss:$28 sps:$4 sm:$0xff]  }
  0xd5   :  { %3137 = vmatpush3.bf16.msra.mxu1 %v3892_v53  ;;  %3279 = vmatprep.subr.bf16.mxu0 %v3853_v46  ;;  %v3429_v53 = vld [vmem:[%s4601_s0 + $0x19c] ss:$28 sps:$4 sm:$0xff]  }
  0xd6   :  { %3138 = vmatprep.subr.bf16.mxu1 %v3898_v54 }
  0xd8   :  { %3280 = vmatpush3.bf16.msra.mxu0 %v3853_v46  ;;  %v3428_v46 = vld [vmem:[%s4601_s0 + $0x1a0] ss:$28 sps:$4 sm:$0xff]  }
  0xd9   :  { %3139 = vmatpush3.bf16.msra.mxu1 %v3907_v55 }
  0xda   :  { %3140 = vmatprep.subr.bf16.mxu1 %v3913_v56 }
  0xdb   :  { %1486 = vmatmul.mubr.bf16.gmra.mxu0 %v3423_v49 }
  0xdc   :  { %3281 = vmatprep.mubr.msk.bf16.mxu0 %vm514_vm0, %v3427_v51 }
  0xdd   :  { %3141 = vmatpush3.bf16.msra.mxu1 %v3924_v58 }
  0xde   :  { %3142 = vmatprep.subr.bf16.mxu1 %v3930_v59 }
  0xe1   :  { %3143 = vmatpush3.bf16.msra.mxu1 %v3941_v61 }
  0xe3   :  { %v2824_v54 = vpop.f32.mrf.mxu0  ;;  %3282 = vmatmul.mubr.msk.bf16.vlgmr.msra.gmra.mxu0 %vm514_vm0, %v3428_v46 }
  0xe4   :  { %1527 = vmatmul.mubr.bf16.vlgmr.msra.gmra.mxu1 %v3424_v37  ;;  %v2852_v55 = vpop.f32.mrf.mxu1 }
  0xe5   :  { %v2825_v56 = vpop.f32.mrf.mxu0  ;;  %1534 = vmatprep.mubr.bf16.mxu1 %v3429_v53 }
  0xe6   :  { %v2826_v58 = vadd.f32 %v2825_v56, %v2824_v54  ;;  %v2853_v59 = vpop.f32.mrf.mxu1 }
  0xe7   :  { %v2854_v0 = vadd.f32 %v2853_v59, %v2852_v55  ;;  %v2827_v62 = vpop.f32.mrf.mxu0 }
  0xe8   :  { %v2855_v61 = vpop.f32.mrf.mxu1 }
  0xe9   :  { %v605_v1 = vadd.f32 %v2854_v0, %v2826_v58  ;;  %v2828_v2 = vpop.f32.mrf.mxu0 }
  0xea   :  { %v2829_v3 = vadd.f32 %v2828_v2, %v2827_v62  ;;  %v2856_v4 = vpop.f32.mrf.mxu1 }
  0xeb   :  { %v2857_v5 = vadd.f32 %v2856_v4, %v2855_v61  ;;  %v2830_v6 = vpop.f32.mrf.mxu0 }
  0xec   :  { %1535 = vmatmul.mubr.bf16.gmra.mxu1 %v3431_v63  ;;  %v2858_v7 = vpop.f32.mrf.mxu1 }
  0xed   :  { %v608_v8 = vadd.f32 %v2857_v5, %v2829_v3  ;;  %v2831_v9 = vpop.f32.mrf.mxu0 }
  0xee   :  { %v2832_v10 = vadd.f32 %v2831_v9, %v2830_v6  ;;  %v2859_v11 = vpop.f32.mrf.mxu1 }
  0xef   :  { %v2860_v12 = vadd.f32 %v2859_v11, %v2858_v7  ;;  %v2833_v13 = vpop.f32.mrf.mxu0 }
  0xf0   :  { %v2861_v14 = vpop.f32.mrf.mxu1 }
  0xf1   :  { %v613_v15 = vadd.f32 %v2860_v12, %v2832_v10  ;;  %v2834_v16 = vpop.f32.mrf.mxu0 }
  0xf2   :  { %v2835_v17 = vadd.f32 %v2834_v16, %v2833_v13  ;;  %v2862_v18 = vpop.f32.mrf.mxu1 }
  0xf3   :  { %v2863_v19 = vadd.f32 %v2862_v18, %v2861_v14 }
  0xf4   :  { %v3259_v21 = vpop.f32.mrf.mxu1 }
  0xf5   :  { %v616_v20 = vadd.f32 %v2863_v19, %v2835_v17 }
  0xf6   :  { %v702_v23 = vpop.f32.mrf.mxu1 }
  0xf8   :  { %v3260_v31 = vpop.f32.mrf.mxu1 }
  0xfa   :  { %v705_v42 = vpop.f32.mrf.mxu1 }
 0x103   :  { %v2880_v22 = vpop.f32.mrf.mxu0 }
 0x105   :  { %v2881_v24 = vpop.f32.mrf.mxu0 }
 0x106   :  { %v2882_v25 = vadd.f32 %v2881_v24, %v2880_v22 }
 0x107   :  { %v2883_v27 = vpop.f32.mrf.mxu0 }
 0x108   :  { %v654_v29 = vadd.f32 %v2882_v25, %v605_v1 }
 0x109   :  { %v2884_v32 = vpop.f32.mrf.mxu0 }
 0x10a   :  { %v2885_v33 = vadd.f32 %v2884_v32, %v2883_v27  ;;  %v4290_v34 = vadd.f32 %v702_v23, %v654_v29 }
 0x10b   :  { %v2886_v35 = vpop.f32.mrf.mxu0 }
 0x10c   :  { %v657_v41 = vadd.f32 %v2885_v33, %v608_v8 }
 0x10d   :  { %v2887_v43 = vpop.f32.mrf.mxu0 }
 0x10e   :  { %v2888_v44 = vadd.f32 %v2887_v43, %v2886_v35  ;;  %v4292_v26 = vadd.f32 %v705_v42, %v657_v41 }
 0x10f   :  { %v2889_v28 = vpop.f32.mrf.mxu0 }
 0x110   :  { %v662_v50 = vadd.f32 %v2888_v44, %v613_v15 }
 0x111   :  { %v2890_v30 = vpop.f32.mrf.mxu0 }
 0x112   :  { %v4294_v36 = vadd.f32 %v3259_v21, %v662_v50  ;;  %v2891_v52 = vadd.f32 %v2890_v30, %v2889_v28  ;;  %v3432_v50 = vld [vmem:[%s4604_s3 + $0x78] sm:$0xff]  }
 0x113   :  { %v3433_v30 = vld [vmem:[%s4604_s3 + $0x38] sm:$0xff]   ;;  %3160 = vmatprep.subr.bf16.mxu0 %v3432_v50 }
 0x114   :  { %v2912_v38 = vpop.f32.mrf.mxu1  ;;  %v665_v57 = vadd.f32 %v2891_v52, %v616_v20  ;;  %v3434_v52 = vld [vmem:[%s4604_s3 + $0xf8] sm:$0xff]   ;;  %3161 = vmatpush3.bf16.msra.mxu0 %v3433_v30 }
 0x115   :  { %3182 = vmatprep.subr.bf16.mxu1 %v3434_v52 }
 0x116   :  { %v2913_v39 = vpop.f32.mrf.mxu1  ;;  %v4296_v45 = vadd.f32 %v3260_v31, %v665_v57  ;;  %v3436_v57 = vld [vmem:[%s4604_s3 + $0x70] sm:$0xff]  }
 0x117   :  { %v2914_v40 = vadd.f32 %v2913_v39, %v2912_v38  ;;  %v3435_v38 = vld [vmem:[%s4604_s3 + $0xb8] sm:$0xff]   ;;  %v3438_v39 = vld [vmem:[%s4604_s3 + $0xf0] sm:$0xff]   ;;  %3162 = vmatprep.subr.bf16.mxu0 %v3436_v57 }
 0x118   :  { %v2915_v60 = vpop.f32.mrf.mxu1  ;;  %3183 = vmatpush3.bf16.msra.mxu1 %v3435_v38 }
 0x119   :  { %3184 = vmatprep.subr.bf16.mxu1 %v3438_v39 }
 0x11a   :  { %v2916_v47 = vpop.f32.mrf.mxu1 }
 0x11b   :  { %v2917_v48 = vadd.f32 %v2916_v47, %v2915_v60  ;;  %v3439_v60 = vld [vmem:[%s4604_s3 + $0xb0] sm:$0xff]   ;;  %v3440_v47 = vld [vmem:[%s4604_s3 + $0x68] sm:$0xff]  }
 0x11c   :  { %v2918_v49 = vpop.f32.mrf.mxu1  ;;  %3185 = vmatpush3.bf16.msra.mxu1 %v3439_v60 }
 0x11e   :  { %v2919_v51 = vpop.f32.mrf.mxu1 }
 0x11f   :  { %v2920_v37 = vadd.f32 %v2919_v51, %v2918_v49 }
 0x120   :  { %v2921_v46 = vpop.f32.mrf.mxu1 }
 0x122   :  { %v2922_v53 = vpop.f32.mrf.mxu1 }
 0x123   :  { %v2923_v54 = vadd.f32 %v2922_v53, %v2921_v46  ;;  %v2940_v55 = vpop.f32.mrf.mxu0 }
 0x125   :  { %v2941_v56 = vpop.f32.mrf.mxu0 }
 0x126   :  { %v2942_v58 = vadd.f32 %v2941_v56, %v2940_v55 }
 0x127   :  { %v2943_v59 = vpop.f32.mrf.mxu0 }
 0x128   :  { %v894_v0 = vadd.f32 %v2942_v58, %v2914_v40  ;;  %v3437_v40 = vld [vmem:[%s4604_s3 + $0x30] sm:$0xff]  }
 0x129   :  { %v2944_v62 = vpop.f32.mrf.mxu0  ;;  %3163 = vmatpush3.bf16.msra.mxu0 %v3437_v40 }
 0x12a   :  { %v2945_v61 = vadd.f32 %v2944_v62, %v2943_v59  ;;  %3164 = vmatprep.subr.bf16.mxu0 %v3440_v47 }
 0x12b   :  { %v2946_v63 = vpop.f32.mrf.mxu0 }
 0x12c   :  { %v897_v1 = vadd.f32 %v2945_v61, %v2917_v48  ;;  %v3441_v48 = vld [vmem:[%s4604_s3 + $0x28] sm:$0xff]  }
 0x12d   :  { %v2947_v2 = vpop.f32.mrf.mxu0  ;;  %3165 = vmatpush3.bf16.msra.mxu0 %v3441_v48 }
 0x12e   :  { %v2948_v3 = vadd.f32 %v2947_v2, %v2946_v63 }
 0x12f   :  { %v2949_v4 = vpop.f32.mrf.mxu0 }
 0x130   :  { %v902_v5 = vadd.f32 %v2948_v3, %v2920_v37 }
 0x131   :  { %v2950_v6 = vpop.f32.mrf.mxu0 }
 0x132   :  { %v2951_v7 = vadd.f32 %v2950_v6, %v2949_v4 }
 0x133   :  { %v3267_v9 = vpop.f32.mrf.mxu0 }
 0x134   :  { %v2968_v8 = vpop.f32.mrf.mxu1  ;;  %v905_v10 = vadd.f32 %v2951_v7, %v2923_v54 }
 0x135   :  { %v991_v13 = vpop.f32.mrf.mxu0 }
 0x136   :  { %v2969_v11 = vpop.f32.mrf.mxu1 }
 0x137   :  { %v2970_v12 = vadd.f32 %v2969_v11, %v2968_v8  ;;  %v3268_v16 = vpop.f32.mrf.mxu0 }
 0x138   :  { %v2971_v14 = vpop.f32.mrf.mxu1 }
 0x139   :  { %v943_v15 = vadd.f32 %v2970_v12, %v894_v0  ;;  %v994_v23 = vpop.f32.mrf.mxu0 }
 0x13a   :  { %v2972_v17 = vpop.f32.mrf.mxu1 }
 0x13b   :  { %v4298_v18 = vadd.f32 %v991_v13, %v943_v15  ;;  %v2973_v19 = vadd.f32 %v2972_v17, %v2971_v14 }
 0x13c   :  { %v2974_v20 = vpop.f32.mrf.mxu1 }
 0x13d   :  { %v946_v22 = vadd.f32 %v2973_v19, %v897_v1 }
 0x13e   :  { %v2975_v24 = vpop.f32.mrf.mxu1 }
 0x13f   :  { %v4302_v25 = vadd.f32 %v994_v23, %v946_v22  ;;  %v2976_v27 = vadd.f32 %v2975_v24, %v2974_v20 }
 0x140   :  { %v2977_v29 = vpop.f32.mrf.mxu1 }
 0x141   :  { %v951_v32 = vadd.f32 %v2976_v27, %v902_v5 }
 0x142   :  { %v2978_v33 = vpop.f32.mrf.mxu1 }
 0x143   :  { %v4306_v35 = vadd.f32 %v3267_v9, %v951_v32  ;;  %v2979_v41 = vadd.f32 %v2978_v33, %v2977_v29 }
 0x145   :  { %v954_v43 = vadd.f32 %v2979_v41, %v905_v10 }
 0x147   :  { %v4310_v44 = vadd.f32 %v3268_v16, %v954_v43 }
 0x153   :  { %v3000_v49 = vpop.f32.mrf.mxu0 }
 0x154   :  { %v3028_v51 = vpop.f32.mrf.mxu1 }
 0x155   :  { %v3001_v37 = vpop.f32.mrf.mxu0 }
 0x156   :  { %v3029_v46 = vpop.f32.mrf.mxu1  ;;  %v3002_v32 = vadd.f32 %v3001_v37, %v3000_v49 }
 0x157   :  { %v3003_v53 = vpop.f32.mrf.mxu0  ;;  %v3030_v33 = vadd.f32 %v3029_v46, %v3028_v51 }
 0x158   :  { %v3031_v54 = vpop.f32.mrf.mxu1 }
 0x159   :  { %v3004_v55 = vpop.f32.mrf.mxu0  ;;  %v1187_v57 = vadd.f32 %v3030_v33, %v3002_v32 }
 0x15a   :  { %v3032_v56 = vpop.f32.mrf.mxu1  ;;  %v3005_v50 = vadd.f32 %v3004_v55, %v3003_v53 }
 0x15b   :  { %v3006_v58 = vpop.f32.mrf.mxu0  ;;  %v3033_v30 = vadd.f32 %v3032_v56, %v3031_v54 }
 0x15c   :  { %v3034_v59 = vpop.f32.mrf.mxu1 }
 0x15d   :  { %v3007_v0 = vpop.f32.mrf.mxu0  ;;  %v1190_v47 = vadd.f32 %v3033_v30, %v3005_v50 }
 0x15e   :  { %v3035_v62 = vpop.f32.mrf.mxu1  ;;  %v3008_v31 = vadd.f32 %v3007_v0, %v3006_v58 }
 0x15f   :  { %v3009_v61 = vpop.f32.mrf.mxu0  ;;  %v3036_v21 = vadd.f32 %v3035_v62, %v3034_v59 }
 0x160   :  { %v3037_v63 = vpop.f32.mrf.mxu1 }
 0x161   :  { %v3010_v1 = vpop.f32.mrf.mxu0 }
 0x162   :  { %v3038_v2 = vpop.f32.mrf.mxu1  ;;  %v3011_v32 = vadd.f32 %v3010_v1, %v3009_v61  ;;  %v3442_v61 = vld [vmem:[%s4604_s3 + $0xe8] sm:$0xff]  }
 0x163   :  { %v3039_v33 = vadd.f32 %v3038_v2, %v3037_v63  ;;  %3186 = vmatprep.subr.bf16.mxu1 %v3442_v61  ;;  %v3462_v61 = vld [vmem:[%s4604_s3 + $0xc0] sm:$0xff]  }
 0x164   :  { %v4344_v4 = vpop.f32.mrf.mxu1 }
 0x165   :  { %v1198_v63 = vadd.f32 %v3039_v33, %v3011_v32  ;;  %v3454_v33 = vld [vmem:[%s4604_s3 + $0xd0] sm:$0xff]  }
 0x166   :  { %v1284_v6 = vpop.f32.mrf.mxu1 }
 0x168   :  { %v4346_v8 = vpop.f32.mrf.mxu1 }
 0x16a   :  { %v1287_v10 = vpop.f32.mrf.mxu1 }
 0x173   :  { %v3056_v3 = vpop.f32.mrf.mxu0 }
 0x175   :  { %v3057_v5 = vpop.f32.mrf.mxu0 }
 0x176   :  { %v3058_v52 = vadd.f32 %v3057_v5, %v3056_v3 }
 0x177   :  { %v3059_v7 = vpop.f32.mrf.mxu0 }
 0x178   :  { %v1236_v48 = vadd.f32 %v3058_v52, %v1187_v57 }
 0x179   :  { %v3060_v9 = vpop.f32.mrf.mxu0 }
 0x17a   :  { %v3061_v39 = vadd.f32 %v3060_v9, %v3059_v7  ;;  %v1285_v55 = vadd.f32 %v1284_v6, %v1236_v48  ;;  %v1195_v9 = vadd.f32 %v3036_v21, %v3008_v31  ;;  %v4362_v21 = vld [vmem:[%s4603_s2] ss:$0 sm:$0xff] }
 0x17b   :  { %v3062_v11 = vpop.f32.mrf.mxu0 }
 0x17c   :  { %v1239_v51 = vadd.f32 %v3061_v39, %v1190_v47  ;;  %v3448_v39 = vld [vmem:[%s4604_s3 + $0x58] sm:$0xff]  }
 0x17d   :  { %v3063_v13 = vpop.f32.mrf.mxu0 }
 0x17e   :  { %v3064_v53 = vadd.f32 %v3063_v13, %v3062_v11 }
 0x17f   :  { %v3065_v15 = vpop.f32.mrf.mxu0 }
 0x180   :  { %v1244_v59 = vadd.f32 %v3064_v53, %v1195_v9 }
 0x181   :  { %v3066_v17 = vpop.f32.mrf.mxu0 }
 0x182   :  { %v3067_v0 = vadd.f32 %v3066_v17, %v3065_v15 }
 0x184   :  { %v3088_v12 = vpop.f32.mrf.mxu1 }
 0x186   :  { %v3089_v14 = vpop.f32.mrf.mxu1 }
 0x187   :  { %v3090_v37 = vadd.f32 %v3089_v14, %v3088_v12 }
 0x188   :  { %v3091_v16 = vpop.f32.mrf.mxu1 }
 0x18a   :  { %v3092_v19 = vpop.f32.mrf.mxu1 }
 0x18c   :  { %v3094_v22 = vpop.f32.mrf.mxu1 }
 0x18e   :  { %v3095_v27 = vpop.f32.mrf.mxu1 }
 0x18f   :  { %v3096_v1 = vadd.f32 %v3095_v27, %v3094_v22  ;;  %v1293_v22 = vadd.f32 %v4344_v4, %v1244_v59  ;;  %v3447_v4 = vld [vmem:[%s4604_s3 + $0xa0] sm:$0xff]   ;;  %v3457_v59 = vld [vmem:[%s4604_s3 + $0x8] sm:$0xff]  }
 0x190   :  { %v4348_v43 = vpop.f32.mrf.mxu1 }
 0x192   :  { %v4350_v60 = vpop.f32.mrf.mxu1 }
 0x193   :  { %v3116_v20 = vpop.f32.mrf.mxu0 }
 0x195   :  { %v3117_v23 = vpop.f32.mrf.mxu0 }
 0x196   :  { %v3118_v28 = vadd.f32 %v3117_v23, %v3116_v20  ;;  %v1288_v20 = vadd.f32 %v1287_v10, %v1239_v51  ;;  %v3093_v23 = vadd.f32 %v3092_v19, %v3091_v16  ;;  %v3443_v10 = vld [vmem:[%s4604_s3 + $0xa8] sm:$0xff]   ;;  %v4610_v16 = vmax.f32 %v4292_v26, %v4302_v25  ;;  %v3446_v26 = vld [vmem:[%s4604_s3 + $0xe0] sm:$0xff]  }
 0x197   :  { %v3119_v24 = vpop.f32.mrf.mxu0  ;;  %3187 = vmatpush3.bf16.msra.mxu1 %v3443_v10 }
 0x198   :  { %v1480_v56 = vadd.f32 %v3118_v28, %v3090_v37  ;;  %v4609_v28 = vmax.f32 %v4290_v34, %v4298_v18  ;;  %v3444_v34 = vld [vmem:[%s4604_s3 + $0x60] sm:$0xff]   ;;  %v1300_v17 = vmax.f32 %v4610_v16, %v1288_v20  ;;  %3188 = vmatprep.subr.bf16.mxu1 %v3446_v26 }
 0x199   :  { %v3120_v29 = vpop.f32.mrf.mxu0  ;;  %v3445_v18 = vld [vmem:[%s4604_s3 + $0x20] sm:$0xff]   ;;  %3166 = vmatprep.subr.bf16.mxu0 %v3444_v34  ;;  %v3464_v34 = vld [vmem:[%s4604_s3 + $0x178] sm:$0xff]  }
 0x19a   :  { %v3121_v3 = vadd.f32 %v3120_v29, %v3119_v24  ;;  %v1299_v6 = vmax.f32 %v4609_v28, %v1285_v55  ;;  %v1247_v24 = vadd.f32 %v3067_v0, %v1198_v63  ;;  %3167 = vmatpush3.bf16.msra.mxu0 %v3445_v18  ;;  %v3463_v63 = vld [vmem:[%s4604_s3 + $0x80] sm:$0xff]  }
 0x19b   :  { %v3122_v41 = vpop.f32.mrf.mxu0  ;;  %3189 = vmatpush3.bf16.msra.mxu1 %v3447_v4  ;;  %3168 = vmatprep.subr.bf16.mxu0 %v3448_v39 }
 0x19c   :  { %v1483_v11 = vadd.f32 %v3121_v3, %v3093_v23  ;;  %v1296_v37 = vadd.f32 %v4346_v8, %v1247_v24  ;;  %v3453_v8 = vld [vmem:[%s4604_s3 + $0x10] sm:$0xff]  }
 0x19d   :  { %v3123_v38 = vpop.f32.mrf.mxu0 }
 0x19e   :  { %v3124_v62 = vadd.f32 %v3123_v38, %v3122_v41 }
 0x19f   :  { %v3125_v40 = vpop.f32.mrf.mxu0 }
 0x1a0   :  { %v1488_v27 = vadd.f32 %v3124_v62, %v3096_v1 }
 0x1a1   :  { %v3126_v42 = vpop.f32.mrf.mxu0 }
 0x1a2   :  { %v3127_v30 = vadd.f32 %v3126_v42, %v3125_v40  ;;  %v3449_v42 = vld [vmem:[%s4604_s3 + $0x18] sm:$0xff]   ;;  %v3099_v40 = vadd.f32 %v4350_v60, %v4348_v43 }
 0x1a3   :  { %v4352_v46 = vpop.f32.mrf.mxu0  ;;  %3169 = vmatpush3.bf16.msra.mxu0 %v3449_v42  ;;  %v3450_v60 = vld [vmem:[%s4604_s3 + $0xd8] sm:$0xff]  }
 0x1a4   :  { %v3144_v49 = vpop.f32.mrf.mxu1  ;;  %3190 = vmatprep.subr.bf16.mxu1 %v3450_v60 }
 0x1a5   :  { %v1577_v7 = vpop.f32.mrf.mxu0 }
 0x1a6   :  { %v3145_v54 = vpop.f32.mrf.mxu1 }
 0x1a7   :  { %v3146_v5 = vadd.f32 %v3145_v54, %v3144_v49  ;;  %v4354_v12 = vpop.f32.mrf.mxu0  ;;  %v4611_v49 = vmax.f32 %v4294_v36, %v4306_v35  ;;  %v1491_v54 = vadd.f32 %v3127_v30, %v3099_v40  ;;  %v3451_v36 = vld [vmem:[%s4604_s3 + $0x98] sm:$0xff]   ;;  %v3452_v35 = vld [vmem:[%s4604_s3 + $0x50] sm:$0xff]  }
 0x1a8   :  { %v3147_v50 = vpop.f32.mrf.mxu1  ;;  %3191 = vmatpush3.bf16.msra.mxu1 %v3451_v36  ;;  %3170 = vmatprep.subr.bf16.mxu0 %v3452_v35  ;;  %v3468_v36 = vld [vmem:[%s4604_s3 + $0x1b8] sm:$0xff]  }
 0x1a9   :  { %v1529_v58 = vadd.f32 %v3146_v5, %v1480_v56  ;;  %v1580_v29 = vpop.f32.mrf.mxu0  ;;  %v1301_v51 = vmax.f32 %v4611_v49, %v1293_v22  ;;  %v4612_v5 = vmax.f32 %v4296_v45, %v4310_v44  ;;  %3171 = vmatpush3.bf16.msra.mxu0 %v3453_v8  ;;  %3192 = vmatprep.subr.bf16.mxu1 %v3454_v33  ;;  %v3455_v44 = vld [vmem:[%s4604_s3 + $0x90] sm:$0xff]  }
 0x1aa   :  { %v3148_v14 = vpop.f32.mrf.mxu1  ;;  %v3471_v8 = vld [vmem:[%s4604_s3 + $0x1f0] sm:$0xff]  }
 0x1ab   :  { %v1578_v13 = vadd.f32 %v1577_v7, %v1529_v58  ;;  %v3149_v31 = vadd.f32 %v3148_v14, %v3147_v50  ;;  %v1302_v7 = vmax.f32 %v4612_v5, %v1296_v37  ;;  %v3456_v58 = vld [vmem:[%s4604_s3 + $0x48] sm:$0xff]  }
 0x1ac   :  { %v3150_v2 = vpop.f32.mrf.mxu1  ;;  %3193 = vmatpush3.bf16.msra.mxu1 %v3455_v44  ;;  %3172 = vmatprep.subr.bf16.mxu0 %v3456_v58  ;;  %v3478_v58 = vld [vmem:[%s4604_s3 + $0x160] sm:$0xff]  }
 0x1ad   :  { %v1592_v15 = vmax.f32 %v1299_v6, %v1578_v13  ;;  %v1532_v19 = vadd.f32 %v3149_v31, %v1483_v11  ;;  %3173 = vmatpush3.bf16.msra.mxu0 %v3457_v59  ;;  %v3459_v6 = vld [vmem:[%s4604_s3 + $0x88] sm:$0xff]   ;;  %v3460_v13 = vld [vmem:[%s4604_s3 + $0x40] sm:$0xff]  }
 0x1ae   :  { %v3151_v41 = vpop.f32.mrf.mxu1  ;;  %3174 = vmatprep.subr.bf16.mxu0 %v3460_v13  ;;  %v3486_v13 = vld [vmem:[%s4604_s3 + $0x150] sm:$0xff]  }
 0x1af   :  { %v1603_v52 = vadd.f32 %v4362_v21, %v1592_v15  ;;  %v1581_v38 = vadd.f32 %v1580_v29, %v1532_v19  ;;  %v3152_v57 = vadd.f32 %v3151_v41, %v3150_v2  ;;  %v3467_v15 = vld [vmem:[%s4604_s3 + $0x1f8] sm:$0xff]   ;;  %v3554_v41 = vmov 1983009808  }
 0x1b0   :  { %v3153_v25 = vpop.f32.mrf.mxu1  ;;  %v1740_v30 = vunpack.c.l.s4 %v3554_v41  ;;  %v3500_v41 = vld [vmem:[%s4606_s5 + $0x8] sm:$0xff]  }
 0x1b1   :  { %1608 = vst.msk [vmem:[#allocation2] sm:$0xff] %vm1607_vm1, %v1603_v52  ;;  %v1593_v47 = vmax.f32 %v1300_v17, %v1581_v38  ;;  %v1537_v48 = vadd.f32 %v3152_v57, %v1488_v27  ;;  %v1742_v52 = vlaneseq }
 0x1b2   :  { %v3154_v53 = vpop.f32.mrf.mxu1  ;;  %v1741_v26 = vunpack.c.0.s8 %v1740_v30  ;;  %v3501_v30 = vld [vmem:[%s4606_s5] sm:$0xff]  }
 0x1b3   :  { %v1604_v55 = vadd.f32 %v4362_v21, %v1593_v47  ;;  %v1586_v56 = vadd.f32 %v4352_v46, %v1537_v48  ;;  %v3155_v43 = vadd.f32 %v3154_v53, %v3153_v25  ;;  %v1743_v25 = vshrl.u32 %v1742_v52, 7 }
 0x1b5   :  { %1609 = vst.msk [vmem:[#allocation2 + $0x8] sm:$0xff] %vm1607_vm1, %v1604_v55  ;;  %v1594_v46 = vmax.f32 %v1301_v51, %v1586_v56  ;;  %v1540_v3 = vadd.f32 %v3155_v43, %v1491_v54  ;;  %v1744_v42 = vsub.s32 %v1741_v26, %v1743_v25  ;;  %v3465_v54 = vld [vmem:[%s4604_s3 + $0x138] sm:$0xff]   ;;  %v3469_v43 = vld [vmem:[%s4604_s3 + $0x170] sm:$0xff]  }
 0x1b7   :  { %v1605_v9 = vadd.f32 %v4362_v21, %v1594_v46  ;;  %v1589_v32 = vadd.f32 %v4354_v12, %v1540_v3  ;;  %v3458_v12 = vld [vmem:[%s4604_s3 + $0xc8] sm:$0xff]   ;;  %v3470_v3 = vld [vmem:[%s4604_s3 + $0x130] sm:$0xff]  }
 0x1b8   :  { %v2729_v50 = vld.sshfl [vmem:[#allocation2 + $0x2] sm:$0x3 pattern:$0x76325410]  ;;  %v1612_v20 = vld [vmem:[#allocation2] sm:$0x3]  ;;  %3194 = vmatprep.subr.bf16.mxu1 %v3458_v12 }
 0x1b9   :  { %1610 = vst.msk [vmem:[#allocation2 + $0x10] sm:$0xff] %vm1607_vm1, %v1605_v9  ;;  %v1595_v23 = vmax.f32 %v1302_v7, %v1589_v32  ;;  %1624 = vrot.lane.b32.xlu0 %v2729_v50, %s3553_s14  ;;  %v1629_v45 = vld [vmem:[#allocation2 + $0x4] sm:$0x3]  ;;  %3195 = vmatpush3.bf16.msra.mxu1 %v3459_v6  ;;  %v3473_v9 = vld [vmem:[%s4604_s3 + $0x168] sm:$0xff]   ;;  %v3472_v32 = vld [vmem:[%s4604_s3 + $0x1b0] sm:$0xff]  }
 0x1ba   :  { %1614 = vst.msk [vmem:[#allocation3] sm:$0x3] %vm1613_vm2, %v1612_v20  ;;  %1630 = vst.msk [vmem:[#allocation3 + $0x2] sm:$0x3] %vm1613_vm2, %v1629_v45  ;;  %3196 = vmatprep.subr.bf16.mxu1 %v3462_v61  ;;  %v3475_v20 = vld [vmem:[%s4604_s3 + $0x1e8] sm:$0xff]   ;;  %v3479_v12 = vld [vmem:[%s4604_s3 + $0x120] sm:$0xff]  }
 0x1bb   :  { %v1606_v0 = vadd.f32 %v4362_v21, %v1595_v23  ;;  %v2730_v62 = vld.sshfl [vmem:[#allocation2 + $0x6] sm:$0x3 pattern:$0x76325410]  ;;  %v3474_v45 = vld [vmem:[%s4604_s3 + $0x128] sm:$0xff]   ;;  %v3483_v6 = vld [vmem:[%s4604_s3 + $0x118] sm:$0xff]  }
 0x1bc   :  { %v2731_v14 = vld.sshfl [vmem:[#allocation2 + $0xa] sm:$0x3 pattern:$0x76325410]  ;;  %v1644_v11 = vld [vmem:[#allocation2 + $0x8] sm:$0x3] }
 0x1bd   :  { %1611 = vst.msk [vmem:[#allocation2 + $0x18] sm:$0xff] %vm1607_vm1, %v1606_v0  ;;  %1655 = vrot.lane.b32.xlu1 %v2731_v14, %s3553_s14  ;;  %1640 = vrot.lane.b32.xlu0 %v2730_v62, %s3553_s14  ;;  %v1659_v28 = vld [vmem:[#allocation2 + $0xc] sm:$0x3]  ;;  %v3461_v21 = vld [vmem:[%s4604_s3] sm:$0xff]   ;;  %v3482_v14 = vld [vmem:[%s4604_s3 + $0x158] sm:$0xff]  }
 0x1be   :  { %1645 = vst.msk [vmem:[#allocation3 + $0x4] sm:$0x3] %vm1613_vm2, %v1644_v11  ;;  %1660 = vst.msk [vmem:[#allocation3 + $0x6] sm:$0x3] %vm1613_vm2, %v1659_v28  ;;  %3175 = vmatpush3.bf16.msra.mxu0 %v3461_v21  ;;  %3197 = vmatpush3.bf16.msra.mxu1 %v3463_v63  ;;  %v3477_v0 = vld [vmem:[%s4604_s3 + $0x1a8] sm:$0xff]   ;;  %v3480_v62 = vld [vmem:[%s4604_s3 + $0x1e0] sm:$0xff]  }
 0x1bf   :  { %v2732_v31 = vld.sshfl [vmem:[#allocation2 + $0xe] sm:$0x3 pattern:$0x76325410]  ;;  %3204 = vmatprep.subr.bf16.mxu0 %v3464_v34  ;;  %3226 = vmatprep.subr.bf16.mxu1 %v3467_v15  ;;  %v3481_v11 = vld [vmem:[%s4604_s3 + $0x1a0] sm:$0xff]   ;;  %v3484_v28 = vld [vmem:[%s4604_s3 + $0x1d8] sm:$0xff]  }
 0x1c0   :  { %v2733_v1 = vld.sshfl [vmem:[#allocation2 + $0x12] sm:$0x3 pattern:$0x76325410]  ;;  %v1674_v2 = vld [vmem:[#allocation2 + $0x10] sm:$0x3] }
 0x1c1   :  { %1670 = vrot.lane.b32.xlu1 %v2732_v31, %s3553_s14  ;;  %1685 = vrot.lane.b32.xlu0 %v2733_v1, %s3553_s14  ;;  %1675 = vst.msk [vmem:[#allocation3 + $0x8] sm:$0x3] %vm1613_vm2, %v1674_v2  ;;  %v1689_v10 = vld [vmem:[#allocation2 + $0x14] sm:$0x3]  ;;  %v3485_v21 = vld [vmem:[%s4604_s3 + $0x198] sm:$0xff]   ;;  %v3490_v63 = vld [vmem:[%s4604_s3 + $0x148] sm:$0xff]  }
 0x1c2   :  { %1690 = vst.msk [vmem:[#allocation3 + $0xa] sm:$0x3] %vm1613_vm2, %v1689_v10  ;;  %v2734_v18 = vld.sshfl [vmem:[#allocation2 + $0x16] sm:$0x3 pattern:$0x76325410] }
 0x1c3   :  { %v3488_v31 = vld [vmem:[%s4604_s3 + $0x1d0] sm:$0xff]   ;;  %v3492_v2 = vld [vmem:[%s4604_s3 + $0x1c8] sm:$0xff]   ;;  %v3494_v34 = vld [vmem:[%s4604_s3 + $0x140] sm:$0xff]  }
 0x1c4   :  { %v2735_v16 = vld.sshfl [vmem:[#allocation2 + $0x1a] sm:$0x3 pattern:$0x76325410]  ;;  %v1704_v17 = vld [vmem:[#allocation2 + $0x18] sm:$0x3] }
 0x1c5   :  { %1700 = vrot.lane.b32.xlu1 %v2734_v18, %s3553_s14  ;;  %1715 = vrot.lane.b32.xlu0 %v2735_v16, %s3553_s14  ;;  %1705 = vst.msk [vmem:[#allocation3 + $0xc] sm:$0x3] %vm1613_vm2, %v1704_v17  ;;  %v1719_v19 = vld [vmem:[#allocation2 + $0x1c] sm:$0x3]  ;;  %v3487_v61 = vld [vmem:[%s4604_s3 + $0x110] sm:$0xff]   ;;  %v3491_v10 = vld [vmem:[%s4604_s3 + $0x108] sm:$0xff]  }
 0x1c6   :  { %1720 = vst.msk [vmem:[#allocation3 + $0xe] sm:$0x3] %vm1613_vm2, %v1719_v19  ;;  %v2736_v22 = vld.sshfl [vmem:[#allocation2 + $0x1e] sm:$0x3 pattern:$0x76325410] }
 0x1c7   :  { %v3489_v1 = vld [vmem:[%s4604_s3 + $0x190] sm:$0xff]   ;;  %v3493_v18 = vld [vmem:[%s4604_s3 + $0x188] sm:$0xff]   ;;  %v3496_v15 = vld [vmem:[%s4604_s3 + $0x1c0] sm:$0xff]  }
 0x1c8   :  { %v3495_v16 = vld [vmem:[%s4604_s3 + $0x100] sm:$0xff]  }
 0x1c9   :  { %1730 = vrot.lane.b32.xlu1 %v2736_v22, %s3553_s14  ;;  %v3497_v17 = vld [vmem:[%s4604_s3 + $0x180] sm:$0xff]  }
 0x22b   :  { %v1625_v24 = vpop.permute.xlu0 %1624 }
 0x22c   :  { %1628 = vst.msk [vmem:[#allocation3] sm:$0x3] %vm1627_vm3, %v1625_v24  ;;  %v3498_v24 = vld [vmem:[%s4606_s5 + $0x18] sm:$0xff]  }
 0x22f   :  { %v1656_v27 = vpop.permute.xlu1 %1655  ;;  %v1641_v29 = vpop.permute.xlu0 %1640 }
 0x230   :  { %1658 = vst.msk [vmem:[#allocation3 + $0x4] sm:$0x3] %vm1627_vm3, %v1656_v27  ;;  %1643 = vst.msk [vmem:[#allocation3 + $0x2] sm:$0x3] %vm1627_vm3, %v1641_v29  ;;  %v3555_v27 = vmov 0.0   ;;  %v3499_v29 = vld [vmem:[%s4606_s5 + $0x10] sm:$0xff]  }
 0x233   :  { %v1671_v38 = vpop.permute.xlu1 %1670  ;;  %v1686_v57 = vpop.permute.xlu0 %1685 }
 0x234   :  { %1673 = vst.msk [vmem:[#allocation3 + $0x6] sm:$0x3] %vm1627_vm3, %v1671_v38  ;;  %1688 = vst.msk [vmem:[#allocation3 + $0x8] sm:$0x3] %vm1627_vm3, %v1686_v57 }
 0x237   :  { %v1701_v4 = vpop.permute.xlu1 %1700  ;;  %v1716_v39 = vpop.permute.xlu0 %1715 }
 0x238   :  { %1703 = vst.msk [vmem:[#allocation3 + $0xa] sm:$0x3] %vm1627_vm3, %v1701_v4  ;;  %1718 = vst.msk [vmem:[#allocation3 + $0xc] sm:$0x3] %vm1627_vm3, %v1716_v39 }
 0x23b   :  { %v1731_v40 = vpop.permute.xlu1 %1730  ;;  %v1734_v47 = vld [vmem:[#allocation3] sm:$0xff] }
 0x23c   :  { %1733 = vst.msk [vmem:[#allocation3 + $0xe] sm:$0x3] %vm1627_vm3, %v1731_v40  ;;  %v1745_v48 = vrot.slane %v1734_v47, %v1744_v42  ;;  %v1738_v49 = vcombine.high %v1734_v47, %v1734_v47  ;;  %v2737_v47 = vld [vmem:[%s4605_s4] ss:$0 sm:$0xff] }
 0x23e   :  { %v1753_v51 = vcombine.high %v1745_v48, %v1745_v48  ;;  %v1752_v37 = vrot.slane %v1738_v49, %v1744_v42  ;;  %v1780_v56 = vpack.c.bf16 %v1745_v48, %v1745_v48 }
 0x240   :  { %v1781_v53 = vpack.c.bf16 %v1753_v51, %v1753_v51  ;;  %v1754_v55 = vcombine.high %v1752_v37, %v1752_v37  ;;  %v1782_v35 = vpack.c.bf16 %v1752_v37, %v1752_v37 }
 0x242   :  { %2339 = vmatprep.mubr.bf16.mxu0 %v1781_v53  ;;  %v1783_v60 = vpack.c.bf16 %v1754_v55, %v1754_v55 }
 0x243   :  { %2340 = vmatmul.mubr.bf16.vlgmr.msra.gmra.mxu0 %v1780_v56  ;;  %v1735_v46 = vld [vmem:[#allocation3 + $0x8] sm:$0xff] }
 0x244   :  { %3205 = vmatpush3.bf16.msra.mxu0 %v3465_v54  ;;  %2379 = vmatprep.mubr.bf16.mxu1 %v1783_v60  ;;  %v4498_v5 = vrot.slane %v1735_v46, %v1744_v42  ;;  %v1755_v7 = vcombine.high %v1735_v46, %v1735_v46 }
 0x245   :  { %2380 = vmatmul.mubr.bf16.vlgmr.msra.gmra.mxu1 %v1782_v35  ;;  %3206 = vmatprep.subr.bf16.mxu0 %v3469_v43 }
 0x246   :  { %3227 = vmatpush3.bf16.msra.mxu1 %v3468_v36  ;;  %v1770_v33 = vcombine.high %v4498_v5, %v4498_v5  ;;  %v1769_v50 = vrot.slane %v1755_v7, %v1744_v42  ;;  %v1784_v19 = vpack.c.bf16 %v4498_v5, %v4498_v5  ;;  %v2802_v7 = vld [vmem:[%s4607_s6] ss:$0 sm:$0xff] }
 0x247   :  { %3228 = vmatprep.subr.bf16.mxu1 %v3471_v8 }
 0x248   :  { %3207 = vmatpush3.bf16.msra.mxu0 %v3470_v3  ;;  %v1785_v23 = vpack.c.bf16 %v1770_v33, %v1770_v33  ;;  %v1771_v44 = vcombine.high %v1769_v50, %v1769_v50  ;;  %v1786_v22 = vpack.c.bf16 %v1769_v50, %v1769_v50 }
 0x249   :  { %3208 = vmatprep.subr.bf16.mxu0 %v3473_v9 }
 0x24a   :  { %3229 = vmatpush3.bf16.msra.mxu1 %v3472_v32  ;;  %2419 = vmatprep.mubr.bf16.mxu0 %v1785_v23  ;;  %v1787_v59 = vpack.c.bf16 %v1771_v44, %v1771_v44 }
 0x24b   :  { %3230 = vmatprep.subr.bf16.mxu1 %v3475_v20 }
 0x24c   :  { %3209 = vmatpush3.bf16.msra.mxu0 %v3474_v45  ;;  %2459 = vmatprep.mubr.bf16.mxu1 %v1787_v59 }
 0x24d   :  { %3210 = vmatprep.subr.bf16.mxu0 %v3478_v58 }
 0x24e   :  { %3231 = vmatpush3.bf16.msra.mxu1 %v3477_v0 }
 0x24f   :  { %3232 = vmatprep.subr.bf16.mxu1 %v3480_v62 }
 0x250   :  { %3211 = vmatpush3.bf16.msra.mxu0 %v3479_v12 }
 0x251   :  { %3212 = vmatprep.subr.bf16.mxu0 %v3482_v14 }
 0x252   :  { %3233 = vmatpush3.bf16.msra.mxu1 %v3481_v11 }
 0x253   :  { %3234 = vmatprep.subr.bf16.mxu1 %v3484_v28 }
 0x254   :  { %3213 = vmatpush3.bf16.msra.mxu0 %v3483_v6 }
 0x255   :  { %3214 = vmatprep.subr.bf16.mxu0 %v3486_v13 }
 0x256   :  { %3235 = vmatpush3.bf16.msra.mxu1 %v3485_v21 }
 0x257   :  { %3236 = vmatprep.subr.bf16.mxu1 %v3488_v31 }
 0x258   :  { %3215 = vmatpush3.bf16.msra.mxu0 %v3487_v61 }
 0x259   :  { %3216 = vmatprep.subr.bf16.mxu0 %v3490_v63 }
 0x25a   :  { %3237 = vmatpush3.bf16.msra.mxu1 %v3489_v1 }
 0x25b   :  { %3238 = vmatprep.subr.bf16.mxu1 %v3492_v2 }
 0x25c   :  { %3217 = vmatpush3.bf16.msra.mxu0 %v3491_v10 }
 0x25d   :  { %3218 = vmatprep.subr.bf16.mxu0 %v3494_v34 }
 0x25e   :  { %3239 = vmatpush3.bf16.msra.mxu1 %v3493_v18 }
 0x25f   :  { %3240 = vmatprep.subr.bf16.mxu1 %v3496_v15 }
 0x260   :  { %3219 = vmatpush3.bf16.msra.mxu0 %v3495_v16 }
 0x261   :  { %3285 = vmatprep.subr.bf16.mxu0 %v3555_v27 }
 0x262   :  { %3241 = vmatpush3.bf16.msra.mxu1 %v3497_v17 }
 0x263   :  { %2420 = vmatmul.mubr.bf16.vlgmr.msra.gmra.mxu0 %v1784_v19 }
 0x264   :  { %3286 = vmatpush3.bf16.msra.mxu0 %v3498_v24  ;;  %3293 = vmatprep.mubr.msk.bf16.mxu0 %vm3556_vm4, %v3555_v27 }
 0x265   :  { %2460 = vmatmul.mubr.bf16.vlgmr.msra.gmra.mxu1 %v1786_v22  ;;  %3287 = vmatprep.subr.bf16.mxu0 %v3555_v27 }
 0x268   :  { %3288 = vmatpush3.bf16.msra.mxu0 %v3499_v29 }
 0x269   :  { %3289 = vmatprep.subr.bf16.mxu0 %v3555_v27 }
 0x26c   :  { %3290 = vmatpush3.bf16.msra.mxu0 %v3500_v41 }
 0x26d   :  { %3291 = vmatprep.subr.bf16.mxu0 %v3555_v27 }
 0x270   :  { %3292 = vmatpush3.bf16.msra.mxu0 %v3501_v30 }
 0x303   :  { %v3176_v52 = vpop.f32.mrf.mxu0 }
 0x305   :  { %v3177_v38 = vpop.f32.mrf.mxu0  ;;  %v3198_v57 = vpop.f32.mrf.mxu1 }
 0x306   :  { %v3178_v40 = vadd.f32 %v3177_v38, %v3176_v52 }
 0x307   :  { %v3179_v26 = vpop.f32.mrf.mxu0  ;;  %v3199_v25 = vpop.f32.mrf.mxu1 }
 0x308   :  { %v2342_v48 = vadd.f32 %v3178_v40, %v2737_v47  ;;  %v3200_v49 = vadd.f32 %v3199_v25, %v3198_v57 }
 0x309   :  { %v3180_v4 = vpop.f32.mrf.mxu0  ;;  %v3201_v39 = vpop.f32.mrf.mxu1 }
 0x30a   :  { %v2382_v54 = vadd.f32 %v3200_v49, %v2342_v48 }
 0x30b   :  { %v3202_v42 = vpop.f32.mrf.mxu1 }
 0x323   :  { %v3220_v51 = vpop.f32.mrf.mxu0 }
 0x325   :  { %v3221_v37 = vpop.f32.mrf.mxu0  ;;  %v3242_v53 = vpop.f32.mrf.mxu1 }
 0x326   :  { %v3222_v55 = vadd.f32 %v3221_v37, %v3220_v51 }
 0x327   :  { %v3223_v56 = vpop.f32.mrf.mxu0  ;;  %v3243_v43 = vpop.f32.mrf.mxu1 }
 0x328   :  { %v2422_v60 = vadd.f32 %v3222_v55, %v2382_v54  ;;  %v3244_v36 = vadd.f32 %v3243_v43, %v3242_v53 }
 0x329   :  { %v3224_v35 = vpop.f32.mrf.mxu0  ;;  %v3245_v8 = vpop.f32.mrf.mxu1 }
 0x32a   :  { %v2462_v46 = vadd.f32 %v3244_v36, %v2422_v60 }
 0x32b   :  { %v3246_v3 = vpop.f32.mrf.mxu1 }
 0x32c   :  { %v2467_v5 = vpack.c.bf16 %v2462_v46, %v2462_v46 }
 0x32e   :  { %3294 = vmatmul.mubr.msk.bf16.vlgmr.msra.gmra.mxu0 %vm1607_vm1, %v2467_v5 }
 0x3ee   :  { %v2544_v9 = vpop.f32.mrf.mxu0 }
 0x3ef   :  { %v2545_v32 = vadd.f32 %v2802_v7, %v2544_v9 }
 0x3f0   :  { %v3295_v33 = vpop.f32.mrf.mxu0 }
 0x3f1   :  { %2551 = vst.msk [vmem:[#allocation4] sm:$0x3] %vm2550_vm5, %v2545_v32 }
 0x3f2   :  { %v2547_v50 = vpop.f32.mrf.mxu0 }
 0x3f3   :  { %3542 = shalt.err (!%p3539_p4)
}
 0x3f4   :  { %2561 = dma.vmem_to_hbm [thread:$0]  %s2559_s27, 32, %s4608_s7, [#allocation5]   ;;  %v3296_v20 = vpop.f32.mrf.mxu0 }
 0x3f5   :  { %3551 = dma.done.wait [#allocation5], 32  }
 0x3f6   :  { %3552 = vsyncadd [#allocation5], 4294967264 }
 0x3f7   :  { %2565 = vsyncpa [#allocation5], 1 }

</bundles_post_ra>
